<compile_context>
chip_gen: v7x
topology: tpu7x:2x2x1
jax: 0.10.0
libtpu: 0.0.40
codegen_flags: <defaults>
</compile_context>

<pallas_src>
import jax
import jax.numpy as jnp
from jax import lax
from jax.experimental import pallas as pl
from jax.experimental.pallas import tpu as pltpu

# Fixed mask region from DummyModel.__init__
X1, X2 = 50, 150
Y1, Y2 = 50, 150


def _dummy_model_kernel(label_ref, img_ref, msk_ref, loss_ref, pm_ref):
    # label_ref : SMEM (B,) f32            (scalar-prefetched pred_label)
    # img_ref   : VMEM (B, C, TH, W) f32
    # msk_ref   : VMEM (B, C, TH, W) f32
    # loss_ref  : VMEM (B, C, TH, W) f32
    # pm_ref    : VMEM (B, 1, TH, W) f32
    h = pl.program_id(0)
    B, C, TH, W = img_ref.shape

    # 1) keep-mask for the zeroed rectangle, built once at (1, 1, TH, W) and
    #    broadcast over B and C with a single multiply per vreg.
    row = lax.broadcasted_iota(jnp.int32, (1, 1, TH, W), 2) + h * TH
    col = lax.broadcasted_iota(jnp.int32, (1, 1, TH, W), 3)
    in_region = (row >= X1) & (row < X2) & (col >= Y1) & (col < Y2)
    keep = jnp.where(in_region, 0.0, 1.0).astype(jnp.float32)

    img = img_ref[...] * keep                       # zeroed image (broadcast over B, C)

    # 2) channel mean, keepdim -> (B, 1, TH, W); tiny C, stays on the VPU.
    pm = jnp.mean(img, axis=1, keepdims=True)

    # 4) clip to [0, 1] and emulate the uint8 round-trip:
    #    (x * 255).to(uint8).to(float32) / 255 == floor(x * 255) / 255 for x in [0, 1]
    pm = jnp.clip(pm, 0.0, 1.0)
    pm = jnp.floor(pm * 255.0) / 255.0
    pm_ref[...] = pm

    # 5) squared-error loss against the (already-zeroed) image.
    loss_ref[...] = (img - msk_ref[...]) ** 2

    # 3) corner label write. The reference assigns the label before the
    #    clip/uint8 round-trip, so quantize the scalar identically.  The patch
    #    slab is built from the in-register `pm` value (no read-back of
    #    pm_ref) and written with a small store-only update.  Only the first
    #    H-tile contains row 0.
    @pl.when(h == 0)
    def _():
        sub = pm[:, :, 0:8, 0:128]                  # (B, 1, 8, 128), already in-register
        r = lax.broadcasted_iota(jnp.int32, (B, 1, 8, 128), 2)
        c = lax.broadcasted_iota(jnp.int32, (B, 1, 8, 128), 3)
        bi = lax.broadcasted_iota(jnp.int32, (B, 1, 8, 128), 0)
        corner = (r == 0) & (c == 0)
        patched = sub
        for i in range(B):                          # tiny static loop, B == 3
            q = jnp.floor(jnp.clip(label_ref[i], 0.0, 1.0) * 255.0) / 255.0
            patched = jnp.where(corner & (bi == i), q, patched)
        pm_ref[0:B, 0:1, 0:8, 0:128] = patched


def dummy_model_forward(image, mask, pred_label):
    """image, mask: (B, C, H, W) f32; pred_label: (B,) f32."""
    B, C, H, W = image.shape

    # Two H-halves when cleanly possible: v7x gets one step per TensorCore,
    # v5e/v6e get two large pipelined DMAs.  Otherwise fall back to whole-H.
    if H % 2 == 0 and (H // 2) % 8 == 0:
        NH = 2
    else:
        NH = 1
    TH = H // NH

    img_spec = pl.BlockSpec((B, C, TH, W), lambda h, lbl: (0, 0, h, 0))
    msk_spec = pl.BlockSpec((B, C, TH, W), lambda h, lbl: (0, 0, h, 0))
    loss_spec = pl.BlockSpec((B, C, TH, W), lambda h, lbl: (0, 0, h, 0))
    pm_spec = pl.BlockSpec((B, 1, TH, W), lambda h, lbl: (0, 0, h, 0))

    itemsize = 4
    bytes_accessed = 3 * B * C * H * W * itemsize + B * 1 * H * W * itemsize
    cost = pl.CostEstimate(
        flops=10 * B * C * H * W, transcendentals=0, bytes_accessed=bytes_accessed)

    loss, pred_mask = pl.pallas_call(
        _dummy_model_kernel,
        out_shape=(
            jax.ShapeDtypeStruct((B, C, H, W), jnp.float32),   # backward_loss
            jax.ShapeDtypeStruct((B, 1, H, W), jnp.float32),   # pred_mask
        ),
        grid_spec=pltpu.PrefetchScalarGridSpec(
            num_scalar_prefetch=1,
            grid=(NH,),
            in_specs=[img_spec, msk_spec],
            out_specs=(loss_spec, pm_spec),
        ),
        compiler_params=pltpu.CompilerParams(
            dimension_semantics=("parallel",)),
        cost_estimate=cost,
    )(pred_label, image, mask)

    return {
        "backward_loss": loss,
        "pred_mask": pred_mask,
        "pred_label": pred_label,
        "visual_loss": {},
        "visual_image": {},
    }


if __name__ == "__main__":
    # Shapes from DummyModel.__init__: B=TEST_BATCH_SIZE=3, C=3, H=W=256
    B, C, H, W = 3, 3, 256, 256
    key = jax.random.PRNGKey(0)
    k_img, k_msk, k_lbl = jax.random.split(key, 3)

    image = jax.random.uniform(k_img, (B, C, H, W), dtype=jnp.float32)
    mask = jax.random.uniform(k_msk, (B, C, H, W), dtype=jnp.float32)
    # pred_label = torch.rand(B) * 0.8  (deterministic here)
    pred_label = jax.random.uniform(k_lbl, (B,), dtype=jnp.float32) * 0.8

    out = dummy_model_forward(image, mask, pred_label)
    jax.block_until_ready(out)

    # Pure-JAX reference for correctness.
    img_zeroed = image.at[:, :, X1:X2, Y1:Y2].set(0.0)
    pm_ref = jnp.mean(img_zeroed, axis=1, keepdims=True)
    pm_ref = pm_ref.at[:, 0, 0, 0].set(pred_label)
    pm_ref = jnp.clip(pm_ref, 0.0, 1.0)
    pm_ref = jnp.floor(pm_ref * 255.0) / 255.0
    loss_ref = (img_zeroed - mask) ** 2

    assert out["backward_loss"].shape == (B, C, H, W)
    assert out["pred_mask"].shape == (B, 1, H, W)
    corner = out["pred_mask"][:, 0, 0, 0]
    expected_corner = jnp.floor(jnp.clip(pred_label, 0.0, 1.0) * 255.0) / 255.0
    assert jnp.allclose(corner, expected_corner, atol=1e-6), "mask label error"
    assert jnp.allclose(out["pred_mask"], pm_ref, atol=1e-6), "pred_mask mismatch"
    assert jnp.allclose(out["backward_loss"], loss_ref, atol=1e-6), "loss mismatch"
    # zeroed region means loss there equals mask**2
    assert jnp.allclose(
        out["backward_loss"][:, :, X1:X2, Y1:Y2],
        mask[:, :, X1:X2, Y1:Y2] ** 2, atol=1e-6)

    print("KERNEL_OK")
</pallas_src>

<mosaic_0001>
module attributes {stable_mosaic.version = 11 : i64} {
  func.func @_dummy_model_kernel(%arg0: i32, %arg1: memref<3xf32, #tpu.memory_space<smem>>, %arg2: memref<3x3x128x256xf32, #tpu.memory_space<vmem>>, %arg3: memref<3x3x128x256xf32, #tpu.memory_space<vmem>>, %arg4: memref<3x3x128x256xf32, #tpu.memory_space<vmem>>, %arg5: memref<3x1x128x256xf32, #tpu.memory_space<vmem>>) attributes {dimension_semantics = [#tpu.dimension_semantics<parallel>], iteration_bounds = array<i64: 2>, scalar_prefetch = 1 : i64, scratch_operands = 0 : i64, tpu.core_type = #tpu.core_type<tc>, window_params = [{transform_indices = @transform_0, window_bounds = array<i64: 3, 3, 128, 256>}, {transform_indices = @transform_1, window_bounds = array<i64: 3, 3, 128, 256>}, {transform_indices = @transform_2, window_bounds = array<i64: 3, 3, 128, 256>}, {transform_indices = @transform_3, window_bounds = array<i64: 3, 1, 128, 256>}]} {
    %0 = tpu.iota {dimensions = array<i32: 2>} : vector<1x1x128x256xi32>
    %c128_i32 = arith.constant 128 : i32
    %1 = arith.muli %arg0, %c128_i32 : i32
    %2 = vector.broadcast %1 : i32 to vector<1x1x128x256xi32>
    %3 = arith.addi %0, %2 : vector<1x1x128x256xi32>
    %4 = tpu.iota {dimensions = array<i32: 3>} : vector<1x1x128x256xi32>
    %c50_i32 = arith.constant 50 : i32
    %5 = vector.broadcast %c50_i32 : i32 to vector<1x1x128x256xi32>
    %6 = arith.cmpi sge, %3, %5 : vector<1x1x128x256xi32>
    %c150_i32 = arith.constant 150 : i32
    %7 = vector.broadcast %c150_i32 : i32 to vector<1x1x128x256xi32>
    %8 = arith.cmpi slt, %3, %7 : vector<1x1x128x256xi32>
    %9 = arith.andi %6, %8 : vector<1x1x128x256xi1>
    %c50_i32_0 = arith.constant 50 : i32
    %10 = vector.broadcast %c50_i32_0 : i32 to vector<1x1x128x256xi32>
    %11 = arith.cmpi sge, %4, %10 : vector<1x1x128x256xi32>
    %12 = arith.andi %9, %11 : vector<1x1x128x256xi1>
    %c150_i32_1 = arith.constant 150 : i32
    %13 = vector.broadcast %c150_i32_1 : i32 to vector<1x1x128x256xi32>
    %14 = arith.cmpi slt, %4, %13 : vector<1x1x128x256xi32>
    %15 = arith.andi %12, %14 : vector<1x1x128x256xi1>
    %cst = arith.constant 0.000000e+00 : f32
    %cst_2 = arith.constant 1.000000e+00 : f32
    %16 = vector.broadcast %cst : f32 to vector<1x1x128x256xf32>
    %17 = vector.broadcast %cst_2 : f32 to vector<1x1x128x256xf32>
    %18 = arith.select %15, %16, %17 : vector<1x1x128x256xi1>, vector<1x1x128x256xf32>
    %c0 = arith.constant 0 : index
    %c0_3 = arith.constant 0 : index
    %c0_4 = arith.constant 0 : index
    %c0_5 = arith.constant 0 : index
    %19 = vector.load %arg2[%c0, %c0_3, %c0_4, %c0_5] : memref<3x3x128x256xf32, #tpu.memory_space<vmem>>, vector<3x3x128x256xf32>
    %20 = vector.broadcast %18 : vector<1x1x128x256xf32> to vector<3x3x128x256xf32>
    %21 = arith.mulf %19, %20 : vector<3x3x128x256xf32>
    %cst_6 = arith.constant dense<0.000000e+00> : vector<3x128x256xf32>
    %22 = vector.multi_reduction <add>, %21, %cst_6 [1] : vector<3x3x128x256xf32> to vector<3x128x256xf32>
    %23 = vector.shape_cast %22 : vector<3x128x256xf32> to vector<3x1x128x256xf32>
    %cst_7 = arith.constant 3.000000e+00 : f32
    %24 = vector.broadcast %cst_7 : f32 to vector<3x1x128x256xf32>
    %25 = arith.divf %23, %24 : vector<3x1x128x256xf32>
    %cst_8 = arith.constant 0.000000e+00 : f32
    %cst_9 = arith.constant 1.000000e+00 : f32
    %26 = vector.broadcast %cst_8 : f32 to vector<3x1x128x256xf32>
    %27 = arith.maximumf %26, %25 : vector<3x1x128x256xf32>
    %28 = vector.broadcast %cst_9 : f32 to vector<3x1x128x256xf32>
    %29 = arith.minimumf %28, %27 : vector<3x1x128x256xf32>
    %cst_10 = arith.constant 2.550000e+02 : f32
    %30 = vector.broadcast %cst_10 : f32 to vector<3x1x128x256xf32>
    %31 = arith.mulf %29, %30 : vector<3x1x128x256xf32>
    %32 = math.floor %31 : vector<3x1x128x256xf32>
    %cst_11 = arith.constant 2.550000e+02 : f32
    %33 = vector.broadcast %cst_11 : f32 to vector<3x1x128x256xf32>
    %34 = arith.divf %32, %33 : vector<3x1x128x256xf32>
    %c0_12 = arith.constant 0 : index
    %c0_13 = arith.constant 0 : index
    %c0_14 = arith.constant 0 : index
    %c0_15 = arith.constant 0 : index
    %35 = vector.load %arg5[%c0_12, %c0_13, %c0_14, %c0_15] : memref<3x1x128x256xf32, #tpu.memory_space<vmem>>, vector<3x1x128x256xf32>
    tpu.vector_store %arg5[%c0_12, %c0_13, %c0_14, %c0_15], %34 {strides = array<i32>} : memref<3x1x128x256xf32, #tpu.memory_space<vmem>>, vector<3x1x128x256xf32>,
    %c0_16 = arith.constant 0 : index
    %c0_17 = arith.constant 0 : index
    %c0_18 = arith.constant 0 : index
    %c0_19 = arith.constant 0 : index
    %36 = vector.load %arg3[%c0_16, %c0_17, %c0_18, %c0_19] : memref<3x3x128x256xf32, #tpu.memory_space<vmem>>, vector<3x3x128x256xf32>
    %37 = arith.subf %21, %36 : vector<3x3x128x256xf32>
    %38 = arith.mulf %37, %37 : vector<3x3x128x256xf32>
    %c0_20 = arith.constant 0 : index
    %c0_21 = arith.constant 0 : index
    %c0_22 = arith.constant 0 : index
    %c0_23 = arith.constant 0 : index
    %39 = vector.load %arg4[%c0_20, %c0_21, %c0_22, %c0_23] : memref<3x3x128x256xf32, #tpu.memory_space<vmem>>, vector<3x3x128x256xf32>
    tpu.vector_store %arg4[%c0_20, %c0_21, %c0_22, %c0_23], %38 {strides = array<i32>} : memref<3x3x128x256xf32, #tpu.memory_space<vmem>>, vector<3x3x128x256xf32>,
    %c0_i32 = arith.constant 0 : i32
    %40 = arith.cmpi eq, %arg0, %c0_i32 : i32
    %41 = arith.extui %40 : i1 to i32
    %c0_i32_24 = arith.constant 0 : i32
    %42 = arith.cmpi ne, %41, %c0_i32_24 : i32
    scf.if %42 {
      %43 = vector.extract_strided_slice %34 {offsets = [0, 0, 0, 0], sizes = [3, 1, 8, 128], strides = [1, 1, 1, 1]} : vector<3x1x128x256xf32> to vector<3x1x8x128xf32>
      %44 = tpu.iota {dimensions = array<i32: 2>} : vector<3x1x8x128xi32>
      %45 = tpu.iota {dimensions = array<i32: 3>} : vector<3x1x8x128xi32>
      %46 = tpu.iota {dimensions = array<i32: 0>} : vector<3x1x8x128xi32>
      %c0_i32_25 = arith.constant 0 : i32
      %47 = vector.broadcast %c0_i32_25 : i32 to vector<3x1x8x128xi32>
      %48 = arith.cmpi eq, %44, %47 : vector<3x1x8x128xi32>
      %c0_i32_26 = arith.constant 0 : i32
      %49 = vector.broadcast %c0_i32_26 : i32 to vector<3x1x8x128xi32>
      %50 = arith.cmpi eq, %45, %49 : vector<3x1x8x128xi32>
      %51 = arith.andi %48, %50 : vector<3x1x8x128xi1>
      %c0_27 = arith.constant 0 : index
      %52 = memref.load %arg1[%c0_27] : memref<3xf32, #tpu.memory_space<smem>>
      %cst_28 = arith.constant 0.000000e+00 : f32
      %cst_29 = arith.constant 1.000000e+00 : f32
      %53 = arith.maximumf %cst_28, %52 : f32
      %54 = arith.minimumf %cst_29, %53 : f32
      %cst_30 = arith.constant 2.550000e+02 : f32
      %55 = arith.mulf %54, %cst_30 : f32
      %56 = math.floor %55 : f32
      %cst_31 = arith.constant 2.550000e+02 : f32
      %57 = arith.divf %56, %cst_31 : f32
      %c0_i32_32 = arith.constant 0 : i32
      %58 = vector.broadcast %c0_i32_32 : i32 to vector<3x1x8x128xi32>
      %59 = arith.cmpi eq, %46, %58 : vector<3x1x8x128xi32>
      %60 = arith.andi %51, %59 : vector<3x1x8x128xi1>
      %61 = vector.broadcast %57 : f32 to vector<3x1x8x128xf32>
      %62 = arith.select %60, %61, %43 : vector<3x1x8x128xi1>, vector<3x1x8x128xf32>
      %c1 = arith.constant 1 : index
      %63 = memref.load %arg1[%c1] : memref<3xf32, #tpu.memory_space<smem>>
      %cst_33 = arith.constant 0.000000e+00 : f32
      %cst_34 = arith.constant 1.000000e+00 : f32
      %64 = arith.maximumf %cst_33, %63 : f32
      %65 = arith.minimumf %cst_34, %64 : f32
      %cst_35 = arith.constant 2.550000e+02 : f32
      %66 = arith.mulf %65, %cst_35 : f32
      %67 = math.floor %66 : f32
      %cst_36 = arith.constant 2.550000e+02 : f32
      %68 = arith.divf %67, %cst_36 : f32
      %c1_i32 = arith.constant 1 : i32
      %69 = vector.broadcast %c1_i32 : i32 to vector<3x1x8x128xi32>
      %70 = arith.cmpi eq, %46, %69 : vector<3x1x8x128xi32>
      %71 = arith.andi %51, %70 : vector<3x1x8x128xi1>
      %72 = vector.broadcast %68 : f32 to vector<3x1x8x128xf32>
      %73 = arith.select %71, %72, %62 : vector<3x1x8x128xi1>, vector<3x1x8x128xf32>
      %c2 = arith.constant 2 : index
      %74 = memref.load %arg1[%c2] : memref<3xf32, #tpu.memory_space<smem>>
      %cst_37 = arith.constant 0.000000e+00 : f32
      %cst_38 = arith.constant 1.000000e+00 : f32
      %75 = arith.maximumf %cst_37, %74 : f32
      %76 = arith.minimumf %cst_38, %75 : f32
      %cst_39 = arith.constant 2.550000e+02 : f32
      %77 = arith.mulf %76, %cst_39 : f32
      %78 = math.floor %77 : f32
      %cst_40 = arith.constant 2.550000e+02 : f32
      %79 = arith.divf %78, %cst_40 : f32
      %c2_i32 = arith.constant 2 : i32
      %80 = vector.broadcast %c2_i32 : i32 to vector<3x1x8x128xi32>
      %81 = arith.cmpi eq, %46, %80 : vector<3x1x8x128xi32>
      %82 = arith.andi %51, %81 : vector<3x1x8x128xi1>
      %83 = vector.broadcast %79 : f32 to vector<3x1x8x128xf32>
      %84 = arith.select %82, %83, %73 : vector<3x1x8x128xi1>, vector<3x1x8x128xf32>
      %c0_41 = arith.constant 0 : index
      %c0_42 = arith.constant 0 : index
      %c0_43 = arith.constant 0 : index
      %c0_44 = arith.constant 0 : index
      %85 = vector.load %arg5[%c0_41, %c0_42, %c0_43, %c0_44] : memref<3x1x128x256xf32, #tpu.memory_space<vmem>>, vector<3x1x8x128xf32>
      tpu.vector_store %arg5[%c0_41, %c0_42, %c0_43, %c0_44], %84 {strides = array<i32>} : memref<3x1x128x256xf32, #tpu.memory_space<vmem>>, vector<3x1x8x128xf32>,
    } else {
    }
    return
  }
  func.func @transform_0(%arg0: i32, %arg1: memref<3xf32, #tpu.memory_space<smem>>) -> (i32, i32, i32, i32) {
    %c0_i32 = arith.constant 0 : i32
    %c0_i32_0 = arith.constant 0 : i32
    %c0_i32_1 = arith.constant 0 : i32
    %c0_i32_2 = arith.constant 0 : i32
    return %c0_i32, %c0_i32_0, %arg0, %c0_i32_1 : i32, i32, i32, i32
  }
  func.func @transform_1(%arg0: i32, %arg1: memref<3xf32, #tpu.memory_space<smem>>) -> (i32, i32, i32, i32) {
    %c0_i32 = arith.constant 0 : i32
    %c0_i32_0 = arith.constant 0 : i32
    %c0_i32_1 = arith.constant 0 : i32
    %c0_i32_2 = arith.constant 0 : i32
    return %c0_i32, %c0_i32_0, %arg0, %c0_i32_1 : i32, i32, i32, i32
  }
  func.func @transform_2(%arg0: i32, %arg1: memref<3xf32, #tpu.memory_space<smem>>) -> (i32, i32, i32, i32) {
    %c0_i32 = arith.constant 0 : i32
    %c0_i32_0 = arith.constant 0 : i32
    %c0_i32_1 = arith.constant 0 : i32
    %c0_i32_2 = arith.constant 0 : i32
    return %c0_i32, %c0_i32_0, %arg0, %c0_i32_1 : i32, i32, i32, i32
  }
  func.func @transform_3(%arg0: i32, %arg1: memref<3xf32, #tpu.memory_space<smem>>) -> (i32, i32, i32, i32) {
    %c0_i32 = arith.constant 0 : i32
    %c0_i32_0 = arith.constant 0 : i32
    %c0_i32_1 = arith.constant 0 : i32
    %c0_i32_2 = arith.constant 0 : i32
    return %c0_i32, %c0_i32_0, %arg0, %c0_i32_1 : i32, i32, i32, i32
  }
}

</mosaic_0001>

<bundles_post_ra>
// kernel: tpu_custom_call.1
= control target key start
LH: loop header
LB: loop body
LE: loop exit
PB: predicated region body
PF: predicated region fallthrough
CT: control target
= control target key end

     0   :  { %s6564_s0 = inlined_call_operand.hbm [shape: f32[3], index: 0, kind: input, shape index: {}]   ;;  %s6565_s1 = inlined_call_operand.hbm [shape: f32[3,3,256,256], index: 1, kind: input, shape index: {}]   ;;  %s6566_s2 = inlined_call_operand.hbm [shape: f32[3,3,256,256], index: 2, kind: input, shape index: {}]   ;;  %s6567_s3 = inlined_call_operand.hbm [shape: f32[3,3,256,256], index: 3, kind: output, shape index: {0}]   ;;  %s6568_s4 = inlined_call_operand.hbm [shape: f32[3,1,256,256], index: 4, kind: output, shape index: {1}]  }
   0x1   :  { %6822 = sst [smem:[#allocation278_spill]] %s6565_s1  ;;  %s3490_s17 = scalar_lea.hbm %s6564_s0, 16 }
   0x2   :  { %p3491_p0 = scmp.ne.s32.totalorder %s6564_s0, %s3490_s17  ;;  %p3494_p1 = scmp.lt.u32.totalorder %s3490_s17, %s6564_s0 }
   0x4   :  { %p3496_p2 = pnand %p3494_p1, %p3491_p0 }
   0x6   :  { %3499 = shalt.err (!%p3496_p2)  }
   0x7   :  { %s3550_s22 = smov [#allocation3]  }
   0x8   :  { %11 = dma.hbm_to_smem %s6564_s0, 16, %s3550_s22, [#allocation2] }
   0x9   :  { %3516 = dma.done.wait [#allocation2], 16 }
   0xa   :  { %3517 = vsyncadd [#allocation2], 4294967280 }
   0xb   :  { %13 = sfence }
   0xc   :  { %14 = vsyncpa [#allocation5], 0 }
   0xd   :  { %16 = vsyncpa [#allocation5 + $0x1], 0 }
   0xe   :  { %17 = vsyncpa [#allocation8], 0 }
   0xf   :  { %19 = vsyncpa [#allocation8 + $0x1], 0 }
  0x10   :  { %20 = vsyncpa [#allocation6], 0 }
  0x11   :  { %22 = vsyncpa [#allocation6 + $0x1], 0 }
  0x12   :  { %23 = vsyncpa [#allocation11], 0 }
  0x13   :  { %25 = vsyncpa [#allocation11 + $0x1], 0  ;;  %s3613_s25 = smov 0   ;;  %s3615_s26 = smov 0  }
  0x14   :  { %s3617_s27 = smov 0   ;;  %s3619_s28 = smov 0  }
  0x15 LB: > { %s3634_s0 = sadd.s32 4294967295, %s3548_s28   ;;  %s3352_s29 = sadd.s32 4294967294, %s3548_s28   ;;  %s3548_s28 = sphi %s3619_s28, %s7358_s28   ;;  %s3544_s27 = sphi %s3617_s27, %s7357_s27   ;;  %s3540_s26 = sphi %s3615_s26, %s7356_s26   ;;  %s3536_s25 = sphi %s3613_s25, %s7355_s25  }
  0x16   : > { %s3638_s30 = sadd.s32 1, %s3548_s28   ;;  %s38_s5 = sadd.s32 1, %s3544_s27 }
  0x17   : > { %s35_s6 = ssub.s32 %s3548_s28, %s3638_s30  ;;  %p45_p3 = scmp.ne.s32.totalorder %s3544_s27, %s3540_s26 }
  0x18   : > { %p36_p4 = scmp.eq.s32.totalorder %s35_s6, 0  ;;  %p46_p5 = scmp.eq.s32.totalorder %s3548_s28, 0 }
  0x19   : > { %p51_p6 = scmp.ne.s32.totalorder %s3540_s26, %s3536_s25  ;;  %p52_p7 = scmp.eq.s32.totalorder %s3634_s0, 0 }
  0x1a   : > { %s3650_s7 = scalar_select %p36_p4, %s3544_s27, %s38_s5  }
  0x1b   : > { %p3652_p8 = por %p46_p5, %p45_p3  ;;  %p3656_p9 = por %p52_p7, %p51_p6 }
  0x1c   : > { %p101_p10 = scmp.eq.s32.totalorder %s3634_s0, 1  ;;  %p107_p11 = scmp.eq.s32.totalorder %s3352_s29, 1 }
  0x1d   : > { %p3354_p0 = scmp.ge.s32.totalorder %s3548_s28, 2 }
  0x1e   : > { %p3661_p12 = por %p101_p10, %p45_p3  ;;  %p3665_p13 = por %p107_p11, %p51_p6 }
  0x1f   : > { %149 = sbr.rel (%p3354_p0) target bundleno = 63 (0x3f), region = 16 }
  0x26   : > { %s3673_s12 = sand.u32 1, %s3544_s27   ;;  %s3379_s14 = sshll.u32 %s3548_s28, 12 }
  0x27   : > { %s3386_s13 = smul.u32 2304, %s3673_s12  ;;  %s3551_s15 = smov 8192  }
  0x28   : > { %3391 = sst [smem:[#allocation13]] (%p3652_p8), %s3551_s15  ;;  %s3552_s20 = smov 4096  }
  0x29   : > { %s3390_s16 = scalar_select %p3652_p8, [#allocation0], [#allocation20] }
  0x2a   : > { %s157_s18 = scalar_lea.vmem [#allocation4], %s3386_s13  ;;  %3392 = sst [smem:[#allocation13 + $0x1]] (%p3652_p8), %s3552_s20 }
  0x2b   : > { %s169_s17 = sld [smem:[%s3390_s16]]   ;;  %s177_s19 = sshll.u32 %s157_s18, 4  ;;  %s178_s19 = int_to_ptr.vmem [resolvable:$true] %s177_s19 }
  0x2c   : > { %s3553_s21 = smov 16   ;;  %s6827_s1 = sld [smem:[#allocation278_spill]] }
  0x2d   : > { %3393 = sst [smem:[#allocation13 + $0x2]] (%p3652_p8), %s3553_s21  ;;  %s3554_s29 = smov 256  }
  0x2e   : > { %3394 = sst [smem:[#allocation13 + $0x3]] (%p3652_p8), %s3554_s29  ;;  %s154_s15 = scalar_lea.sflag [#allocation5], %s3673_s12 }
  0x2f   : > { %3395 = sst [smem:[#allocation13 + $0x4]] (%p3652_p8), %s3554_s29  ;;  %s3555_s16 = smov [#allocation12]  }
  0x30   : > { %3396 = sst [smem:[#allocation13 + $0x5]] (%p3652_p8), %s3553_s21 }
  0x31   : > { %s3358_s5 = sshll.u32 %s169_s17, 26 }
  0x32   : > { %s164_s24 = scalar_lea.hbm %s6827_s1, %s3379_s14  ;;  %s3359_s6 = sadd.s32 134217728, %s3358_s5 }
  0x33   : > { %3397 = dma.general (%p3652_p8), %s164_s24, 36864, %s178_s19, %s154_s15, %s3555_s16, [#allocation13], %s3359_s6, 0  }
  0x34   : > { %s3398_s18 = scalar_select %p3652_p8, [#allocation0], [#allocation21] }
  0x35   : > { %s204_s20 = scalar_lea.vmem [#allocation7], %s3386_s13  ;;  %s3556_s17 = smov 8192  }
  0x36   : > { %s224_s22 = sshll.u32 %s204_s20, 4  ;;  %s216_s21 = sld [smem:[%s3398_s18]]   ;;  %s225_s22 = int_to_ptr.vmem [resolvable:$true] %s224_s22 }
  0x37   : > { %3399 = sst [smem:[#allocation15]] (%p3652_p8), %s3556_s17  ;;  %s3557_s23 = smov 4096  }
  0x38   : > { %3400 = sst [smem:[#allocation15 + $0x1]] (%p3652_p8), %s3557_s23  ;;  %s211_s29 = scalar_lea.hbm %s6566_s2, %s3379_s14 }
  0x39   : > { %s3558_s5 = smov 16   ;;  %s3559_s13 = smov 256  }
  0x3a   : > { %3401 = sst [smem:[#allocation15 + $0x2]] (%p3652_p8), %s3558_s5  ;;  %s201_s16 = scalar_lea.sflag [#allocation8], %s3673_s12 }
  0x3b   : > { %3402 = sst [smem:[#allocation15 + $0x3]] (%p3652_p8), %s3559_s13  ;;  %s3560_s18 = smov [#allocation14]  }
  0x3c   : > { %3403 = sst [smem:[#allocation15 + $0x4]] (%p3652_p8), %s3559_s13  ;;  %s3363_s6 = sshll.u32 %s216_s21, 26 }
  0x3d   : > { %3404 = sst [smem:[#allocation15 + $0x5]] (%p3652_p8), %s3558_s5  ;;  %s3364_s15 = sadd.s32 134217728, %s3363_s6 }
  0x3e   : > { %3405 = dma.general (%p3652_p8), %s211_s29, 36864, %s225_s22, %s201_s16, %s3560_s18, [#allocation15], %s3364_s15, 0  }
  0x3f PF: > { %p3365_p1 = scmp.ge.s32.totalorder %s3548_s28, 1  ;;  %p245_p2 = scmp.lt.s32.totalorder %s3548_s28, 3 }
  0x41   : > { %p246_p3 = pnand %p3365_p1, %p245_p2 }
  0x43   : > { %249 = sbr.rel (%p246_p3) target bundleno = 605 (0x25d), region = 28 }
  0x4a   : > { %s3724_s14 = sand.u32 1, %s3540_s26  }
  0x4b   : > { %s3727_s20 = smul.u32 2304, %s3724_s14  ;;  %s252_s12 = scalar_lea.sflag [#allocation5], %s3724_s14 }
  0x4d   : > { %s3731_s21 = scalar_lea.vmem [#allocation4], %s3727_s20 }
  0x4e   : > { %3519 = dma.done.wait (%p3656_p9), %s252_s12, 36864  }
  0x4f   : > { %3521 = vsyncadd (%p3656_p9), %s252_s12, 4294930432  ;;  %s261_s8 = scalar_lea.sflag [#allocation8], %s3724_s14  ;;  %s3739_s22 = scalar_lea.vmem [#allocation7], %s3727_s20 }
  0x50   : > { %3523 = dma.done.wait (%p3656_p9), %s261_s8, 36864  }
  0x51   : > { %3525 = vsyncadd (%p3656_p9), %s261_s8, 4294930432  ;;  %v301_v0 = vlaneseq  ;;  %s3366_s17 = sshll.u32 %s3634_s0, 7  ;;  %v487_v12 = vld [vmem:[%s3731_s21] sm:$0xff]  ;;  %v488_v17 = vld [vmem:[%s3731_s21 + $0x8] sm:$0xff]  ;;  %v6569_v20 = vmov 1.0   ;;  %s3389_s9 = smul.u32 768, %s3724_s14 }
  0x52   : > { %v3746_v1 = vstv %s3366_s17  ;;  %v519_v13 = vld [vmem:[%s3731_s21 + $0x100] sm:$0xff]  ;;  %v520_v22 = vld [vmem:[%s3731_s21 + $0x108] sm:$0xff]  ;;  %v489_v29 = vld [vmem:[%s3731_s21 + $0x10] sm:$0xff]  ;;  %s5633_s19 = scalar_lea.vmem [#allocation9], %s3727_s20  ;;  %p3367_p4 = scmp.ne.s32.totalorder %s3634_s0, 0 }
  0x53   : > { %v3748_v2 = vshrl.u32 %v301_v0, 7  ;;  %v3750_v3 = vand.u32 127, %v301_v0  ;;  %v551_v16 = vld [vmem:[%s3731_s21 + $0x200] sm:$0xff]  ;;  %v552_v23 = vld [vmem:[%s3731_s21 + $0x208] sm:$0xff]  ;;  %v521_v30 = vld [vmem:[%s3731_s21 + $0x110] sm:$0xff]  ;;  %s3980_s23 = scalar_lea.vmem [#allocation10], %s3389_s9 }
  0x54   : > { %v553_v34 = vld [vmem:[%s3731_s21 + $0x210] sm:$0xff]  ;;  %v490_v38 = vld [vmem:[%s3731_s21 + $0x18] sm:$0xff]  ;;  %v491_v47 = vld [vmem:[%s3731_s21 + $0x20] sm:$0xff]  ;;  %s3088_s24 = sld [smem:[#allocation3]] (!%p3367_p4)  ;;  %s3368_s29 = sld [smem:[#allocation3 + $0x1]] (!%p3367_p4) }
  0x55   : > { %6828 = vst [vmem:[#allocation27_spill] sm:$0xff] %v3748_v2  ;;  %6829 = vst [vmem:[#allocation28_spill] sm:$0xff] %v3750_v3  ;;  %v320_v4 = vadd.s32 %v3746_v1, %v3748_v2  ;;  %vm387_vm0 = vcmp.ge.s32.totalorder %v3750_v3, 50  ;;  %v3756_v5 = vadd.s32 128, %v3750_v3  ;;  %v303_v6 = vadd.s32 8, %v3748_v2  ;;  %v522_v39 = vld [vmem:[%s3731_s21 + $0x118] sm:$0xff] }
  0x56   : > { %v304_v7 = vadd.s32 16, %v3748_v2  ;;  %v305_v8 = vadd.s32 24, %v3748_v2  ;;  %v306_v9 = vadd.s32 32, %v3748_v2  ;;  %v307_v10 = vadd.s32 40, %v3748_v2  ;;  %v554_v44 = vld [vmem:[%s3731_s21 + $0x218] sm:$0xff]  ;;  %v523_v48 = vld [vmem:[%s3731_s21 + $0x120] sm:$0xff] }
  0x57   : > { %vm339_vm1 = vcmp.ge.s32.totalorder %v320_v4, 50  ;;  %vm355_vm2 = vcmp.lt.s32.totalorder %v320_v4, 150  ;;  %vm422_vm3 = vcmp.lt.s32.totalorder %v3756_v5, 150  ;;  %v321_v11 = vadd.s32 %v3746_v1, %v303_v6  ;;  %v555_v53 = vld [vmem:[%s3731_s21 + $0x220] sm:$0xff]  ;;  %v492_v54 = vld [vmem:[%s3731_s21 + $0x28] sm:$0xff]  ;;  %v518_v3 = vld [vmem:[%s3731_s21 + $0xf8] sm:$0xff] }
  0x58   : > { %vm371_vm4 = vmand %vm339_vm1, %vm355_vm2  ;;  %v322_v14 = vadd.s32 %v3746_v1, %v304_v7  ;;  %v323_v15 = vadd.s32 %v3746_v1, %v305_v8  ;;  %v3774_v18 = vadd.s32 %v3746_v1, %v306_v9  ;;  %v3777_v19 = vadd.s32 %v3746_v1, %v307_v10  ;;  %v524_v59 = vld [vmem:[%s3731_s21 + $0x128] sm:$0xff]  ;;  %s3369_s5 = sld [smem:[#allocation3 + $0x2]] (!%p3367_p4)  ;;  %s3562_s13 = smov (!%p3367_p4), 0.0  }
  0x59   : > { %vm389_vm5 = vmand %vm371_vm4, %vm387_vm0  ;;  %vm340_vm6 = vcmp.ge.s32.totalorder %v321_v11, 50  ;;  %vm356_vm7 = vcmp.lt.s32.totalorder %v321_v11, 150  ;;  %v3787_v24 = vadd.s32 48, %v3748_v2  ;;  %v3818_v35 = vadd.s32 56, %v3748_v2  ;;  %v556_v4 = vld [vmem:[%s3731_s21 + $0x228] sm:$0xff]  ;;  %s3563_s15 = smov (!%p3367_p4), 1.0  }
  0x5a   : > { %v3780_v21 = vsel %vm389_vm5, 0.0, %v6569_v20  ;;  %vm424_vm8 = vmand %vm371_vm4, %vm422_vm3  ;;  %vm341_vm9 = vcmp.ge.s32.totalorder %v322_v14, 50  ;;  %vm357_vm10 = vcmp.lt.s32.totalorder %v322_v14, 150  ;;  %vm342_vm14 = vcmp.ge.s32.totalorder %v323_v15, 50  ;;  %v493_v14 = vld [vmem:[%s3731_s21 + $0x30] sm:$0xff]  ;;  %s3089_s6 = smax.f32 (!%p3367_p4), %s3562_s13, %s3088_s24  ;;  %s3103_s18 = smax.f32 (!%p3367_p4), %s3562_s13, %s3368_s29 }
  0x5b   : > { %v3790_v25 = vmul.f32 %v487_v12, %v3780_v21  ;;  %v3793_v26 = vmul.f32 %v519_v13, %v3780_v21  ;;  %v3796_v27 = vmul.f32 %v551_v16, %v3780_v21  ;;  %v3799_v28 = vsel %vm424_vm8, 0.0, %v6569_v20  ;;  %vm372_vm11 = vmand %vm340_vm6, %vm356_vm7  ;;  %s3090_s16 = smin.f32 (!%p3367_p4), %s3563_s15, %s3089_s6  ;;  %s3104_s12 = smin.f32 (!%p3367_p4), %s3563_s15, %s3103_s18 }
  0x5c   : > { %v3806_v31 = vmul.f32 %v488_v17, %v3799_v28  ;;  %v3809_v32 = vmul.f32 %v520_v22, %v3799_v28  ;;  %v3812_v33 = vmul.f32 %v552_v23, %v3799_v28  ;;  %vm391_vm12 = vmand %vm372_vm11, %vm387_vm0  ;;  %vm358_vm15 = vcmp.lt.s32.totalorder %v323_v15, 150  ;;  %v525_v15 = vld [vmem:[%s3731_s21 + $0x130] sm:$0xff]  ;;  %s3091_s20 = smul.f32 (!%p3367_p4), 255.0, %s3090_s16 }
  0x5d   : > { %6830 = vst [vmem:[#allocation29_spill] sm:$0xff] %v3793_v26  ;;  %6831 = vst [vmem:[#allocation30_spill] sm:$0xff] %v3796_v27  ;;  %v1063_v36 = vadd.f32 %v3793_v26, %v3790_v25  ;;  %v3823_v37 = vsel %vm391_vm12, 0.0, %v6569_v20  ;;  %vm343_vm4 = vcmp.ge.s32.totalorder %v3774_v18, 50  ;;  %vm359_vm5 = vcmp.lt.s32.totalorder %v3774_v18, 150  ;;  %v526_v18 = vld [vmem:[%s3731_s21 + $0x138] sm:$0xff] }
  0x5e   : > { %6832 = vst [vmem:[#allocation31_spill] sm:$0xff] %v3809_v32  ;;  %6833 = vst [vmem:[#allocation32_spill] sm:$0xff] %v3812_v33  ;;  %v1065_v40 = vadd.f32 %v3809_v32, %v3806_v31  ;;  %v3832_v41 = vmul.f32 %v489_v29, %v3823_v37  ;;  %v3835_v42 = vmul.f32 %v521_v30, %v3823_v37  ;;  %vm344_vm8 = vcmp.ge.s32.totalorder %v3777_v19, 50  ;;  %s3115_s8 = smax.f32 (!%p3367_p4), %s3562_s13, %s3369_s5 }
  0x5f   : > { %vm426_vm13 = vmand %vm372_vm11, %vm422_vm3  ;;  %v3838_v43 = vmul.f32 %v553_v34, %v3823_v37  ;;  %v1064_v45 = vadd.f32 %v1063_v36, %v3796_v27  ;;  %s3116_s17 = smin.f32 (!%p3367_p4), %s3563_s15, %s3115_s8 }
  0x60   : > { %6834 = vst [vmem:[#allocation33_spill] sm:$0xff] %v3835_v42  ;;  %vm373_vm1 = vmand %vm341_vm9, %vm357_vm10  ;;  %v3845_v46 = vsel %vm426_vm13, 0.0, %v6569_v20  ;;  %v1066_v49 = vadd.f32 %v1065_v40, %v3812_v33  ;;  %v1067_v50 = vadd.f32 %v3835_v42, %v3832_v41  ;;  %vm360_vm9 = vcmp.lt.s32.totalorder %v3777_v19, 150  ;;  %v495_v19 = vld [vmem:[%s3731_s21 + $0x40] sm:$0xff]  ;;  %s3117_s6 = smul.f32 (!%p3367_p4), 255.0, %s3116_s17 }
  0x61   : > { %6835 = vst [vmem:[#allocation34_spill] sm:$0xff] %v3838_v43  ;;  %vm393_vm2 = vmand %vm373_vm1, %vm387_vm0  ;;  %v3857_v51 = vmul.f32 %v490_v38, %v3845_v46  ;;  %v3860_v52 = vmul.f32 %v522_v39, %v3845_v46  ;;  %v1256_v55 = vmul.f32 0.33333334, %v1064_v45  ;;  %v3867_v56 = vmul.f32 %v554_v44, %v3845_v46  ;;  %v557_v38 = vld [vmem:[%s3731_s21 + $0x230] sm:$0xff] }
  0x62   : > { %vm428_vm6 = vmand %vm373_vm1, %vm422_vm3  ;;  %v3870_v57 = vsel %vm393_vm2, 0.0, %v6569_v20  ;;  %v1257_v61 = vmul.f32 0.33333334, %v1066_v49  ;;  %v1068_v62 = vadd.f32 %v1067_v50, %v3838_v43  ;;  %s3118_s29 = sfloor.f32 (!%p3367_p4), %s3117_s6 }
  0x63   : > { %6836 = vst [vmem:[#allocation35_spill] sm:$0xff] %v3860_v52  ;;  %6837 = vst [vmem:[#allocation36_spill] sm:$0xff] %v3867_v56  ;;  %v3873_v58 = vsel %vm428_vm6, 0.0, %v6569_v20  ;;  %v1069_v63 = vadd.f32 %v3860_v52, %v3857_v51  ;;  %v3888_v0 = vmul.f32 %v491_v47, %v3870_v57  ;;  %v1352_v6 = vmax.f32 %v1256_v55, 0.0  ;;  %s3121_s16 = smul.f32 (!%p3367_p4), 0.003921569, %s3118_s29 }
  0x64   : > { %vm3878_vm7 = vmand %vm342_vm14, %vm358_vm15  ;;  %v3896_v7 = vmul.f32 %v523_v48, %v3870_v57  ;;  %v3899_v8 = vmul.f32 %v555_v53, %v3870_v57  ;;  %v3902_v9 = vmul.f32 %v492_v54, %v3873_v58  ;;  %v1353_v10 = vmax.f32 %v1257_v61, 0.0 }
  0x65   : > { %vm395_vm10 = vmand %vm3878_vm7, %vm387_vm0  ;;  %v1258_v11 = vmul.f32 0.33333334, %v1068_v62  ;;  %v1070_v12 = vadd.f32 %v1069_v63, %v3867_v56  ;;  %v3906_v13 = vmul.f32 %v524_v59, %v3873_v58  ;;  %v1448_v16 = vmin.f32 %v1352_v6, 1.0 }
  0x66   : > { %6840 = vst [vmem:[#allocation37_spill] sm:$0xff] %v3896_v7  ;;  %6841 = vst [vmem:[#allocation38_spill] sm:$0xff] %v3899_v8  ;;  %v1071_v17 = vadd.f32 %v3896_v7, %v3888_v0  ;;  %v3914_v22 = vmul.f32 %v556_v4, %v3873_v58  ;;  %v3917_v23 = vsel %vm395_vm10, 0.0, %v6569_v20  ;;  %v1449_v29 = vmin.f32 %v1353_v10, 1.0  ;;  %v494_v10 = vld [vmem:[%s3731_s21 + $0x38] sm:$0xff] }
  0x67   : > { %6842 = vst [vmem:[#allocation39_spill] sm:$0xff] %v3906_v13  ;;  %v1354_v30 = vmax.f32 %v1258_v11, 0.0  ;;  %v1259_v34 = vmul.f32 0.33333334, %v1070_v12  ;;  %v1073_v36 = vadd.f32 %v3906_v13, %v3902_v9  ;;  %v1544_v39 = vmul.f32 255.0, %v1448_v16  ;;  %vm3933_vm11 = vmand %vm3878_vm7, %vm422_vm3  ;;  %v558_v16 = vld [vmem:[%s3731_s21 + $0x238] sm:$0xff] }
  0x68   : > { %6843 = vst [vmem:[#allocation40_spill] sm:$0xff] %v3914_v22  ;;  %v1072_v40 = vadd.f32 %v1071_v17, %v3899_v8  ;;  %v3924_v44 = vmul.f32 %v493_v14, %v3917_v23  ;;  %v3927_v45 = vmul.f32 %v525_v15, %v3917_v23  ;;  %v1545_v48 = vmul.f32 255.0, %v1449_v29  ;;  %vm3942_vm12 = vmand %vm343_vm4, %vm359_vm5  ;;  %v496_v17 = vld [vmem:[%s3731_s21 + $0x48] sm:$0xff] }
  0x69   : > { %v1450_v49 = vmin.f32 %v1354_v30, 1.0  ;;  %v1355_v50 = vmax.f32 %v1259_v34, 0.0  ;;  %v1074_v53 = vadd.f32 %v1073_v36, %v3914_v22  ;;  %v1640_v55 = vfloor.f32 %v1544_v39  ;;  %vm3966_vm13 = vmand %vm3942_vm12, %vm387_vm0 }
  0x6a   : > { %6844 = vst [vmem:[#allocation41_spill] sm:$0xff] %v3927_v45  ;;  %v1260_v59 = vmul.f32 0.33333334, %v1072_v40  ;;  %v3947_v60 = vmul.f32 %v557_v38, %v3917_v23  ;;  %v1075_v61 = vadd.f32 %v3927_v45, %v3924_v44  ;;  %v1641_v62 = vfloor.f32 %v1545_v48  ;;  %vm3974_vm14 = vmand %vm344_vm8, %vm360_vm9 }
  0x6b   : > { %v1546_v63 = vmul.f32 255.0, %v1450_v49  ;;  %v1451_v4 = vmin.f32 %v1355_v50, 1.0  ;;  %v1261_v6 = vmul.f32 0.33333334, %v1074_v53  ;;  %v3953_v11 = vmul.f32 0.003921569, %v1640_v55  ;;  %vm4001_vm15 = vmand %vm3942_vm12, %vm422_vm3 }
  0x6c   : > { %6849 = vst [vmem:[#allocation42_spill] sm:$0xff] %v3947_v60  ;;  %v1356_v12 = vmax.f32 %v1260_v59, 0.0  ;;  %v1076_v14 = vadd.f32 %v1075_v61, %v3947_v60  ;;  %v3959_v15 = vsel %vm3933_vm11, 0.0, %v6569_v20  ;;  %v1738_v29 = vmul.f32 0.003921569, %v1641_v62  ;;  %v527_v49 = vld [vmem:[%s3731_s21 + $0x140] sm:$0xff]  ;;  %vm4016_vm1 = vmand %vm3974_vm14, %vm387_vm0 }
  0x6d   : > { %6850 = vst [vmem:[#allocation43_spill] sm:$0xff] %v3953_v11  ;;  %v1642_v30 = vfloor.f32 %v1546_v63  ;;  %v1547_v34 = vmul.f32 255.0, %v1451_v4  ;;  %v1357_v36 = vmax.f32 %v1261_v6, 0.0  ;;  %1833 = vst [vmem:[%s3980_s23] sm:$0xff] %v3953_v11  ;;  %v3985_v47 = vmul.f32 %v494_v10, %v3959_v15  ;;  %v559_v61 = vld [vmem:[%s3731_s21 + $0x240] sm:$0xff]  ;;  %v561_v62 = vld [vmem:[%s3731_s21 + $0x250] sm:$0xff] }
  0x6e   : > { %v1452_v39 = vmin.f32 %v1356_v12, 1.0  ;;  %v1262_v40 = vmul.f32 0.33333334, %v1076_v14  ;;  %v3988_v48 = vmul.f32 %v526_v18, %v3959_v15  ;;  %1834 = vst [vmem:[%s3980_s23 + $0x8] sm:$0xff] %v1738_v29  ;;  %v3994_v59 = vmul.f32 %v558_v16, %v3959_v15  ;;  %vm4057_vm2 = vmand %vm3974_vm14, %vm422_vm3  ;;  %v562_v60 = vld [vmem:[%s3731_s21 + $0x258] sm:$0xff] }
  0x6f   : > { %6855 = vst [vmem:[#allocation44_spill] sm:$0xff] %v3985_v47  ;;  %v1739_v50 = vmul.f32 0.003921569, %v1642_v30  ;;  %v1643_v53 = vfloor.f32 %v1547_v34  ;;  %v1453_v55 = vmin.f32 %v1357_v36, 1.0  ;;  %v4010_v10 = vsel %vm3966_vm13, 0.0, %v6569_v20 }
  0x70   : > { %6856 = vst [vmem:[#allocation45_spill] sm:$0xff] %v3988_v48  ;;  %6857 = vst [vmem:[#allocation46_spill] sm:$0xff] %v3994_v59  ;;  %v1548_v63 = vmul.f32 255.0, %v1452_v39  ;;  %v1358_v4 = vmax.f32 %v1262_v40, 0.0  ;;  %v1077_v6 = vadd.f32 %v3988_v48, %v3985_v47  ;;  %v4022_v14 = vmul.f32 %v495_v19, %v4010_v10  ;;  %v528_v39 = vld [vmem:[%s3731_s21 + $0x148] sm:$0xff] }
  0x71   : > { %1835 = vst [vmem:[%s3980_s23 + $0x10] sm:$0xff] %v1739_v50  ;;  %v1740_v18 = vmul.f32 0.003921569, %v1643_v53  ;;  %v1549_v12 = vmul.f32 255.0, %v1453_v55  ;;  %v4025_v16 = vmul.f32 %v527_v49, %v4010_v10  ;;  %v4030_v36 = vmul.f32 %v559_v61, %v4010_v10  ;;  %v560_v40 = vld [vmem:[%s3731_s21 + $0x248] sm:$0xff]  ;;  %v497_v55 = vld [vmem:[%s3731_s21 + $0x50] sm:$0xff] }
  0x72   : > { %6862 = vst [vmem:[#allocation47_spill] sm:$0xff] %v4022_v14  ;;  %v1644_v29 = vfloor.f32 %v1548_v63  ;;  %v1454_v30 = vmin.f32 %v1358_v4, 1.0  ;;  %v1078_v34 = vadd.f32 %v1077_v6, %v3994_v59  ;;  %v4040_v49 = vsel %vm4001_vm15, 0.0, %v6569_v20  ;;  %v529_v61 = vld [vmem:[%s3731_s21 + $0x150] sm:$0xff] }
  0x73   : > { %6863 = vst [vmem:[#allocation48_spill] sm:$0xff] %v4025_v16  ;;  %6864 = vst [vmem:[#allocation49_spill] sm:$0xff] %v4030_v36  ;;  %v1645_v50 = vfloor.f32 %v1549_v12  ;;  %v1079_v19 = vadd.f32 %v4025_v16, %v4022_v14  ;;  %v4045_v53 = vsel %vm4016_vm1, 0.0, %v6569_v20 }
  0x74   : > { %1836 = vst [vmem:[%s3980_s23 + $0x18] sm:$0xff] %v1740_v18  ;;  %v1741_v63 = vmul.f32 0.003921569, %v1644_v29  ;;  %v1550_v4 = vmul.f32 255.0, %v1454_v30  ;;  %v1263_v6 = vmul.f32 0.33333334, %v1078_v34  ;;  %v4050_v18 = vmul.f32 %v496_v17, %v4040_v49 }
  0x75   : > { %v1742_v12 = vmul.f32 0.003921569, %v1645_v50  ;;  %v1080_v29 = vadd.f32 %v1079_v19, %v4030_v36  ;;  %v4063_v30 = vmul.f32 %v528_v39, %v4040_v49  ;;  %v4066_v34 = vmul.f32 %v560_v40, %v4040_v49  ;;  %v498_v17 = vld [vmem:[%s3731_s21 + $0x58] sm:$0xff] }
  0x76   : > { %6865 = vst [vmem:[#allocation50_spill] sm:$0xff] %v4050_v18  ;;  %1837 = vst [vmem:[%s3980_s23 + $0x20] sm:$0xff] %v1741_v63  ;;  %v1646_v20 = vfloor.f32 %v1550_v4  ;;  %v1359_v11 = vmax.f32 %v1263_v6, 0.0  ;;  %v4071_v59 = vmul.f32 %v497_v55, %v4045_v53  ;;  %v4074_v38 = vmul.f32 %v529_v61, %v4045_v53  ;;  %v530_v50 = vld [vmem:[%s3731_s21 + $0x158] sm:$0xff] }
  0x77   : > { %6868 = vst [vmem:[#allocation51_spill] sm:$0xff] %v4063_v30  ;;  %6869 = vst [vmem:[#allocation52_spill] sm:$0xff] %v4066_v34  ;;  %v1264_v19 = vmul.f32 0.33333334, %v1080_v29  ;;  %v1081_v39 = vadd.f32 %v4063_v30, %v4050_v18  ;;  %v4082_v40 = vmul.f32 %v561_v62, %v4045_v53  ;;  %v6873_v63 = vmov 1.0  }
  0x78   : > { %6870 = vst [vmem:[#allocation53_spill] sm:$0xff] %v4071_v59  ;;  %6871 = vst [vmem:[#allocation54_spill] sm:$0xff] %v4074_v38  ;;  %v4087_v4 = vsel %vm4057_vm2, 0.0, %v6873_v63  ;;  %v1743_v55 = vmul.f32 0.003921569, %v1646_v20  ;;  %v1455_v6 = vmin.f32 %v1359_v11, 1.0  ;;  %v1083_v61 = vadd.f32 %v4074_v38, %v4071_v59 }
  0x79   : > { %1838 = vst [vmem:[%s3980_s23 + $0x28] sm:$0xff] %v1742_v12  ;;  %6872 = vst [vmem:[#allocation55_spill] sm:$0xff] %v4082_v40  ;;  %v4092_v36 = vmul.f32 %v498_v17, %v4087_v4  ;;  %v1360_v12 = vmax.f32 %v1264_v19, 0.0  ;;  %v1082_v29 = vadd.f32 %v1081_v39, %v4066_v34  ;;  %v4096_v62 = vmul.f32 %v530_v50, %v4087_v4 }
  0x7a   : > { %v4099_v22 = vmul.f32 %v562_v60, %v4087_v4  ;;  %1839 = vst [vmem:[%s3980_s23 + $0x30] sm:$0xff] %v1743_v55  ;;  %v1551_v54 = vmul.f32 255.0, %v1455_v6  ;;  %v1084_v20 = vadd.f32 %v1083_v61, %v4082_v40  ;;  %v326_v11 = vadd.s32 %v3746_v1, %v3787_v24  ;;  %v499_v6 = vld [vmem:[%s3731_s21 + $0x60] sm:$0xff] }
  0x7b   : > { %6874 = vst [vmem:[#allocation56_spill] sm:$0xff] %v4092_v36  ;;  %6875 = vst [vmem:[#allocation57_spill] sm:$0xff] %v4096_v62  ;;  %v327_v17 = vadd.s32 %v3746_v1, %v3818_v35  ;;  %v1456_v19 = vmin.f32 %v1360_v12, 1.0  ;;  %v1265_v39 = vmul.f32 0.33333334, %v1082_v29  ;;  %v1085_v50 = vadd.f32 %v4096_v62, %v4092_v36  ;;  %v531_v35 = vld [vmem:[%s3731_s21 + $0x160] sm:$0xff] }
  0x7c   : > { %6876 = vst [vmem:[#allocation58_spill] sm:$0xff] %v4099_v22  ;;  %v310_v60 = vadd.s32 64, %v3748_v2  ;;  %v1647_v34 = vfloor.f32 %v1551_v54  ;;  %v1266_v55 = vmul.f32 0.33333334, %v1084_v20  ;;  %vm345_vm4 = vcmp.ge.s32.totalorder %v326_v11, 50  ;;  %v563_v12 = vld [vmem:[%s3731_s21 + $0x260] sm:$0xff] }
  0x7d   : > { %vm361_vm5 = vcmp.lt.s32.totalorder %v326_v11, 150  ;;  %v1552_v61 = vmul.f32 255.0, %v1456_v19  ;;  %v1361_v40 = vmax.f32 %v1265_v39, 0.0  ;;  %v1086_v24 = vadd.f32 %v1085_v50, %v4099_v22  ;;  %v532_v50 = vld [vmem:[%s3731_s21 + $0x168] sm:$0xff] }
  0x7e   : > { %vm377_vm6 = vmand %vm345_vm4, %vm361_vm5  ;;  %vm346_vm7 = vcmp.ge.s32.totalorder %v327_v17, 50  ;;  %v1744_v29 = vmul.f32 0.003921569, %v1647_v34  ;;  %v1362_v8 = vmax.f32 %v1266_v55, 0.0  ;;  %vm362_vm9 = vcmp.lt.s32.totalorder %v327_v17, 150  ;;  %v500_v34 = vld [vmem:[%s3731_s21 + $0x68] sm:$0xff] }
  0x7f   : > { %vm401_vm8 = vmand %vm377_vm6, %vm387_vm0  ;;  %v4117_v54 = vadd.s32 %v3746_v1, %v310_v60  ;;  %v1648_v20 = vfloor.f32 %v1552_v61  ;;  %v1457_v11 = vmin.f32 %v1361_v40, 1.0  ;;  %v1267_v19 = vmul.f32 0.33333334, %v1086_v24  ;;  %v564_v61 = vld [vmem:[%s3731_s21 + $0x268] sm:$0xff] }
  0x80   : > { %v4120_v39 = vsel %vm401_vm8, 0.0, %v6873_v63  ;;  %vm436_vm10 = vmand %vm377_vm6, %vm422_vm3  ;;  %1840 = vst [vmem:[%s3980_s23 + $0x38] sm:$0xff] %v1744_v29  ;;  %v1458_v55 = vmin.f32 %v1362_v8, 1.0 }
  0x81   : > { %v4128_v22 = vmul.f32 %v499_v6, %v4120_v39  ;;  %v4131_v60 = vmul.f32 %v531_v35, %v4120_v39  ;;  %v4134_v40 = vmul.f32 %v563_v12, %v4120_v39  ;;  %vm4139_vm11 = vmand %vm346_vm7, %vm362_vm9  ;;  %v1745_v8 = vmul.f32 0.003921569, %v1648_v20  ;;  %v501_v35 = vld [vmem:[%s3731_s21 + $0x70] sm:$0xff] }
  0x82   : > { %v1553_v29 = vmul.f32 255.0, %v1457_v11  ;;  %v1363_v56 = vmax.f32 %v1267_v19, 0.0  ;;  %v4144_v6 = vsel %vm436_vm10, 0.0, %v6873_v63  ;;  %vm403_vm12 = vmand %vm4139_vm11, %vm387_vm0  ;;  %v1554_v12 = vmul.f32 255.0, %v1458_v55  ;;  %v533_v11 = vld [vmem:[%s3731_s21 + $0x170] sm:$0xff] }
  0x83   : > { %6877 = vst [vmem:[#allocation59_spill] sm:$0xff] %v4128_v22  ;;  %6878 = vst [vmem:[#allocation60_spill] sm:$0xff] %v4131_v60  ;;  %v1087_v17 = vadd.f32 %v4131_v60, %v4128_v22  ;;  %v4154_v43 = vmul.f32 %v500_v34, %v4144_v6  ;;  %v4157_v20 = vmul.f32 %v532_v50, %v4144_v6  ;;  %v565_v19 = vld [vmem:[%s3731_s21 + $0x270] sm:$0xff]  ;;  %v4166_v55 = vsel %vm403_vm12, 0.0, %v6873_v63 }
  0x84   : > { %6879 = vst [vmem:[#allocation61_spill] sm:$0xff] %v4134_v40  ;;  %1841 = vst [vmem:[%s3980_s23 + $0x40] sm:$0xff] %v1745_v8  ;;  %v1649_v33 = vfloor.f32 %v1553_v29  ;;  %v1459_v27 = vmin.f32 %v1363_v56, 1.0  ;;  %v4163_v62 = vmul.f32 %v564_v61, %v4144_v6  ;;  %v1650_v34 = vfloor.f32 %v1554_v12  ;;  %v502_v61 = vld [vmem:[%s3731_s21 + $0x78] sm:$0xff] }
  0x85   : > { %6882 = vst [vmem:[#allocation62_spill] sm:$0xff] %v4154_v43  ;;  %6883 = vst [vmem:[#allocation63_spill] sm:$0xff] %v4157_v20  ;;  %v1088_v50 = vadd.f32 %v1087_v17, %v4134_v40  ;;  %v1089_v8 = vadd.f32 %v4157_v20, %v4154_v43  ;;  %v4176_v56 = vmul.f32 %v501_v35, %v4166_v55  ;;  %v534_v29 = vld [vmem:[%s3731_s21 + $0x178] sm:$0xff]  ;;  %vm347_vm14 = vcmp.ge.s32.totalorder %v4117_v54, 50  ;;  %v543_v43 = vld [vmem:[%s3731_s21 + $0x1c0] sm:$0xff] }
  0x86   : > { %6884 = vst [vmem:[#allocation64_spill] sm:$0xff] %v4163_v62  ;;  %vm438_vm13 = vmand %vm4139_vm11, %vm422_vm3  ;;  %v1746_v60 = vmul.f32 0.003921569, %v1649_v33  ;;  %v1555_v38 = vmul.f32 255.0, %v1459_v27  ;;  %v4181_v30 = vmul.f32 %v533_v11, %v4166_v55  ;;  %v4184_v24 = vmul.f32 %v565_v19, %v4166_v55  ;;  %v566_v12 = vld [vmem:[%s3731_s21 + $0x278] sm:$0xff] }
  0x87   : > { %6885 = vst [vmem:[#allocation65_spill] sm:$0xff] %v4176_v56  ;;  %v1747_v16 = vmul.f32 0.003921569, %v1650_v34  ;;  %v1268_v17 = vmul.f32 0.33333334, %v1088_v50  ;;  %v1090_v40 = vadd.f32 %v1089_v8, %v4163_v62  ;;  %v4189_v20 = vsel %vm438_vm13, 0.0, %v6873_v63 }
  0x88   : > { %6886 = vst [vmem:[#allocation66_spill] sm:$0xff] %v4181_v30  ;;  %6887 = vst [vmem:[#allocation67_spill] sm:$0xff] %v4184_v24  ;;  %v1651_v35 = vfloor.f32 %v1555_v38  ;;  %v1091_v27 = vadd.f32 %v4181_v30, %v4176_v56  ;;  %v4195_v33 = vmul.f32 %v502_v61, %v4189_v20  ;;  %v4198_v11 = vmul.f32 %v534_v29, %v4189_v20 }
  0x89   : > { %1842 = vst [vmem:[%s3980_s23 + $0x48] sm:$0xff] %v1746_v60  ;;  %1843 = vst [vmem:[%s3980_s23 + $0x50] sm:$0xff] %v1747_v16  ;;  %v1364_v19 = vmax.f32 %v1268_v17, 0.0  ;;  %v1269_v34 = vmul.f32 0.33333334, %v1090_v40  ;;  %v4202_v50 = vmul.f32 %v566_v12, %v4189_v20  ;;  %vm363_vm15 = vcmp.lt.s32.totalorder %v4117_v54, 150 }
  0x8a   : > { %6888 = vst [vmem:[#allocation68_spill] sm:$0xff] %v4195_v33  ;;  %6889 = vst [vmem:[#allocation69_spill] sm:$0xff] %v4198_v11  ;;  %v1748_v38 = vmul.f32 0.003921569, %v1651_v35  ;;  %v1092_v60 = vadd.f32 %v1091_v27, %v4184_v24  ;;  %v1093_v8 = vadd.f32 %v4198_v11, %v4195_v33  ;;  %v503_v40 = vld [vmem:[%s3731_s21 + $0x80] sm:$0xff]  ;;  %v311_v17 = vadd.s32 72, %v3748_v2 }
  0x8b   : > { %6890 = vst [vmem:[#allocation70_spill] sm:$0xff] %v4202_v50  ;;  %v1460_v61 = vmin.f32 %v1364_v19, 1.0  ;;  %v1365_v29 = vmax.f32 %v1269_v34, 0.0  ;;  %vm4209_vm1 = vmand %vm347_vm14, %vm363_vm15  ;;  %v535_v12 = vld [vmem:[%s3731_s21 + $0x180] sm:$0xff]  ;;  %v312_v35 = vadd.s32 80, %v3748_v2  ;;  %v313_v19 = vadd.s32 88, %v3748_v2 }
  0x8c   : > { %1844 = vst [vmem:[%s3980_s23 + $0x58] sm:$0xff] %v1748_v38  ;;  %v1270_v27 = vmul.f32 0.33333334, %v1092_v60  ;;  %v1094_v24 = vadd.f32 %v1093_v8, %v4202_v50  ;;  %vm405_vm2 = vmand %vm4209_vm1, %vm387_vm0  ;;  %v567_v54 = vld [vmem:[%s3731_s21 + $0x280] sm:$0xff]  ;;  %v314_v34 = vadd.s32 96, %v3748_v2  ;;  %v504_v38 = vld [vmem:[%s3731_s21 + $0x88] sm:$0xff]  ;;  %v329_v60 = vadd.s32 %v3746_v1, %v311_v17 }
  0x8d   : > { %v1556_v62 = vmul.f32 255.0, %v1460_v61  ;;  %v1461_v11 = vmin.f32 %v1365_v29, 1.0  ;;  %v4227_v30 = vsel %vm405_vm2, 0.0, %v6873_v63  ;;  %vm440_vm4 = vmand %vm4209_vm1, %vm422_vm3  ;;  %v536_v61 = vld [vmem:[%s3731_s21 + $0x188] sm:$0xff] }
  0x8e   : > { %v1366_v8 = vmax.f32 %v1270_v27, 0.0  ;;  %v1271_v50 = vmul.f32 0.33333334, %v1094_v24  ;;  %v4236_v48 = vmul.f32 %v503_v40, %v4227_v30  ;;  %v4239_v45 = vmul.f32 %v535_v12, %v4227_v30  ;;  %v568_v29 = vld [vmem:[%s3731_s21 + $0x288] sm:$0xff] }
  0x8f   : > { %v1652_v13 = vfloor.f32 %v1556_v62  ;;  %v1557_v7 = vmul.f32 255.0, %v1461_v11  ;;  %v4244_v52 = vmul.f32 %v567_v54, %v4227_v30  ;;  %v4247_v16 = vsel %vm440_vm4, 0.0, %v6873_v63 }
  0x90   : > { %6893 = vst [vmem:[#allocation71_spill] sm:$0xff] %v4236_v48  ;;  %6894 = vst [vmem:[#allocation72_spill] sm:$0xff] %v4239_v45  ;;  %v1462_v17 = vmin.f32 %v1366_v8, 1.0  ;;  %v1367_v24 = vmax.f32 %v1271_v50, 0.0  ;;  %v1095_v40 = vadd.f32 %v4239_v45, %v4236_v48  ;;  %v4252_v12 = vmul.f32 %v504_v38, %v4247_v16 }
  0x91   : > { %6895 = vst [vmem:[#allocation73_spill] sm:$0xff] %v4244_v52  ;;  %v1749_v27 = vmul.f32 0.003921569, %v1652_v13  ;;  %v1653_v42 = vfloor.f32 %v1557_v7  ;;  %v4255_v62 = vmul.f32 %v536_v61, %v4247_v16  ;;  %v4258_v11 = vmul.f32 %v568_v29, %v4247_v16  ;;  %v505_v7 = vld [vmem:[%s3731_s21 + $0x90] sm:$0xff] }
  0x92   : > { %6896 = vst [vmem:[#allocation74_spill] sm:$0xff] %v4252_v12  ;;  %v1558_v54 = vmul.f32 255.0, %v1462_v17  ;;  %v1463_v8 = vmin.f32 %v1367_v24, 1.0  ;;  %v1096_v50 = vadd.f32 %v1095_v40, %v4244_v52  ;;  %vm348_vm5 = vcmp.ge.s32.totalorder %v329_v60, 50  ;;  %v537_v17 = vld [vmem:[%s3731_s21 + $0x190] sm:$0xff] }
  0x93   : > { %6897 = vst [vmem:[#allocation75_spill] sm:$0xff] %v4255_v62  ;;  %6898 = vst [vmem:[#allocation76_spill] sm:$0xff] %v4258_v11  ;;  %v1750_v45 = vmul.f32 0.003921569, %v1653_v42  ;;  %v1097_v13 = vadd.f32 %v4255_v62, %v4252_v12  ;;  %vm364_vm6 = vcmp.lt.s32.totalorder %v329_v60, 150  ;;  %v330_v38 = vadd.s32 %v3746_v1, %v312_v35  ;;  %v569_v24 = vld [vmem:[%s3731_s21 + $0x290] sm:$0xff] }
  0x94   : > { %1845 = vst [vmem:[%s3980_s23 + $0x60] sm:$0xff] %v1749_v27  ;;  %v1654_v61 = vfloor.f32 %v1558_v54  ;;  %v1559_v32 = vmul.f32 255.0, %v1463_v8  ;;  %v1272_v29 = vmul.f32 0.33333334, %v1096_v50  ;;  %vm380_vm7 = vmand %vm348_vm5, %vm364_vm6  ;;  %v331_v40 = vadd.s32 %v3746_v1, %v313_v19  ;;  %v538_v19 = vld [vmem:[%s3731_s21 + $0x198] sm:$0xff] }
  0x95   : > { %1846 = vst [vmem:[%s3980_s23 + $0x68] sm:$0xff] %v1750_v45  ;;  %v1098_v42 = vadd.f32 %v1097_v13, %v4258_v11  ;;  %vm407_vm8 = vmand %vm380_vm7, %vm387_vm0  ;;  %vm349_vm9 = vcmp.ge.s32.totalorder %v330_v38, 50  ;;  %vm365_vm10 = vcmp.lt.s32.totalorder %v330_v38, 150  ;;  %v4274_v35 = vadd.s32 %v3746_v1, %v314_v34  ;;  %v506_v45 = vld [vmem:[%s3731_s21 + $0x98] sm:$0xff] }
  0x96   : > { %v1751_v60 = vmul.f32 0.003921569, %v1654_v61  ;;  %v1655_v27 = vfloor.f32 %v1559_v32  ;;  %v1368_v54 = vmax.f32 %v1272_v29, 0.0  ;;  %v4277_v8 = vsel %vm407_vm8, 0.0, %v6873_v63  ;;  %vm442_vm11 = vmand %vm380_vm7, %vm422_vm3  ;;  %v570_v34 = vld [vmem:[%s3731_s21 + $0x298] sm:$0xff]  ;;  %v507_v61 = vld [vmem:[%s3731_s21 + $0xa0] sm:$0xff] }
  0x97   : > { %v1273_v50 = vmul.f32 0.33333334, %v1098_v42  ;;  %v4284_v13 = vmul.f32 %v505_v7, %v4277_v8  ;;  %v4287_v11 = vmul.f32 %v537_v17, %v4277_v8  ;;  %v4290_v32 = vmul.f32 %v569_v24, %v4277_v8  ;;  %vm381_vm12 = vmand %vm349_vm9, %vm365_vm10  ;;  %v539_v7 = vld [vmem:[%s3731_s21 + $0x1a0] sm:$0xff] }
  0x98   : > { %1847 = vst [vmem:[%s3980_s23 + $0x70] sm:$0xff] %v1751_v60  ;;  %v1752_v29 = vmul.f32 0.003921569, %v1655_v27  ;;  %v1464_v52 = vmin.f32 %v1368_v54, 1.0  ;;  %v4297_v42 = vsel %vm442_vm11, 0.0, %v6873_v63  ;;  %vm409_vm13 = vmand %vm381_vm12, %vm387_vm0  ;;  %vm350_vm14 = vcmp.ge.s32.totalorder %v331_v40, 50 }
  0x99   : > { %6899 = vst [vmem:[#allocation77_spill] sm:$0xff] %v4284_v13  ;;  %6900 = vst [vmem:[#allocation78_spill] sm:$0xff] %v4287_v11  ;;  %v1369_v17 = vmax.f32 %v1273_v50, 0.0  ;;  %v1099_v38 = vadd.f32 %v4287_v11, %v4284_v13  ;;  %v4305_v24 = vmul.f32 %v506_v45, %v4297_v42  ;;  %v4308_v60 = vmul.f32 %v538_v19, %v4297_v42  ;;  %v571_v27 = vld [vmem:[%s3731_s21 + $0x2a0] sm:$0xff]  ;;  %v508_v54 = vld [vmem:[%s3731_s21 + $0xa8] sm:$0xff] }
  0x9a   : > { %6901 = vst [vmem:[#allocation79_spill] sm:$0xff] %v4290_v32  ;;  %vm444_vm15 = vmand %vm381_vm12, %vm422_vm3  ;;  %v1560_v62 = vmul.f32 255.0, %v1464_v52  ;;  %v4316_v26 = vmul.f32 %v570_v34, %v4297_v42  ;;  %v4319_v50 = vsel %vm409_vm13, 0.0, %v6873_v63  ;;  %v540_v45 = vld [vmem:[%s3731_s21 + $0x1a8] sm:$0xff]  ;;  %vm366_vm1 = vcmp.lt.s32.totalorder %v331_v40, 150 }
  0x9b   : > { %6902 = vst [vmem:[#allocation80_spill] sm:$0xff] %v4305_v24  ;;  %6903 = vst [vmem:[#allocation81_spill] sm:$0xff] %v4308_v60  ;;  %v4322_v11 = vsel %vm444_vm15, 0.0, %v6873_v63  ;;  %v1465_v13 = vmin.f32 %v1369_v17, 1.0  ;;  %v1100_v19 = vadd.f32 %v1099_v38, %v4290_v32  ;;  %v1101_v12 = vadd.f32 %v4308_v60, %v4305_v24  ;;  %v572_v52 = vld [vmem:[%s3731_s21 + $0x2a8] sm:$0xff]  ;;  %v511_v24 = vld [vmem:[%s3731_s21 + $0xc0] sm:$0xff] }
  0x9c   : > { %1848 = vst [vmem:[%s3980_s23 + $0x78] sm:$0xff] %v1752_v29  ;;  %6904 = vst [vmem:[#allocation82_spill] sm:$0xff] %v4316_v26  ;;  %v4329_v48 = vmul.f32 %v507_v61, %v4319_v50  ;;  %v1656_v29 = vfloor.f32 %v1560_v62  ;;  %v4333_v34 = vmul.f32 %v539_v7, %v4319_v50  ;;  %v4336_v33 = vmul.f32 %v571_v27, %v4319_v50 }
  0x9d   : > { %v4339_v56 = vmul.f32 %v508_v54, %v4322_v11  ;;  %v1561_v17 = vmul.f32 255.0, %v1465_v13  ;;  %v1274_v38 = vmul.f32 0.33333334, %v1100_v19  ;;  %v1102_v32 = vadd.f32 %v1101_v12, %v4316_v26  ;;  %vm382_vm2 = vmand %vm350_vm14, %vm366_vm1 }
  0x9e   : > { %6905 = vst [vmem:[#allocation83_spill] sm:$0xff] %v4329_v48  ;;  %6906 = vst [vmem:[#allocation84_spill] sm:$0xff] %v4333_v34  ;;  %v4343_v61 = vmul.f32 %v540_v45, %v4322_v11  ;;  %v1753_v62 = vmul.f32 0.003921569, %v1656_v29  ;;  %v1103_v7 = vadd.f32 %v4333_v34, %v4329_v48  ;;  %v4348_v60 = vmul.f32 %v572_v52, %v4322_v11  ;;  %v509_v45 = vld [vmem:[%s3731_s21 + $0xb0] sm:$0xff]  ;;  %v574_v34 = vld [vmem:[%s3731_s21 + $0x2b8] sm:$0xff] }
  0x9f   : > { %6907 = vst [vmem:[#allocation85_spill] sm:$0xff] %v4336_v33  ;;  %6908 = vst [vmem:[#allocation86_spill] sm:$0xff] %v4339_v56  ;;  %v1657_v27 = vfloor.f32 %v1561_v17  ;;  %v1370_v54 = vmax.f32 %v1274_v38, 0.0  ;;  %v1275_v13 = vmul.f32 0.33333334, %v1102_v32  ;;  %v541_v52 = vld [vmem:[%s3731_s21 + $0x1b0] sm:$0xff] }
  0xa0   : > { %6909 = vst [vmem:[#allocation87_spill] sm:$0xff] %v4343_v61  ;;  %6910 = vst [vmem:[#allocation88_spill] sm:$0xff] %v4348_v60  ;;  %v1105_v19 = vadd.f32 %v4343_v61, %v4339_v56  ;;  %v1104_v12 = vadd.f32 %v1103_v7, %v4336_v33  ;;  %vm351_vm5 = vcmp.ge.s32.totalorder %v4274_v35, 50  ;;  %vm367_vm6 = vcmp.lt.s32.totalorder %v4274_v35, 150  ;;  %v510_v7 = vld [vmem:[%s3731_s21 + $0xb8] sm:$0xff] }
  0xa1   : > { %1849 = vst [vmem:[%s3980_s23 + $0x80] sm:$0xff] %v1753_v62  ;;  %vm411_vm4 = vmand %vm382_vm2, %vm387_vm0  ;;  %v315_v32 = vadd.s32 104, %v3748_v2  ;;  %v1754_v29 = vmul.f32 0.003921569, %v1657_v27  ;;  %v1466_v40 = vmin.f32 %v1370_v54, 1.0  ;;  %v1371_v17 = vmax.f32 %v1275_v13, 0.0 }
  0xa2   : > { %v1106_v38 = vadd.f32 %v1105_v19, %v4348_v60  ;;  %v573_v62 = vld [vmem:[%s3731_s21 + $0x2b0] sm:$0xff]  ;;  %vm446_vm7 = vmand %vm382_vm2, %vm422_vm3  ;;  %v1276_v33 = vmul.f32 0.33333334, %v1104_v12  ;;  %v4368_v26 = vsel %vm411_vm4, 0.0, %v6873_v63  ;;  %v542_v35 = vld [vmem:[%s3731_s21 + $0x1b8] sm:$0xff] }
  0xa3   : > { %v4371_v61 = vsel %vm446_vm7, 0.0, %v6873_v63  ;;  %vm4374_vm8 = vmand %vm351_vm5, %vm367_vm6  ;;  %v4379_v54 = vadd.s32 %v3746_v1, %v315_v32  ;;  %1850 = vst [vmem:[%s3980_s23 + $0x88] sm:$0xff] %v1754_v29  ;;  %v1562_v13 = vmul.f32 255.0, %v1466_v40  ;;  %v1467_v19 = vmin.f32 %v1371_v17, 1.0 }
  0xa4   : > { %v1277_v12 = vmul.f32 0.33333334, %v1106_v38  ;;  %v4383_v60 = vmul.f32 %v509_v45, %v4368_v26  ;;  %vm413_vm9 = vmand %vm4374_vm8, %vm387_vm0  ;;  %v1372_v56 = vmax.f32 %v1276_v33, 0.0  ;;  %v4391_v32 = vmul.f32 %v541_v52, %v4368_v26 }
  0xa5   : > { %v4394_v29 = vmul.f32 %v573_v62, %v4368_v26  ;;  %v4397_v40 = vmul.f32 %v510_v7, %v4371_v61  ;;  %v1658_v17 = vfloor.f32 %v1562_v13  ;;  %v1563_v45 = vmul.f32 255.0, %v1467_v19  ;;  %v575_v13 = vld [vmem:[%s3731_s21 + $0x2c0] sm:$0xff]  ;;  %vm4419_vm10 = vmand %vm4374_vm8, %vm422_vm3 }
  0xa6   : > { %6913 = vst [vmem:[#allocation89_spill] sm:$0xff] %v4383_v60  ;;  %6914 = vst [vmem:[#allocation90_spill] sm:$0xff] %v4391_v32  ;;  %v1373_v38 = vmax.f32 %v1277_v12, 0.0  ;;  %v4400_v48 = vmul.f32 %v542_v35, %v4371_v61  ;;  %v1468_v33 = vmin.f32 %v1372_v56, 1.0  ;;  %v1107_v52 = vadd.f32 %v4391_v32, %v4383_v60 }
  0xa7   : > { %6915 = vst [vmem:[#allocation91_spill] sm:$0xff] %v4394_v29  ;;  %6916 = vst [vmem:[#allocation92_spill] sm:$0xff] %v4397_v40  ;;  %v4407_v62 = vmul.f32 %v574_v34, %v4371_v61  ;;  %v4410_v7 = vsel %vm413_vm9, 0.0, %v6873_v63  ;;  %v1755_v19 = vmul.f32 0.003921569, %v1658_v17  ;;  %v1659_v35 = vfloor.f32 %v1563_v45 }
  0xa8   : > { %6917 = vst [vmem:[#allocation93_spill] sm:$0xff] %v4400_v48  ;;  %v1469_v12 = vmin.f32 %v1373_v38, 1.0  ;;  %v1109_v22 = vadd.f32 %v4400_v48, %v4397_v40  ;;  %v1564_v34 = vmul.f32 255.0, %v1468_v33  ;;  %v1108_v32 = vadd.f32 %v1107_v52, %v4394_v29  ;;  %v512_v38 = vld [vmem:[%s3731_s21 + $0xc8] sm:$0xff] }
  0xa9   : > { %6918 = vst [vmem:[#allocation94_spill] sm:$0xff] %v4407_v62  ;;  %v4425_v17 = vmul.f32 %v511_v24, %v4410_v7  ;;  %v4428_v45 = vmul.f32 %v543_v43, %v4410_v7  ;;  %v544_v48 = vld [vmem:[%s3731_s21 + $0x1c8] sm:$0xff]  ;;  %1851 = vst [vmem:[%s3980_s23 + $0x90] sm:$0xff] %v1755_v19  ;;  %v1756_v40 = vmul.f32 0.003921569, %v1659_v35  ;;  %v4435_v36 = vmul.f32 %v575_v13, %v4410_v7 }
  0xaa   : > { %v1565_v60 = vmul.f32 255.0, %v1469_v12  ;;  %v1110_v27 = vadd.f32 %v1109_v22, %v4407_v62  ;;  %v576_v33 = vld [vmem:[%s3731_s21 + $0x2c8] sm:$0xff]  ;;  %v1660_v59 = vfloor.f32 %v1564_v34  ;;  %v1278_v52 = vmul.f32 0.33333334, %v1108_v32  ;;  %v583_v62 = vld [vmem:[%s3731_s21 + $0x300] sm:$0xff] }
  0xab   : > { %6921 = vst [vmem:[#allocation95_spill] sm:$0xff] %v4425_v17  ;;  %6922 = vst [vmem:[#allocation96_spill] sm:$0xff] %v4428_v45  ;;  %v1111_v24 = vadd.f32 %v4428_v45, %v4425_v17  ;;  %v4443_v43 = vsel %vm4419_vm10, 0.0, %v6873_v63  ;;  %vm352_vm11 = vcmp.ge.s32.totalorder %v4379_v54, 50  ;;  %vm368_vm12 = vcmp.lt.s32.totalorder %v4379_v54, 150  ;;  %v577_v54 = vld [vmem:[%s3731_s21 + $0x2d0] sm:$0xff] }
  0xac   : > { %6923 = vst [vmem:[#allocation97_spill] sm:$0xff] %v4435_v36  ;;  %1852 = vst [vmem:[%s3980_s23 + $0x98] sm:$0xff] %v1756_v40  ;;  %v1661_v19 = vfloor.f32 %v1565_v60  ;;  %v1279_v22 = vmul.f32 0.33333334, %v1110_v27  ;;  %v4447_v35 = vmul.f32 %v512_v38, %v4443_v43  ;;  %v4450_v13 = vmul.f32 %v544_v48, %v4443_v43  ;;  %v615_v48 = vld [vmem:[%s3731_s21 + $0x400] sm:$0xff] }
  0xad   : > { %v1757_v32 = vmul.f32 0.003921569, %v1660_v59  ;;  %v1374_v12 = vmax.f32 %v1278_v52, 0.0  ;;  %v1112_v34 = vadd.f32 %v1111_v24, %v4435_v36  ;;  %v4454_v56 = vmul.f32 %v576_v33, %v4443_v43  ;;  %vm384_vm13 = vmand %vm352_vm11, %vm368_vm12  ;;  %v647_v17 = vld [vmem:[%s3731_s21 + $0x500] sm:$0xff] }
  0xae   : > { %6924 = vst [vmem:[#allocation98_spill] sm:$0xff] %v4447_v35  ;;  %6925 = vst [vmem:[#allocation99_spill] sm:$0xff] %v4450_v13  ;;  %v1758_v40 = vmul.f32 0.003921569, %v1661_v19  ;;  %v1375_v60 = vmax.f32 %v1279_v22, 0.0  ;;  %v1113_v38 = vadd.f32 %v4450_v13, %v4447_v35  ;;  %v316_v33 = vadd.s32 112, %v3748_v2 }
  0xaf   : > { %6926 = vst [vmem:[#allocation100_spill] sm:$0xff] %v4454_v56  ;;  %1853 = vst [vmem:[%s3980_s23 + $0xa0] sm:$0xff] %v1757_v32  ;;  %v1470_v59 = vmin.f32 %v1374_v12, 1.0  ;;  %v1280_v27 = vmul.f32 0.33333334, %v1112_v34  ;;  %v513_v19 = vld [vmem:[%s3731_s21 + $0xd0] sm:$0xff]  ;;  %v4470_v29 = vmul.f32 %v583_v62, %v3780_v21 }
  0xb0   : > { %1854 = vst [vmem:[%s3980_s23 + $0xa8] sm:$0xff] %v1758_v40  ;;  %v1471_v52 = vmin.f32 %v1375_v60, 1.0  ;;  %v1114_v24 = vadd.f32 %v1113_v38, %v4454_v56  ;;  %v545_v22 = vld [vmem:[%s3731_s21 + $0x1d0] sm:$0xff]  ;;  %v317_v36 = vadd.s32 120, %v3748_v2  ;;  %vm415_vm14 = vmand %vm384_vm13, %vm387_vm0  ;;  %v334_v34 = vadd.s32 %v3746_v1, %v316_v33  ;;  %v514_v62 = vld [vmem:[%s3731_s21 + $0xd8] sm:$0xff] }
  0xb1   : > { %6927 = vst [vmem:[#allocation101_spill] sm:$0xff] %v4470_v29  ;;  %v1566_v32 = vmul.f32 255.0, %v1470_v59  ;;  %v1376_v12 = vmax.f32 %v1280_v27, 0.0  ;;  %v4477_v40 = vmul.f32 %v615_v48, %v3780_v21  ;;  %v4480_v2 = vsel %vm415_vm14, 0.0, %v6873_v63  ;;  %vm450_vm15 = vmand %vm384_vm13, %vm422_vm3  ;;  %v546_v33 = vld [vmem:[%s3731_s21 + $0x1d8] sm:$0xff] }
  0xb2   : > { %v1567_v60 = vmul.f32 255.0, %v1471_v52  ;;  %v1281_v38 = vmul.f32 0.33333334, %v1114_v24  ;;  %v335_v59 = vadd.s32 %v3746_v1, %v317_v36  ;;  %v4487_v13 = vmul.f32 %v513_v19, %v4480_v2  ;;  %v578_v52 = vld [vmem:[%s3731_s21 + $0x2d8] sm:$0xff] }
  0xb3   : > { %6928 = vst [vmem:[#allocation102_spill] sm:$0xff] %v4477_v40  ;;  %v1662_v27 = vfloor.f32 %v1566_v32  ;;  %v1472_v56 = vmin.f32 %v1376_v12, 1.0  ;;  %v4490_v48 = vmul.f32 %v545_v22, %v4480_v2  ;;  %v4495_v35 = vmul.f32 %v577_v54, %v4480_v2 }
  0xb4   : > { %6929 = vst [vmem:[#allocation103_spill] sm:$0xff] %v4487_v13  ;;  %v1663_v24 = vfloor.f32 %v1567_v60  ;;  %v1377_v45 = vmax.f32 %v1281_v38, 0.0  ;;  %v4498_v1 = vsel %vm450_vm15, 0.0, %v6873_v63  ;;  %vm353_vm1 = vcmp.ge.s32.totalorder %v334_v34, 50 }
  0xb5   : > { %6930 = vst [vmem:[#allocation104_spill] sm:$0xff] %v4490_v48  ;;  %6931 = vst [vmem:[#allocation105_spill] sm:$0xff] %v4495_v35  ;;  %v1759_v36 = vmul.f32 0.003921569, %v1662_v27  ;;  %v1568_v19 = vmul.f32 255.0, %v1472_v56  ;;  %v1115_v22 = vadd.f32 %v4490_v48, %v4487_v13  ;;  %v4503_v32 = vmul.f32 %v514_v62, %v4498_v1  ;;  %v515_v48 = vld [vmem:[%s3731_s21 + $0xe0] sm:$0xff] }
  0xb6   : > { %v1760_v12 = vmul.f32 0.003921569, %v1663_v24  ;;  %v1473_v60 = vmin.f32 %v1377_v45, 1.0  ;;  %v4506_v54 = vmul.f32 %v546_v33, %v4498_v1  ;;  %v4509_v38 = vmul.f32 %v578_v52, %v4498_v1  ;;  %v584_v62 = vld [vmem:[%s3731_s21 + $0x308] sm:$0xff]  ;;  %v547_v33 = vld [vmem:[%s3731_s21 + $0x1e0] sm:$0xff] }
  0xb7   : > { %6932 = vst [vmem:[#allocation106_spill] sm:$0xff] %v4503_v32  ;;  %1855 = vst [vmem:[%s3980_s23 + $0xb0] sm:$0xff] %v1759_v36  ;;  %v1664_v27 = vfloor.f32 %v1568_v19  ;;  %v1116_v56 = vadd.f32 %v1115_v22, %v4495_v35  ;;  %vm369_vm2 = vcmp.lt.s32.totalorder %v334_v34, 150  ;;  %v579_v52 = vld [vmem:[%s3731_s21 + $0x2e0] sm:$0xff]  ;;  %vm354_vm5 = vcmp.ge.s32.totalorder %v335_v59, 50 }
  0xb8   : > { %6933 = vst [vmem:[#allocation107_spill] sm:$0xff] %v4506_v54  ;;  %6934 = vst [vmem:[#allocation108_spill] sm:$0xff] %v4509_v38  ;;  %v1569_v24 = vmul.f32 255.0, %v1473_v60  ;;  %v1117_v45 = vadd.f32 %v4506_v54, %v4503_v32  ;;  %vm370_vm6 = vcmp.lt.s32.totalorder %v335_v59, 150  ;;  %v4524_v34 = vmul.f32 %v647_v17, %v3780_v21 }
  0xb9   : > { %1856 = vst [vmem:[%s3980_s23 + $0xb8] sm:$0xff] %v1760_v12  ;;  %vm385_vm4 = vmand %vm353_vm1, %vm369_vm2  ;;  %v1761_v36 = vmul.f32 0.003921569, %v1664_v27  ;;  %v1282_v19 = vmul.f32 0.33333334, %v1116_v56  ;;  %v1127_v22 = vadd.f32 %v4477_v40, %v4470_v29  ;;  %v516_v27 = vld [vmem:[%s3731_s21 + $0xe8] sm:$0xff]  ;;  %v4537_v54 = vmul.f32 %v584_v62, %v3799_v28 }
  0xba   : > { %vm417_vm7 = vmand %vm385_vm4, %vm387_vm0  ;;  %6935 = vst [vmem:[#allocation109_spill] sm:$0xff] %v4524_v34  ;;  %v1665_v12 = vfloor.f32 %v1569_v24  ;;  %v1118_v60 = vadd.f32 %v1117_v45, %v4509_v38  ;;  %v548_v56 = vld [vmem:[%s3731_s21 + $0x1e8] sm:$0xff]  ;;  %v517_v62 = vld [vmem:[%s3731_s21 + $0xf0] sm:$0xff] }
  0xbb   : > { %v4530_v35 = vsel %vm417_vm7, 0.0, %v6873_v63  ;;  %vm452_vm8 = vmand %vm385_vm4, %vm422_vm3  ;;  %6936 = vst [vmem:[#allocation110_spill] sm:$0xff] %v4537_v54  ;;  %v1378_v17 = vmax.f32 %v1282_v19, 0.0  ;;  %v580_v40 = vld [vmem:[%s3731_s21 + $0x2e8] sm:$0xff] }
  0xbc   : > { %1857 = vst [vmem:[%s3980_s23 + $0xc0] sm:$0xff] %v1761_v36  ;;  %v4541_v32 = vmul.f32 %v515_v48, %v4530_v35  ;;  %v4544_v24 = vmul.f32 %v547_v33, %v4530_v35  ;;  %v4547_v45 = vmul.f32 %v579_v52, %v4530_v35  ;;  %vm386_vm9 = vmand %vm354_vm5, %vm370_vm6  ;;  %v1762_v29 = vmul.f32 0.003921569, %v1665_v12  ;;  %v549_v48 = vld [vmem:[%s3731_s21 + $0x1f0] sm:$0xff] }
  0xbd   : > { %v1283_v36 = vmul.f32 0.33333334, %v1118_v60  ;;  %v4554_v19 = vsel %vm452_vm8, 0.0, %v6873_v63  ;;  %vm419_vm10 = vmand %vm386_vm9, %vm387_vm0  ;;  %v1128_v33 = vadd.f32 %v1127_v22, %v4524_v34  ;;  %v1474_v52 = vmin.f32 %v1378_v17, 1.0  ;;  %v581_v60 = vld [vmem:[%s3731_s21 + $0x2f0] sm:$0xff]  ;;  %v550_v34 = vld [vmem:[%s3731_s21 + $0x1f8] sm:$0xff] }
  0xbe   : > { %6937 = vst [vmem:[#allocation111_spill] sm:$0xff] %v4541_v32  ;;  %6938 = vst [vmem:[#allocation112_spill] sm:$0xff] %v4544_v24  ;;  %v1119_v38 = vadd.f32 %v4544_v24, %v4541_v32  ;;  %v4563_v59 = vmul.f32 %v516_v27, %v4554_v19  ;;  %v4566_v12 = vmul.f32 %v548_v56, %v4554_v19  ;;  %v4577_v17 = vsel %vm419_vm10, 0.0, %v6873_v63 }
  0xbf   : > { %6939 = vst [vmem:[#allocation113_spill] sm:$0xff] %v4547_v45  ;;  %vm454_vm11 = vmand %vm386_vm9, %vm422_vm3  ;;  %v1379_v13 = vmax.f32 %v1283_v36, 0.0  ;;  %v4574_v22 = vmul.f32 %v580_v40, %v4554_v19  ;;  %v1570_v56 = vmul.f32 255.0, %v1474_v52  ;;  %v582_v40 = vld [vmem:[%s3731_s21 + $0x2f8] sm:$0xff]  ;;  %v4591_v32 = vmul.f32 %v549_v48, %v4577_v17 }
  0xc0   : > { %6940 = vst [vmem:[#allocation114_spill] sm:$0xff] %v4563_v59  ;;  %6941 = vst [vmem:[#allocation115_spill] sm:$0xff] %v4566_v12  ;;  %v4580_v27 = vsel %vm454_vm11, 0.0, %v6873_v63  ;;  %v1120_v24 = vadd.f32 %v1119_v38, %v4547_v45  ;;  %v1121_v5 = vadd.f32 %v4566_v12, %v4563_v59  ;;  %v4594_v18 = vmul.f32 %v581_v60, %v4577_v17 }
  0xc1   : > { %1858 = vst [vmem:[%s3980_s23 + $0xc8] sm:$0xff] %v1762_v29  ;;  %6942 = vst [vmem:[#allocation116_spill] sm:$0xff] %v4574_v22  ;;  %v4587_v29 = vmul.f32 %v517_v62, %v4577_v17  ;;  %v1475_v36 = vmin.f32 %v1379_v13, 1.0  ;;  %v4597_v63 = vmul.f32 %v518_v3, %v4580_v27  ;;  %v1666_v52 = vfloor.f32 %v1570_v56  ;;  %v616_v62 = vld [vmem:[%s3731_s21 + $0x408] sm:$0xff] }
  0xc2   : > { %6944 = vst [vmem:[#allocation118_spill] sm:$0xff] %v4591_v32  ;;  %6945 = vst [vmem:[#allocation119_spill] sm:$0xff] %v4594_v18  ;;  %v1284_v38 = vmul.f32 0.33333334, %v1120_v24  ;;  %v1122_v45 = vadd.f32 %v1121_v5, %v4574_v22  ;;  %v4601_v12 = vmul.f32 %v550_v34, %v4580_v27  ;;  %v4607_v60 = vmul.f32 %v582_v40, %v4580_v27  ;;  %v648_v3 = vld [vmem:[%s3731_s21 + $0x508] sm:$0xff] }
  0xc3   : > { %6943 = vst [vmem:[#allocation117_spill] sm:$0xff] %v4587_v29  ;;  %6946 = vst [vmem:[#allocation120_spill] sm:$0xff] %v4597_v63  ;;  %v1571_v13 = vmul.f32 255.0, %v1475_v36  ;;  %v1123_v48 = vadd.f32 %v4591_v32, %v4587_v29  ;;  %v1288_v59 = vmul.f32 0.33333334, %v1128_v33  ;;  %v4614_v47 = vmul.f32 %v616_v62, %v3799_v28  ;;  %v585_v32 = vld [vmem:[%s3731_s21 + $0x310] sm:$0xff] }
  0xc4   : > { %6947 = vst [vmem:[#allocation121_spill] sm:$0xff] %v4601_v12  ;;  %v1763_v56 = vmul.f32 0.003921569, %v1666_v52  ;;  %v1380_v24 = vmax.f32 %v1284_v38, 0.0  ;;  %v1285_v14 = vmul.f32 0.33333334, %v1122_v45  ;;  %v1125_v5 = vadd.f32 %v4601_v12, %v4597_v63 }
  0xc5   : > { %v1667_v34 = vfloor.f32 %v1571_v13  ;;  %v1124_v22 = vadd.f32 %v1123_v48, %v4594_v18  ;;  %v1384_v36 = vmax.f32 %v1288_v59, 0.0  ;;  %6948 = vst [vmem:[#allocation122_spill] sm:$0xff] %v4614_v47  ;;  %v4620_v45 = vmul.f32 %v648_v3, %v3799_v28  ;;  %v617_v38 = vld [vmem:[%s3731_s21 + $0x410] sm:$0xff] }
  0xc6   : > { %1859 = vst [vmem:[%s3980_s23 + $0xd0] sm:$0xff] %v1763_v56  ;;  %v1476_v33 = vmin.f32 %v1380_v24, 1.0  ;;  %v1381_v40 = vmax.f32 %v1285_v14, 0.0  ;;  %v1126_v52 = vadd.f32 %v1125_v5, %v4607_v60  ;;  %v1129_v59 = vadd.f32 %v4614_v47, %v4537_v54  ;;  %v649_v62 = vld [vmem:[%s3731_s21 + $0x510] sm:$0xff]  ;;  %v586_v5 = vld [vmem:[%s3731_s21 + $0x318] sm:$0xff]  ;;  %v651_v47 = vld [vmem:[%s3731_s21 + $0x520] sm:$0xff] }
  0xc7   : > { %6949 = vst [vmem:[#allocation123_spill] sm:$0xff] %v4620_v45  ;;  %v1764_v12 = vmul.f32 0.003921569, %v1667_v34  ;;  %v1286_v13 = vmul.f32 0.33333334, %v1124_v22  ;;  %v1480_v63 = vmin.f32 %v1384_v36, 1.0  ;;  %v4627_v14 = vmul.f32 %v585_v32, %v3823_v37 }
  0xc8   : > { %v1572_v48 = vmul.f32 255.0, %v1476_v33  ;;  %v1477_v18 = vmin.f32 %v1381_v40, 1.0  ;;  %v1287_v29 = vmul.f32 0.33333334, %v1126_v52  ;;  %v1130_v24 = vadd.f32 %v1129_v59, %v4620_v45 }
  0xc9   : > { %6950 = vst [vmem:[#allocation124_spill] sm:$0xff] %v4627_v14  ;;  %1860 = vst [vmem:[%s3980_s23 + $0xd8] sm:$0xff] %v1764_v12  ;;  %v1382_v3 = vmax.f32 %v1286_v13, 0.0  ;;  %v1576_v56 = vmul.f32 255.0, %v1480_v63  ;;  %v4632_v22 = vmul.f32 %v617_v38, %v3823_v37  ;;  %v4636_v40 = vmul.f32 %v649_v62, %v3823_v37  ;;  %v618_v13 = vld [vmem:[%s3731_s21 + $0x418] sm:$0xff] }
  0xca   : > { %v1668_v34 = vfloor.f32 %v1572_v48  ;;  %v1573_v36 = vmul.f32 255.0, %v1477_v18  ;;  %v1383_v33 = vmax.f32 %v1287_v29, 0.0  ;;  %v1289_v12 = vmul.f32 0.33333334, %v1130_v24  ;;  %v650_v38 = vld [vmem:[%s3731_s21 + $0x518] sm:$0xff]  ;;  %v587_v29 = vld [vmem:[%s3731_s21 + $0x320] sm:$0xff] }
  0xcb   : > { %6951 = vst [vmem:[#allocation125_spill] sm:$0xff] %v4632_v22  ;;  %6952 = vst [vmem:[#allocation126_spill] sm:$0xff] %v4636_v40  ;;  %v1478_v32 = vmin.f32 %v1382_v3, 1.0  ;;  %v1672_v52 = vfloor.f32 %v1576_v56  ;;  %v1131_v63 = vadd.f32 %v4632_v22, %v4627_v14  ;;  %v4643_v18 = vmul.f32 %v586_v5, %v3845_v46  ;;  %v619_v22 = vld [vmem:[%s3731_s21 + $0x420] sm:$0xff] }
  0xcc   : > { %v1765_v59 = vmul.f32 0.003921569, %v1668_v34  ;;  %v1669_v45 = vfloor.f32 %v1573_v36  ;;  %v1479_v48 = vmin.f32 %v1383_v33, 1.0  ;;  %v1385_v56 = vmax.f32 %v1289_v12, 0.0 }
  0xcd   : > { %6953 = vst [vmem:[#allocation127_spill] sm:$0xff] %v4643_v18  ;;  %v1574_v62 = vmul.f32 255.0, %v1478_v32  ;;  %v4646_v3 = vmul.f32 0.003921569, %v1672_v52  ;;  %v1132_v24 = vadd.f32 %v1131_v63, %v4636_v40  ;;  %v4653_v33 = vmul.f32 %v618_v13, %v3845_v46  ;;  %v588_v32 = vld [vmem:[%s3731_s21 + $0x328] sm:$0xff] }
  0xce   : > { %1861 = vst [vmem:[%s3980_s23 + $0xe0] sm:$0xff] %v1765_v59  ;;  %v1766_v34 = vmul.f32 0.003921569, %v1669_v45  ;;  %v1575_v36 = vmul.f32 255.0, %v1479_v48  ;;  %v4656_v5 = vmul.f32 %v650_v38, %v3845_v46  ;;  %v1481_v12 = vmin.f32 %v1385_v56, 1.0  ;;  %v620_v45 = vld [vmem:[%s3731_s21 + $0x428] sm:$0xff] }
  0xcf   : > { %6954 = vst [vmem:[#allocation128_spill] sm:$0xff] %v4646_v3  ;;  %6955 = vst [vmem:[#allocation129_spill] sm:$0xff] %v4653_v33  ;;  %v1670_v52 = vfloor.f32 %v1574_v62  ;;  %v1290_v63 = vmul.f32 0.33333334, %v1132_v24  ;;  %v4662_v40 = vmul.f32 %v587_v29, %v3870_v57  ;;  %v1133_v13 = vadd.f32 %v4653_v33, %v4643_v18  ;;  %v652_v62 = vld [vmem:[%s3731_s21 + $0x528] sm:$0xff]  ;;  %v589_v56 = vld [vmem:[%s3731_s21 + $0x330] sm:$0xff] }
  0xd0   : > { %6956 = vst [vmem:[#allocation130_spill] sm:$0xff] %v4656_v5  ;;  %1865 = vst [vmem:[%s3980_s23 + $0x100] sm:$0xff] %v4646_v3  ;;  %v1671_v59 = vfloor.f32 %v1575_v36  ;;  %v4669_v38 = vmul.f32 %v619_v22, %v3870_v57  ;;  %v4672_v48 = vmul.f32 %v651_v47, %v3870_v57  ;;  %v1577_v29 = vmul.f32 255.0, %v1481_v12  ;;  %v621_v36 = vld [vmem:[%s3731_s21 + $0x430] sm:$0xff]  ;;  %v590_v18 = vld [vmem:[%s3731_s21 + $0x338] sm:$0xff] }
  0xd1   : > { %6957 = vst [vmem:[#allocation131_spill] sm:$0xff] %v4662_v40  ;;  %1862 = vst [vmem:[%s3980_s23 + $0xe8] sm:$0xff] %v1766_v34  ;;  %v1767_v24 = vmul.f32 0.003921569, %v1670_v52  ;;  %v1386_v3 = vmax.f32 %v1290_v63, 0.0  ;;  %v4677_v34 = vmul.f32 %v588_v32, %v3873_v58  ;;  %v1134_v33 = vadd.f32 %v1133_v13, %v4656_v5  ;;  %v653_v52 = vld [vmem:[%s3731_s21 + $0x530] sm:$0xff] }
  0xd2   : > { %6958 = vst [vmem:[#allocation132_spill] sm:$0xff] %v4669_v38  ;;  %6959 = vst [vmem:[#allocation133_spill] sm:$0xff] %v4672_v48  ;;  %v1768_v14 = vmul.f32 0.003921569, %v1671_v59  ;;  %v1135_v22 = vadd.f32 %v4669_v38, %v4662_v40  ;;  %v4684_v47 = vmul.f32 %v620_v45, %v3873_v58  ;;  %v1673_v12 = vfloor.f32 %v1577_v29  ;;  %v654_v29 = vld [vmem:[%s3731_s21 + $0x538] sm:$0xff] }
  0xd3   : > { %6960 = vst [vmem:[#allocation134_spill] sm:$0xff] %v4677_v34  ;;  %1863 = vst [vmem:[%s3980_s23 + $0xf0] sm:$0xff] %v1767_v24  ;;  %v1482_v63 = vmin.f32 %v1386_v3, 1.0  ;;  %v4690_v32 = vmul.f32 %v652_v62, %v3873_v58  ;;  %v4693_v59 = vmul.f32 %v589_v56, %v3917_v23  ;;  %v1291_v13 = vmul.f32 0.33333334, %v1134_v33  ;;  %v622_v3 = vld [vmem:[%s3731_s21 + $0x438] sm:$0xff] }
  0xd4   : > { %6961 = vst [vmem:[#allocation135_spill] sm:$0xff] %v4684_v47  ;;  %1864 = vst [vmem:[%s3980_s23 + $0xf8] sm:$0xff] %v1768_v14  ;;  %v1136_v5 = vadd.f32 %v1135_v22, %v4672_v48  ;;  %v1137_v45 = vadd.f32 %v4684_v47, %v4677_v34  ;;  %v4700_v24 = vmul.f32 %v621_v36, %v3917_v23  ;;  %v591_v62 = vld [vmem:[%s3731_s21 + $0x340] sm:$0xff]  ;;  %v1770_v38 = vmul.f32 0.003921569, %v1673_v12 }
  0xd5   : > { %6962 = vst [vmem:[#allocation136_spill] sm:$0xff] %v4690_v32  ;;  %6963 = vst [vmem:[#allocation137_spill] sm:$0xff] %v4693_v59  ;;  %v1578_v40 = vmul.f32 255.0, %v1482_v63  ;;  %v4706_v56 = vmul.f32 %v653_v52, %v3917_v23  ;;  %v4709_v14 = vmul.f32 %v590_v18, %v3959_v15  ;;  %v1387_v33 = vmax.f32 %v1291_v13, 0.0  ;;  %v623_v47 = vld [vmem:[%s3731_s21 + $0x440] sm:$0xff] }
  0xd6   : > { %6964 = vst [vmem:[#allocation138_spill] sm:$0xff] %v4700_v24  ;;  %v1292_v22 = vmul.f32 0.33333334, %v1136_v5  ;;  %v1138_v48 = vadd.f32 %v1137_v45, %v4690_v32  ;;  %v1139_v36 = vadd.f32 %v4700_v24, %v4693_v59  ;;  %v655_v34 = vld [vmem:[%s3731_s21 + $0x540] sm:$0xff]  ;;  %1866 = vst [vmem:[%s3980_s23 + $0x108] sm:$0xff] %v1770_v38  ;;  %v4718_v63 = vmul.f32 %v622_v3, %v3959_v15  ;;  %v592_v24 = vld [vmem:[%s3731_s21 + $0x348] sm:$0xff] }
  0xd7   : > { %6965 = vst [vmem:[#allocation139_spill] sm:$0xff] %v4706_v56  ;;  %6966 = vst [vmem:[#allocation140_spill] sm:$0xff] %v4709_v14  ;;  %v1674_v12 = vfloor.f32 %v1578_v40  ;;  %v4721_v52 = vmul.f32 %v654_v29, %v3959_v15  ;;  %v4724_v18 = vmul.f32 %v591_v62, %v4010_v10  ;;  %v1483_v5 = vmin.f32 %v1387_v33, 1.0  ;;  %v624_v59 = vld [vmem:[%s3731_s21 + $0x448] sm:$0xff] }
  0xd8   : > { %6967 = vst [vmem:[#allocation141_spill] sm:$0xff] %v4718_v63  ;;  %v1388_v13 = vmax.f32 %v1292_v22, 0.0  ;;  %v1293_v45 = vmul.f32 0.33333334, %v1138_v48  ;;  %v1140_v32 = vadd.f32 %v1139_v36, %v4706_v56  ;;  %v1141_v40 = vadd.f32 %v4718_v63, %v4709_v14  ;;  %v656_v48 = vld [vmem:[%s3731_s21 + $0x548] sm:$0xff] }
  0xd9   : > { %6968 = vst [vmem:[#allocation142_spill] sm:$0xff] %v4721_v52  ;;  %6969 = vst [vmem:[#allocation143_spill] sm:$0xff] %v4724_v18  ;;  %v1771_v38 = vmul.f32 0.003921569, %v1674_v12  ;;  %v4732_v3 = vmul.f32 %v623_v47, %v4010_v10  ;;  %v4735_v29 = vmul.f32 %v655_v34, %v4010_v10  ;;  %v1579_v62 = vmul.f32 255.0, %v1483_v5  ;;  %v660_v14 = vld [vmem:[%s3731_s21 + $0x568] sm:$0xff] }
  0xda   : > { %v1484_v54 = vmin.f32 %v1388_v13, 1.0  ;;  %v1389_v33 = vmax.f32 %v1293_v45, 0.0  ;;  %v1294_v22 = vmul.f32 0.33333334, %v1140_v32  ;;  %v1142_v36 = vadd.f32 %v1141_v40, %v4721_v52  ;;  %v593_v32 = vld [vmem:[%s3731_s21 + $0x350] sm:$0xff] }
  0xdb   : > { %6970 = vst [vmem:[#allocation144_spill] sm:$0xff] %v4732_v3  ;;  %6971 = vst [vmem:[#allocation145_spill] sm:$0xff] %v4735_v29  ;;  %v1143_v12 = vadd.f32 %v4732_v3, %v4724_v18  ;;  %v4743_v56 = vmul.f32 %v592_v24, %v4040_v49  ;;  %v4746_v47 = vmul.f32 %v624_v59, %v4040_v49  ;;  %v1675_v34 = vfloor.f32 %v1579_v62  ;;  %v625_v3 = vld [vmem:[%s3731_s21 + $0x450] sm:$0xff] }
  0xdc   : > { %1867 = vst [vmem:[%s3980_s23 + $0x110] sm:$0xff] %v1771_v38  ;;  %v1580_v5 = vmul.f32 255.0, %v1484_v54  ;;  %v1485_v13 = vmin.f32 %v1389_v33, 1.0  ;;  %v1390_v45 = vmax.f32 %v1294_v22, 0.0  ;;  %v1295_v38 = vmul.f32 0.33333334, %v1142_v36 }
  0xdd   : > { %6972 = vst [vmem:[#allocation146_spill] sm:$0xff] %v4743_v56  ;;  %6973 = vst [vmem:[#allocation147_spill] sm:$0xff] %v4746_v47  ;;  %v1144_v40 = vadd.f32 %v1143_v12, %v4735_v29  ;;  %v4751_v52 = vmul.f32 %v656_v48, %v4040_v49  ;;  %v1145_v24 = vadd.f32 %v4746_v47, %v4743_v56  ;;  %v1772_v59 = vmul.f32 0.003921569, %v1675_v34  ;;  %v657_v33 = vld [vmem:[%s3731_s21 + $0x550] sm:$0xff]  ;;  %v594_v12 = vld [vmem:[%s3731_s21 + $0x358] sm:$0xff] }
  0xde   : > { %v1676_v63 = vfloor.f32 %v1580_v5  ;;  %v1581_v62 = vmul.f32 255.0, %v1485_v13  ;;  %v1486_v54 = vmin.f32 %v1390_v45, 1.0  ;;  %v1391_v22 = vmax.f32 %v1295_v38, 0.0  ;;  %v626_v5 = vld [vmem:[%s3731_s21 + $0x458] sm:$0xff] }
  0xdf   : > { %6974 = vst [vmem:[#allocation148_spill] sm:$0xff] %v4751_v52  ;;  %v1296_v18 = vmul.f32 0.33333334, %v1144_v40  ;;  %v1146_v36 = vadd.f32 %v1145_v24, %v4751_v52  ;;  %v4759_v48 = vmul.f32 %v593_v32, %v4045_v53  ;;  %1868 = vst [vmem:[%s3980_s23 + $0x118] sm:$0xff] %v1772_v59  ;;  %v4764_v34 = vmul.f32 %v625_v3, %v4045_v53  ;;  %v658_v32 = vld [vmem:[%s3731_s21 + $0x558] sm:$0xff]  ;;  %v595_v24 = vld [vmem:[%s3731_s21 + $0x360] sm:$0xff] }
  0xe0   : > { %v1773_v29 = vmul.f32 0.003921569, %v1676_v63  ;;  %v1677_v47 = vfloor.f32 %v1581_v62  ;;  %v1582_v56 = vmul.f32 255.0, %v1486_v54  ;;  %v1487_v13 = vmin.f32 %v1391_v22, 1.0  ;;  %v659_v52 = vld [vmem:[%s3731_s21 + $0x560] sm:$0xff] }
  0xe1   : > { %6975 = vst [vmem:[#allocation149_spill] sm:$0xff] %v4759_v48  ;;  %6976 = vst [vmem:[#allocation150_spill] sm:$0xff] %v4764_v34  ;;  %v1392_v45 = vmax.f32 %v1296_v18, 0.0  ;;  %v1297_v38 = vmul.f32 0.33333334, %v1146_v36  ;;  %v4768_v40 = vmul.f32 %v657_v33, %v4045_v53  ;;  %v1147_v3 = vadd.f32 %v4764_v34, %v4759_v48  ;;  %v627_v36 = vld [vmem:[%s3731_s21 + $0x460] sm:$0xff] }
  0xe2   : > { %1869 = vst [vmem:[%s3980_s23 + $0x120] sm:$0xff] %v1773_v29  ;;  %v1774_v63 = vmul.f32 0.003921569, %v1677_v47  ;;  %v1678_v59 = vfloor.f32 %v1582_v56  ;;  %v4776_v62 = vmul.f32 %v594_v12, %v4087_v4  ;;  %v1583_v54 = vmul.f32 255.0, %v1487_v13  ;;  %v596_v29 = vld [vmem:[%s3731_s21 + $0x368] sm:$0xff] }
  0xe3   : > { %6977 = vst [vmem:[#allocation151_spill] sm:$0xff] %v4768_v40  ;;  %v1488_v18 = vmin.f32 %v1392_v45, 1.0  ;;  %v1393_v22 = vmax.f32 %v1297_v38, 0.0  ;;  %v4779_v33 = vmul.f32 %v626_v5, %v4087_v4  ;;  %v1148_v47 = vadd.f32 %v1147_v3, %v4768_v40  ;;  %v628_v48 = vld [vmem:[%s3731_s21 + $0x468] sm:$0xff]  ;;  %v597_v3 = vld [vmem:[%s3731_s21 + $0x370] sm:$0xff] }
  0xe4   : > { %6978 = vst [vmem:[#allocation152_spill] sm:$0xff] %v4776_v62  ;;  %1870 = vst [vmem:[%s3980_s23 + $0x128] sm:$0xff] %v1774_v63  ;;  %v1775_v56 = vmul.f32 0.003921569, %v1678_v59  ;;  %v4787_v12 = vmul.f32 %v658_v32, %v4087_v4  ;;  %v4790_v13 = vmul.f32 %v595_v24, %v4120_v39  ;;  %v1679_v45 = vfloor.f32 %v1583_v54 }
  0xe5   : > { %6979 = vst [vmem:[#allocation153_spill] sm:$0xff] %v4779_v33  ;;  %v1584_v38 = vmul.f32 255.0, %v1488_v18  ;;  %v1489_v34 = vmin.f32 %v1393_v22, 1.0  ;;  %v1149_v5 = vadd.f32 %v4779_v33, %v4776_v62  ;;  %v1298_v63 = vmul.f32 0.33333334, %v1148_v47  ;;  %v629_v33 = vld [vmem:[%s3731_s21 + $0x470] sm:$0xff] }
  0xe6   : > { %6980 = vst [vmem:[#allocation154_spill] sm:$0xff] %v4787_v12  ;;  %6981 = vst [vmem:[#allocation155_spill] sm:$0xff] %v4790_v13  ;;  %v4798_v32 = vmul.f32 %v627_v36, %v4120_v39  ;;  %v4801_v24 = vmul.f32 %v659_v52, %v4120_v39  ;;  %v4804_v59 = vmul.f32 %v596_v29, %v4144_v6  ;;  %v1776_v54 = vmul.f32 0.003921569, %v1679_v45  ;;  %v661_v47 = vld [vmem:[%s3731_s21 + $0x570] sm:$0xff]  ;;  %v598_v45 = vld [vmem:[%s3731_s21 + $0x378] sm:$0xff] }
  0xe7   : > { %1871 = vst [vmem:[%s3980_s23 + $0x130] sm:$0xff] %v1775_v56  ;;  %v1680_v18 = vfloor.f32 %v1584_v38  ;;  %v1585_v22 = vmul.f32 255.0, %v1489_v34  ;;  %v1150_v40 = vadd.f32 %v1149_v5, %v4787_v12  ;;  %v1394_v56 = vmax.f32 %v1298_v63, 0.0  ;;  %v663_v62 = vld [vmem:[%s3731_s21 + $0x580] sm:$0xff] }
  0xe8   : > { %6982 = vst [vmem:[#allocation156_spill] sm:$0xff] %v4798_v32  ;;  %6983 = vst [vmem:[#allocation157_spill] sm:$0xff] %v4801_v24  ;;  %v1151_v36 = vadd.f32 %v4798_v32, %v4790_v13  ;;  %v4812_v52 = vmul.f32 %v628_v48, %v4144_v6  ;;  %v4815_v29 = vmul.f32 %v660_v14, %v4144_v6  ;;  %v630_v13 = vld [vmem:[%s3731_s21 + $0x478] sm:$0xff] }
  0xe9   : > { %6984 = vst [vmem:[#allocation158_spill] sm:$0xff] %v4804_v59  ;;  %1872 = vst [vmem:[%s3980_s23 + $0x138] sm:$0xff] %v1776_v54  ;;  %v1777_v34 = vmul.f32 0.003921569, %v1680_v18  ;;  %v1681_v38 = vfloor.f32 %v1585_v22  ;;  %v1299_v5 = vmul.f32 0.33333334, %v1150_v40  ;;  %v4821_v63 = vmul.f32 %v597_v3, %v4166_v55 }
  0xea   : > { %6985 = vst [vmem:[#allocation159_spill] sm:$0xff] %v4812_v52  ;;  %6986 = vst [vmem:[#allocation160_spill] sm:$0xff] %v4815_v29  ;;  %v1490_v12 = vmin.f32 %v1394_v56, 1.0  ;;  %v1152_v32 = vadd.f32 %v1151_v36, %v4801_v24  ;;  %v1153_v48 = vadd.f32 %v4812_v52, %v4804_v59  ;;  %v4827_v14 = vmul.f32 %v629_v33, %v4166_v55  ;;  %v662_v54 = vld [vmem:[%s3731_s21 + $0x578] sm:$0xff]  ;;  %v599_v18 = vld [vmem:[%s3731_s21 + $0x380] sm:$0xff] }
  0xeb   : > { %6987 = vst [vmem:[#allocation161_spill] sm:$0xff] %v4821_v63  ;;  %1873 = vst [vmem:[%s3980_s23 + $0x140] sm:$0xff] %v1777_v34  ;;  %v1778_v40 = vmul.f32 0.003921569, %v1681_v38  ;;  %v1395_v22 = vmax.f32 %v1299_v5, 0.0  ;;  %v4834_v3 = vmul.f32 %v661_v47, %v4166_v55  ;;  %v4837_v56 = vmul.f32 %v598_v45, %v4189_v20  ;;  %v631_v59 = vld [vmem:[%s3731_s21 + $0x480] sm:$0xff] }
  0xec   : > { %6988 = vst [vmem:[#allocation162_spill] sm:$0xff] %v4827_v14  ;;  %v1586_v36 = vmul.f32 255.0, %v1490_v12  ;;  %v1300_v24 = vmul.f32 0.33333334, %v1152_v32  ;;  %v1154_v52 = vadd.f32 %v1153_v48, %v4815_v29  ;;  %v1155_v33 = vadd.f32 %v4827_v14, %v4821_v63  ;;  %v600_v29 = vld [vmem:[%s3731_s21 + $0x388] sm:$0xff] }
  0xed   : > { %6989 = vst [vmem:[#allocation163_spill] sm:$0xff] %v4834_v3  ;;  %6990 = vst [vmem:[#allocation164_spill] sm:$0xff] %v4837_v56  ;;  %v1491_v34 = vmin.f32 %v1395_v22, 1.0  ;;  %v4846_v47 = vmul.f32 %v630_v13, %v4189_v20  ;;  %v4849_v45 = vmul.f32 %v662_v54, %v4189_v20  ;;  %v4852_v12 = vmul.f32 %v599_v18, %v4227_v30  ;;  %v632_v18 = vld [vmem:[%s3731_s21 + $0x488] sm:$0xff] }
  0xee   : > { %1874 = vst [vmem:[%s3980_s23 + $0x148] sm:$0xff] %v1778_v40  ;;  %v1682_v32 = vfloor.f32 %v1586_v36  ;;  %v1396_v38 = vmax.f32 %v1300_v24, 0.0  ;;  %v1301_v5 = vmul.f32 0.33333334, %v1154_v52  ;;  %v1156_v48 = vadd.f32 %v1155_v33, %v4834_v3  ;;  %v664_v22 = vld [vmem:[%s3731_s21 + $0x588] sm:$0xff] }
  0xef   : > { %6991 = vst [vmem:[#allocation165_spill] sm:$0xff] %v4846_v47  ;;  %6992 = vst [vmem:[#allocation166_spill] sm:$0xff] %v4849_v45  ;;  %v1587_v14 = vmul.f32 255.0, %v1491_v34  ;;  %v1157_v40 = vadd.f32 %v4846_v47, %v4837_v56  ;;  %v4859_v13 = vmul.f32 %v631_v59, %v4227_v30  ;;  %v4862_v54 = vmul.f32 %v663_v62, %v4227_v30 }
  0xf0   : > { %6993 = vst [vmem:[#allocation167_spill] sm:$0xff] %v4852_v12  ;;  %v1779_v24 = vmul.f32 0.003921569, %v1682_v32  ;;  %v1492_v52 = vmin.f32 %v1396_v38, 1.0  ;;  %v1397_v36 = vmax.f32 %v1301_v5, 0.0  ;;  %v4870_v59 = vmul.f32 %v600_v29, %v4247_v16  ;;  %v601_v38 = vld [vmem:[%s3731_s21 + $0x390] sm:$0xff] }
  0xf1   : > { %6994 = vst [vmem:[#allocation168_spill] sm:$0xff] %v4859_v13  ;;  %6995 = vst [vmem:[#allocation169_spill] sm:$0xff] %v4862_v54  ;;  %v1302_v33 = vmul.f32 0.33333334, %v1156_v48  ;;  %v1683_v3 = vfloor.f32 %v1587_v14  ;;  %v1158_v34 = vadd.f32 %v1157_v40, %v4849_v45  ;;  %v1159_v47 = vadd.f32 %v4859_v13, %v4852_v12  ;;  %v633_v14 = vld [vmem:[%s3731_s21 + $0x490] sm:$0xff]  ;;  %v670_v12 = vld [vmem:[%s3731_s21 + $0x5b8] sm:$0xff] }
  0xf2   : > { %6996 = vst [vmem:[#allocation170_spill] sm:$0xff] %v4870_v59  ;;  %1875 = vst [vmem:[%s3980_s23 + $0x150] sm:$0xff] %v1779_v24  ;;  %v1588_v62 = vmul.f32 255.0, %v1492_v52  ;;  %v1493_v56 = vmin.f32 %v1397_v36, 1.0  ;;  %v4874_v32 = vmul.f32 %v632_v18, %v4247_v16  ;;  %v4880_v45 = vmul.f32 %v664_v22, %v4247_v16  ;;  %v665_v36 = vld [vmem:[%s3731_s21 + $0x590] sm:$0xff]  ;;  %v602_v22 = vld [vmem:[%s3731_s21 + $0x398] sm:$0xff] }
  0xf3   : > { %v1398_v63 = vmax.f32 %v1302_v33, 0.0  ;;  %v1780_v5 = vmul.f32 0.003921569, %v1683_v3  ;;  %v1303_v48 = vmul.f32 0.33333334, %v1158_v34  ;;  %v1160_v40 = vadd.f32 %v1159_v47, %v4862_v54  ;;  %v634_v54 = vld [vmem:[%s3731_s21 + $0x498] sm:$0xff] }
  0xf4   : > { %6997 = vst [vmem:[#allocation171_spill] sm:$0xff] %v4874_v32  ;;  %6998 = vst [vmem:[#allocation172_spill] sm:$0xff] %v4880_v45  ;;  %v1684_v29 = vfloor.f32 %v1588_v62  ;;  %v1589_v24 = vmul.f32 255.0, %v1493_v56  ;;  %v1161_v52 = vadd.f32 %v4874_v32, %v4870_v59  ;;  %v4887_v33 = vmul.f32 %v601_v38, %v4277_v8  ;;  %v604_v59 = vld [vmem:[%s3731_s21 + $0x3a8] sm:$0xff] }
  0xf5   : > { %v1494_v13 = vmin.f32 %v1398_v63, 1.0  ;;  %1876 = vst [vmem:[%s3980_s23 + $0x158] sm:$0xff] %v1780_v5  ;;  %v1399_v18 = vmax.f32 %v1303_v48, 0.0  ;;  %v1304_v3 = vmul.f32 0.33333334, %v1160_v40  ;;  %v4890_v47 = vmul.f32 %v633_v14, %v4277_v8  ;;  %v666_v14 = vld [vmem:[%s3731_s21 + $0x598] sm:$0xff] }
  0xf6   : > { %6999 = vst [vmem:[#allocation173_spill] sm:$0xff] %v4887_v33  ;;  %v1781_v34 = vmul.f32 0.003921569, %v1684_v29  ;;  %v1685_v56 = vfloor.f32 %v1589_v24  ;;  %v1162_v62 = vadd.f32 %v1161_v52, %v4880_v45  ;;  %v4896_v48 = vmul.f32 %v665_v36, %v4277_v8  ;;  %v603_v40 = vld [vmem:[%s3731_s21 + $0x3a0] sm:$0xff] }
  0xf7   : > { %7000 = vst [vmem:[#allocation174_spill] sm:$0xff] %v4890_v47  ;;  %v1590_v63 = vmul.f32 255.0, %v1494_v13  ;;  %v1495_v32 = vmin.f32 %v1399_v18, 1.0  ;;  %v1400_v5 = vmax.f32 %v1304_v3, 0.0  ;;  %v1163_v38 = vadd.f32 %v4890_v47, %v4887_v33  ;;  %v635_v47 = vld [vmem:[%s3731_s21 + $0x4a0] sm:$0xff] }
  0xf8   : > { %7001 = vst [vmem:[#allocation175_spill] sm:$0xff] %v4896_v48  ;;  %1877 = vst [vmem:[%s3980_s23 + $0x160] sm:$0xff] %v1781_v34  ;;  %v1782_v29 = vmul.f32 0.003921569, %v1685_v56  ;;  %v1305_v24 = vmul.f32 0.33333334, %v1162_v62  ;;  %v4904_v52 = vmul.f32 %v602_v22, %v4297_v42  ;;  %v4908_v45 = vmul.f32 %v634_v54, %v4297_v42 }
  0xf9   : > { %v1686_v13 = vfloor.f32 %v1590_v63  ;;  %v1591_v18 = vmul.f32 255.0, %v1495_v32  ;;  %v1496_v3 = vmin.f32 %v1400_v5, 1.0  ;;  %v1164_v36 = vadd.f32 %v1163_v38, %v4896_v48  ;;  %v667_v33 = vld [vmem:[%s3731_s21 + $0x5a0] sm:$0xff]  ;;  %v636_v38 = vld [vmem:[%s3731_s21 + $0x4a8] sm:$0xff] }
  0xfa   : > { %7002 = vst [vmem:[#allocation176_spill] sm:$0xff] %v4904_v52  ;;  %7003 = vst [vmem:[#allocation177_spill] sm:$0xff] %v4908_v45  ;;  %v1401_v56 = vmax.f32 %v1305_v24, 0.0  ;;  %v4915_v22 = vmul.f32 %v666_v14, %v4297_v42  ;;  %v4918_v32 = vmul.f32 %v603_v40, %v4319_v50  ;;  %v1165_v54 = vadd.f32 %v4908_v45, %v4904_v52  ;;  %v668_v48 = vld [vmem:[%s3731_s21 + $0x5a8] sm:$0xff]  ;;  %v605_v24 = vld [vmem:[%s3731_s21 + $0x3b0] sm:$0xff] }
  0xfb   : > { %1878 = vst [vmem:[%s3980_s23 + $0x168] sm:$0xff] %v1782_v29  ;;  %v1783_v34 = vmul.f32 0.003921569, %v1686_v13  ;;  %v1687_v63 = vfloor.f32 %v1591_v18  ;;  %v1592_v62 = vmul.f32 255.0, %v1496_v3  ;;  %v1306_v5 = vmul.f32 0.33333334, %v1164_v36 }
  0xfc   : > { %7004 = vst [vmem:[#allocation178_spill] sm:$0xff] %v4915_v22  ;;  %7005 = vst [vmem:[#allocation179_spill] sm:$0xff] %v4918_v32  ;;  %v1497_v29 = vmin.f32 %v1401_v56, 1.0  ;;  %v4926_v14 = vmul.f32 %v635_v47, %v4319_v50  ;;  %v4929_v40 = vmul.f32 %v667_v33, %v4319_v50  ;;  %v4932_v13 = vmul.f32 %v604_v59, %v4322_v11  ;;  %v637_v52 = vld [vmem:[%s3731_s21 + $0x4b0] sm:$0xff] }
  0xfd   : > { %1879 = vst [vmem:[%s3980_s23 + $0x170] sm:$0xff] %v1783_v34  ;;  %v1784_v18 = vmul.f32 0.003921569, %v1687_v63  ;;  %v1688_v3 = vfloor.f32 %v1592_v62  ;;  %v1402_v36 = vmax.f32 %v1306_v5, 0.0  ;;  %v1166_v45 = vadd.f32 %v1165_v54, %v4915_v22  ;;  %v669_v56 = vld [vmem:[%s3731_s21 + $0x5b0] sm:$0xff]  ;;  %v606_v63 = vld [vmem:[%s3731_s21 + $0x3b8] sm:$0xff] }
  0xfe   : > { %7006 = vst [vmem:[#allocation180_spill] sm:$0xff] %v4926_v14  ;;  %7007 = vst [vmem:[#allocation181_spill] sm:$0xff] %v4929_v40  ;;  %v1593_v34 = vmul.f32 255.0, %v1497_v29  ;;  %v1167_v47 = vadd.f32 %v4926_v14, %v4918_v32  ;;  %v4940_v33 = vmul.f32 %v636_v38, %v4322_v11  ;;  %v4943_v59 = vmul.f32 %v668_v48, %v4322_v11  ;;  %v638_v32 = vld [vmem:[%s3731_s21 + $0x4b8] sm:$0xff] }
  0xff   : > { %7008 = vst [vmem:[#allocation182_spill] sm:$0xff] %v4932_v13  ;;  %1880 = vst [vmem:[%s3980_s23 + $0x178] sm:$0xff] %v1784_v18  ;;  %v1785_v62 = vmul.f32 0.003921569, %v1688_v3  ;;  %v1498_v5 = vmin.f32 %v1402_v36, 1.0  ;;  %v4949_v29 = vmul.f32 %v605_v24, %v4368_v26  ;;  %v4955_v48 = vmul.f32 %v637_v52, %v4368_v26  ;;  %v607_v36 = vld [vmem:[%s3731_s21 + $0x3c0] sm:$0xff] }
 0x100   : > { %7009 = vst [vmem:[#allocation183_spill] sm:$0xff] %v4940_v33  ;;  %7010 = vst [vmem:[#allocation184_spill] sm:$0xff] %v4943_v59  ;;  %v1307_v54 = vmul.f32 0.33333334, %v1166_v45  ;;  %v1689_v22 = vfloor.f32 %v1593_v34  ;;  %v1168_v14 = vadd.f32 %v1167_v47, %v4929_v40  ;;  %v1169_v38 = vadd.f32 %v4940_v33, %v4932_v13  ;;  %v639_v33 = vld [vmem:[%s3731_s21 + $0x4c0] sm:$0xff]  ;;  %v678_v13 = vld [vmem:[%s3731_s21 + $0x5f8] sm:$0xff] }
 0x101   : > { %7011 = vst [vmem:[#allocation185_spill] sm:$0xff] %v4949_v29  ;;  %7012 = vst [vmem:[#allocation186_spill] sm:$0xff] %v4955_v48  ;;  %v1594_v18 = vmul.f32 255.0, %v1498_v5  ;;  %v4961_v24 = vmul.f32 %v669_v56, %v4368_v26  ;;  %v4964_v3 = vmul.f32 %v606_v63, %v4371_v61  ;;  %v1171_v40 = vadd.f32 %v4955_v48, %v4949_v29  ;;  %v671_v63 = vld [vmem:[%s3731_s21 + $0x5c0] sm:$0xff]  ;;  %v608_v48 = vld [vmem:[%s3731_s21 + $0x3c8] sm:$0xff] }
 0x102   : > { %1881 = vst [vmem:[%s3980_s23 + $0x180] sm:$0xff] %v1785_v62  ;;  %v1403_v45 = vmax.f32 %v1307_v54, 0.0  ;;  %v1786_v34 = vmul.f32 0.003921569, %v1689_v22  ;;  %v1308_v47 = vmul.f32 0.33333334, %v1168_v14  ;;  %v1170_v52 = vadd.f32 %v1169_v38, %v4943_v59 }
 0x103   : > { %7013 = vst [vmem:[#allocation187_spill] sm:$0xff] %v4961_v24  ;;  %7014 = vst [vmem:[#allocation188_spill] sm:$0xff] %v4964_v3  ;;  %v1690_v62 = vfloor.f32 %v1594_v18  ;;  %v4972_v54 = vmul.f32 %v638_v32, %v4371_v61  ;;  %v4975_v56 = vmul.f32 %v670_v12, %v4371_v61  ;;  %v1172_v38 = vadd.f32 %v1171_v40, %v4961_v24  ;;  %v640_v29 = vld [vmem:[%s3731_s21 + $0x4c8] sm:$0xff] }
 0x104   : > { %v1499_v5 = vmin.f32 %v1403_v45, 1.0  ;;  %1882 = vst [vmem:[%s3980_s23 + $0x188] sm:$0xff] %v1786_v34  ;;  %v1404_v22 = vmax.f32 %v1308_v47, 0.0  ;;  %v1309_v14 = vmul.f32 0.33333334, %v1170_v52  ;;  %v4981_v59 = vmul.f32 %v607_v36, %v4410_v7  ;;  %v672_v36 = vld [vmem:[%s3731_s21 + $0x5c8] sm:$0xff] }
 0x105   : > { %7015 = vst [vmem:[#allocation189_spill] sm:$0xff] %v4972_v54  ;;  %7016 = vst [vmem:[#allocation190_spill] sm:$0xff] %v4975_v56  ;;  %v1787_v18 = vmul.f32 0.003921569, %v1690_v62  ;;  %v1173_v32 = vadd.f32 %v4972_v54, %v4964_v3  ;;  %v4987_v12 = vmul.f32 %v639_v33, %v4410_v7  ;;  %v1310_v52 = vmul.f32 0.33333334, %v1172_v38 }
 0x106   : > { %7017 = vst [vmem:[#allocation191_spill] sm:$0xff] %v4981_v59  ;;  %v1595_v45 = vmul.f32 255.0, %v1499_v5  ;;  %v1500_v34 = vmin.f32 %v1404_v22, 1.0  ;;  %v1405_v47 = vmax.f32 %v1309_v14, 0.0  ;;  %v4991_v40 = vmul.f32 %v671_v63, %v4410_v7  ;;  %v609_v63 = vld [vmem:[%s3731_s21 + $0x3d0] sm:$0xff] }
 0x107   : > { %7018 = vst [vmem:[#allocation192_spill] sm:$0xff] %v4987_v12  ;;  %1883 = vst [vmem:[%s3980_s23 + $0x190] sm:$0xff] %v1787_v18  ;;  %v1174_v62 = vadd.f32 %v1173_v32, %v4975_v56  ;;  %v1175_v5 = vadd.f32 %v4987_v12, %v4981_v59  ;;  %v4999_v33 = vmul.f32 %v608_v48, %v4443_v43  ;;  %v1406_v14 = vmax.f32 %v1310_v52, 0.0  ;;  %v641_v18 = vld [vmem:[%s3731_s21 + $0x4d0] sm:$0xff] }
 0x108   : > { %7019 = vst [vmem:[#allocation193_spill] sm:$0xff] %v4991_v40  ;;  %v1691_v24 = vfloor.f32 %v1595_v45  ;;  %v1596_v54 = vmul.f32 255.0, %v1500_v34  ;;  %v1501_v22 = vmin.f32 %v1405_v47, 1.0  ;;  %v5002_v38 = vmul.f32 %v640_v29, %v4443_v43  ;;  %v673_v47 = vld [vmem:[%s3731_s21 + $0x5d0] sm:$0xff] }
 0x109   : > { %7020 = vst [vmem:[#allocation194_spill] sm:$0xff] %v4999_v33  ;;  %v1311_v3 = vmul.f32 0.33333334, %v1174_v62  ;;  %v1176_v32 = vadd.f32 %v1175_v5, %v4991_v40  ;;  %v5008_v56 = vmul.f32 %v672_v36, %v4443_v43  ;;  %v1502_v59 = vmin.f32 %v1406_v14, 1.0  ;;  %v610_v62 = vld [vmem:[%s3731_s21 + $0x3d8] sm:$0xff] }
 0x10a   : > { %7021 = vst [vmem:[#allocation195_spill] sm:$0xff] %v5002_v38  ;;  %v1788_v45 = vmul.f32 0.003921569, %v1691_v24  ;;  %v1692_v48 = vfloor.f32 %v1596_v54  ;;  %v1597_v12 = vmul.f32 255.0, %v1501_v22  ;;  %v1177_v34 = vadd.f32 %v5002_v38, %v4999_v33  ;;  %v642_v40 = vld [vmem:[%s3731_s21 + $0x4d8] sm:$0xff]  ;;  %v612_v33 = vld [vmem:[%s3731_s21 + $0x3e8] sm:$0xff] }
 0x10b   : > { %7022 = vst [vmem:[#allocation196_spill] sm:$0xff] %v5008_v56  ;;  %v1407_v29 = vmax.f32 %v1311_v3, 0.0  ;;  %v1312_v24 = vmul.f32 0.33333334, %v1176_v32  ;;  %v5015_v52 = vmul.f32 %v609_v63, %v4480_v2  ;;  %v5018_v36 = vmul.f32 %v641_v18, %v4480_v2  ;;  %v674_v18 = vld [vmem:[%s3731_s21 + $0x5d8] sm:$0xff]  ;;  %v611_v32 = vld [vmem:[%s3731_s21 + $0x3e0] sm:$0xff] }
 0x10c   : > { %1884 = vst [vmem:[%s3980_s23 + $0x198] sm:$0xff] %v1788_v45  ;;  %v1789_v54 = vmul.f32 0.003921569, %v1692_v48  ;;  %v1693_v5 = vfloor.f32 %v1597_v12  ;;  %v1598_v22 = vmul.f32 255.0, %v1502_v59  ;;  %v1178_v14 = vadd.f32 %v1177_v34, %v5008_v56 }
 0x10d   : > { %7023 = vst [vmem:[#allocation197_spill] sm:$0xff] %v5015_v52  ;;  %7024 = vst [vmem:[#allocation198_spill] sm:$0xff] %v5018_v36  ;;  %v1503_v38 = vmin.f32 %v1407_v29, 1.0  ;;  %v1408_v45 = vmax.f32 %v1312_v24, 0.0  ;;  %v5024_v3 = vmul.f32 %v673_v47, %v4480_v2  ;;  %v1179_v63 = vadd.f32 %v5018_v36, %v5015_v52  ;;  %v643_v36 = vld [vmem:[%s3731_s21 + $0x4e0] sm:$0xff] }
 0x10e   : > { %1885 = vst [vmem:[%s3980_s23 + $0x1a0] sm:$0xff] %v1789_v54  ;;  %v1790_v12 = vmul.f32 0.003921569, %v1693_v5  ;;  %v1694_v59 = vfloor.f32 %v1598_v22  ;;  %v1313_v48 = vmul.f32 0.33333334, %v1178_v14  ;;  %v5032_v34 = vmul.f32 %v610_v62, %v4498_v1  ;;  %v675_v52 = vld [vmem:[%s3731_s21 + $0x5e0] sm:$0xff] }
 0x10f   : > { %7025 = vst [vmem:[#allocation199_spill] sm:$0xff] %v5024_v3  ;;  %v1599_v29 = vmul.f32 255.0, %v1503_v38  ;;  %v1504_v24 = vmin.f32 %v1408_v45, 1.0  ;;  %v1180_v47 = vadd.f32 %v1179_v63, %v5024_v3  ;;  %v5036_v56 = vmul.f32 %v642_v40, %v4498_v1  ;;  %v644_v63 = vld [vmem:[%s3731_s21 + $0x4e8] sm:$0xff] }
 0x110   : > { %7026 = vst [vmem:[#allocation200_spill] sm:$0xff] %v5032_v34  ;;  %1886 = vst [vmem:[%s3980_s23 + $0x1a8] sm:$0xff] %v1790_v12  ;;  %v1791_v54 = vmul.f32 0.003921569, %v1694_v59  ;;  %v1409_v5 = vmax.f32 %v1313_v48, 0.0  ;;  %v5043_v62 = vmul.f32 %v674_v18, %v4498_v1  ;;  %v5046_v38 = vmul.f32 %v611_v32, %v4530_v35  ;;  %v676_v3 = vld [vmem:[%s3731_s21 + $0x5e8] sm:$0xff] }
 0x111   : > { %7027 = vst [vmem:[#allocation201_spill] sm:$0xff] %v5036_v56  ;;  %v1695_v22 = vfloor.f32 %v1599_v29  ;;  %v1600_v14 = vmul.f32 255.0, %v1504_v24  ;;  %v1314_v45 = vmul.f32 0.33333334, %v1180_v47  ;;  %v1181_v40 = vadd.f32 %v5036_v56, %v5032_v34  ;;  %v613_v48 = vld [vmem:[%s3731_s21 + $0x3f0] sm:$0xff] }
 0x112   : > { %7028 = vst [vmem:[#allocation202_spill] sm:$0xff] %v5043_v62  ;;  %7029 = vst [vmem:[#allocation203_spill] sm:$0xff] %v5046_v38  ;;  %v1505_v12 = vmin.f32 %v1409_v5, 1.0  ;;  %v5054_v18 = vmul.f32 %v643_v36, %v4530_v35  ;;  %v5057_v32 = vmul.f32 %v675_v52, %v4530_v35  ;;  %v5060_v59 = vmul.f32 %v612_v33, %v4554_v19  ;;  %v645_v34 = vld [vmem:[%s3731_s21 + $0x4f0] sm:$0xff] }
 0x113   : > { %1887 = vst [vmem:[%s3980_s23 + $0x1b0] sm:$0xff] %v1791_v54  ;;  %v1792_v29 = vmul.f32 0.003921569, %v1695_v22  ;;  %v1696_v24 = vfloor.f32 %v1600_v14  ;;  %v1410_v47 = vmax.f32 %v1314_v45, 0.0  ;;  %v1182_v56 = vadd.f32 %v1181_v40, %v5043_v62  ;;  %v677_v5 = vld [vmem:[%s3731_s21 + $0x5f0] sm:$0xff]  ;;  %v614_v22 = vld [vmem:[%s3731_s21 + $0x3f8] sm:$0xff] }
 0x114   : > { %7030 = vst [vmem:[#allocation204_spill] sm:$0xff] %v5054_v18  ;;  %7031 = vst [vmem:[#allocation205_spill] sm:$0xff] %v5057_v32  ;;  %v1601_v54 = vmul.f32 255.0, %v1505_v12  ;;  %v1183_v36 = vadd.f32 %v5054_v18, %v5046_v38  ;;  %v5068_v52 = vmul.f32 %v644_v63, %v4554_v19  ;;  %v5071_v33 = vmul.f32 %v676_v3, %v4554_v19  ;;  %v646_v38 = vld [vmem:[%s3731_s21 + $0x4f8] sm:$0xff] }
 0x115   : > { %1888 = vst [vmem:[%s3980_s23 + $0x1b8] sm:$0xff] %v1792_v29  ;;  %v1793_v14 = vmul.f32 0.003921569, %v1696_v24  ;;  %v1506_v45 = vmin.f32 %v1410_v47, 1.0  ;;  %v1315_v40 = vmul.f32 0.33333334, %v1182_v56  ;;  %v5077_v12 = vmul.f32 %v613_v48, %v4577_v17 }
 0x116   : > { %7032 = vst [vmem:[#allocation206_spill] sm:$0xff] %v5068_v52  ;;  %7033 = vst [vmem:[#allocation207_spill] sm:$0xff] %v5071_v33  ;;  %v1697_v62 = vfloor.f32 %v1601_v54  ;;  %v1184_v18 = vadd.f32 %v1183_v36, %v5057_v32  ;;  %v1185_v63 = vadd.f32 %v5068_v52, %v5060_v59  ;;  %v5083_v3 = vmul.f32 %v645_v34, %v4577_v17  ;;  %v679_v47 = vld [vmem:[%s3731_s21 + $0x600] sm:$0xff] }
 0x117   : > { %7034 = vst [vmem:[#allocation208_spill] sm:$0xff] %v5077_v12  ;;  %1889 = vst [vmem:[%s3980_s23 + $0x1c0] sm:$0xff] %v1793_v14  ;;  %v1602_v29 = vmul.f32 255.0, %v1506_v45  ;;  %v1411_v56 = vmax.f32 %v1315_v40, 0.0  ;;  %v5089_v48 = vmul.f32 %v677_v5, %v4577_v17  ;;  %v5092_v24 = vmul.f32 %v614_v22, %v4580_v27  ;;  %v711_v52 = vld [vmem:[%s3731_s21 + $0x700] sm:$0xff] }
 0x118   : > { %7035 = vst [vmem:[#allocation209_spill] sm:$0xff] %v5083_v3  ;;  %v1794_v54 = vmul.f32 0.003921569, %v1697_v62  ;;  %v1316_v36 = vmul.f32 0.33333334, %v1184_v18  ;;  %v1186_v34 = vadd.f32 %v1185_v63, %v5071_v33  ;;  %v1187_v32 = vadd.f32 %v5083_v3, %v5077_v12  ;;  %v743_v22 = vld [vmem:[%s3731_s21 + $0x800] sm:$0xff] }
 0x119   : > { %7036 = vst [vmem:[#allocation210_spill] sm:$0xff] %v5089_v48  ;;  %v1698_v14 = vfloor.f32 %v1602_v29  ;;  %v1507_v45 = vmin.f32 %v1411_v56, 1.0  ;;  %v5100_v40 = vmul.f32 %v646_v38, %v4580_v27  ;;  %v5103_v5 = vmul.f32 %v678_v13, %v4580_v27  ;;  %v680_v3 = vld [vmem:[%s3731_s21 + $0x608] sm:$0xff] }
 0x11a   : > { %1890 = vst [vmem:[%s3980_s23 + $0x1c8] sm:$0xff] %v1794_v54  ;;  %v1412_v62 = vmax.f32 %v1316_v36, 0.0  ;;  %v1317_v18 = vmul.f32 0.33333334, %v1186_v34  ;;  %v1188_v63 = vadd.f32 %v1187_v32, %v5089_v48  ;;  %v5109_v33 = vmul.f32 %v679_v47, %v3780_v21  ;;  %v712_v12 = vld [vmem:[%s3731_s21 + $0x708] sm:$0xff] }
 0x11b   : > { %7037 = vst [vmem:[#allocation211_spill] sm:$0xff] %v5100_v40  ;;  %7038 = vst [vmem:[#allocation212_spill] sm:$0xff] %v5103_v5  ;;  %v1795_v29 = vmul.f32 0.003921569, %v1698_v14  ;;  %v1603_v56 = vmul.f32 255.0, %v1507_v45  ;;  %v1189_v38 = vadd.f32 %v5100_v40, %v5092_v24  ;;  %v5115_v13 = vmul.f32 %v711_v52, %v3780_v21  ;;  %v744_v47 = vld [vmem:[%s3731_s21 + $0x808] sm:$0xff] }
 0x11c   : > { %7039 = vst [vmem:[#allocation213_spill] sm:$0xff] %v5109_v33  ;;  %v1508_v54 = vmin.f32 %v1412_v62, 1.0  ;;  %v1413_v36 = vmax.f32 %v1317_v18, 0.0  ;;  %v1318_v34 = vmul.f32 0.33333334, %v1188_v63  ;;  %v5119_v32 = vmul.f32 %v743_v22, %v3780_v21  ;;  %v681_v21 = vld [vmem:[%s3731_s21 + $0x610] sm:$0xff] }
 0x11d   : > { %7040 = vst [vmem:[#allocation214_spill] sm:$0xff] %v5115_v13  ;;  %1891 = vst [vmem:[%s3980_s23 + $0x1d0] sm:$0xff] %v1795_v29  ;;  %v1699_v48 = vfloor.f32 %v1603_v56  ;;  %v1190_v14 = vadd.f32 %v1189_v38, %v5103_v5  ;;  %v1191_v45 = vadd.f32 %v5115_v13, %v5109_v33  ;;  %v5127_v52 = vmul.f32 %v680_v3, %v3799_v28  ;;  %v713_v22 = vld [vmem:[%s3731_s21 + $0x710] sm:$0xff] }
 0x11e   : > { %7041 = vst [vmem:[#allocation215_spill] sm:$0xff] %v5119_v32  ;;  %v1604_v40 = vmul.f32 255.0, %v1508_v54  ;;  %v1509_v62 = vmin.f32 %v1413_v36, 1.0  ;;  %v1414_v18 = vmax.f32 %v1318_v34, 0.0  ;;  %v5130_v63 = vmul.f32 %v712_v12, %v3799_v28  ;;  %v745_v36 = vld [vmem:[%s3731_s21 + $0x810] sm:$0xff] }
 0x11f   : > { %v1796_v29 = vmul.f32 0.003921569, %v1699_v48  ;;  %v1319_v56 = vmul.f32 0.33333334, %v1190_v14  ;;  %v1192_v38 = vadd.f32 %v1191_v45, %v5119_v32  ;;  %v5136_v13 = vmul.f32 %v744_v47, %v3799_v28  ;;  %v682_v47 = vld [vmem:[%s3731_s21 + $0x618] sm:$0xff] }
 0x120   : > { %7042 = vst [vmem:[#allocation216_spill] sm:$0xff] %v5130_v63  ;;  %v1700_v3 = vfloor.f32 %v1604_v40  ;;  %v1605_v33 = vmul.f32 255.0, %v1509_v62  ;;  %v1510_v5 = vmin.f32 %v1414_v18, 1.0  ;;  %v1193_v54 = vadd.f32 %v5130_v63, %v5127_v52  ;;  %v714_v18 = vld [vmem:[%s3731_s21 + $0x718] sm:$0xff]  ;;  %v684_v63 = vld [vmem:[%s3731_s21 + $0x628] sm:$0xff] }
 0x121   : > { %7043 = vst [vmem:[#allocation217_spill] sm:$0xff] %v5136_v13  ;;  %1892 = vst [vmem:[%s3980_s23 + $0x1d8] sm:$0xff] %v1796_v29  ;;  %v1415_v12 = vmax.f32 %v1319_v56, 0.0  ;;  %v1320_v48 = vmul.f32 0.33333334, %v1192_v38  ;;  %v5143_v34 = vmul.f32 %v681_v21, %v3823_v37  ;;  %v5146_v28 = vmul.f32 %v713_v22, %v3823_v37  ;;  %v746_v22 = vld [vmem:[%s3731_s21 + $0x818] sm:$0xff] }
 0x122   : > { %v1797_v40 = vmul.f32 0.003921569, %v1700_v3  ;;  %v1701_v14 = vfloor.f32 %v1605_v33  ;;  %v1606_v45 = vmul.f32 255.0, %v1510_v5  ;;  %v1194_v62 = vadd.f32 %v1193_v54, %v5136_v13  ;;  %v683_v38 = vld [vmem:[%s3731_s21 + $0x620] sm:$0xff] }
 0x123   : > { %7044 = vst [vmem:[#allocation218_spill] sm:$0xff] %v5146_v28  ;;  %v1511_v32 = vmin.f32 %v1415_v12, 1.0  ;;  %v1416_v29 = vmax.f32 %v1320_v48, 0.0  ;;  %v5152_v56 = vmul.f32 %v745_v36, %v3823_v37  ;;  %v1195_v21 = vadd.f32 %v5146_v28, %v5143_v34  ;;  %v715_v13 = vld [vmem:[%s3731_s21 + $0x720] sm:$0xff] }
 0x124   : > { %1893 = vst [vmem:[%s3980_s23 + $0x1e0] sm:$0xff] %v1797_v40  ;;  %v1798_v33 = vmul.f32 0.003921569, %v1701_v14  ;;  %v1702_v5 = vfloor.f32 %v1606_v45  ;;  %v1321_v3 = vmul.f32 0.33333334, %v1194_v62  ;;  %v5160_v54 = vmul.f32 %v682_v47, %v3845_v46  ;;  %v747_v28 = vld [vmem:[%s3731_s21 + $0x820] sm:$0xff] }
 0x125   : > { %7045 = vst [vmem:[#allocation219_spill] sm:$0xff] %v5152_v56  ;;  %v1607_v12 = vmul.f32 255.0, %v1511_v32  ;;  %v1512_v48 = vmin.f32 %v1416_v29, 1.0  ;;  %v1196_v37 = vadd.f32 %v1195_v21, %v5152_v56  ;;  %v5164_v36 = vmul.f32 %v714_v18, %v3845_v46  ;;  %v716_v21 = vld [vmem:[%s3731_s21 + $0x728] sm:$0xff] }
 0x126   : > { %1894 = vst [vmem:[%s3980_s23 + $0x1e8] sm:$0xff] %v1798_v33  ;;  %v1799_v40 = vmul.f32 0.003921569, %v1702_v5  ;;  %v1417_v14 = vmax.f32 %v1321_v3, 0.0  ;;  %v5171_v47 = vmul.f32 %v746_v22, %v3845_v46  ;;  %v5174_v32 = vmul.f32 %v683_v38, %v3870_v57  ;;  %v748_v56 = vld [vmem:[%s3731_s21 + $0x828] sm:$0xff]  ;;  %v685_v5 = vld [vmem:[%s3731_s21 + $0x630] sm:$0xff] }
 0x127   : > { %7046 = vst [vmem:[#allocation220_spill] sm:$0xff] %v5164_v36  ;;  %v1703_v45 = vfloor.f32 %v1607_v12  ;;  %v1608_v62 = vmul.f32 255.0, %v1512_v48  ;;  %v1322_v29 = vmul.f32 0.33333334, %v1196_v37  ;;  %v1197_v18 = vadd.f32 %v5164_v36, %v5160_v54  ;;  %v717_v36 = vld [vmem:[%s3731_s21 + $0x730] sm:$0xff] }
 0x128   : > { %7047 = vst [vmem:[#allocation221_spill] sm:$0xff] %v5171_v47  ;;  %1895 = vst [vmem:[%s3980_s23 + $0x1f0] sm:$0xff] %v1799_v40  ;;  %v1513_v33 = vmin.f32 %v1417_v14, 1.0  ;;  %v5182_v46 = vmul.f32 %v715_v13, %v3870_v57  ;;  %v5185_v22 = vmul.f32 %v747_v28, %v3870_v57  ;;  %v5188_v38 = vmul.f32 %v684_v63, %v3873_v58  ;;  %v749_v28 = vld [vmem:[%s3731_s21 + $0x830] sm:$0xff]  ;;  %v686_v14 = vld [vmem:[%s3731_s21 + $0x638] sm:$0xff] }
 0x129   : > { %v1800_v3 = vmul.f32 0.003921569, %v1703_v45  ;;  %v1704_v12 = vfloor.f32 %v1608_v62  ;;  %v1418_v48 = vmax.f32 %v1322_v29, 0.0  ;;  %v1198_v37 = vadd.f32 %v1197_v18, %v5171_v47 }
 0x12a   : > { %7048 = vst [vmem:[#allocation222_spill] sm:$0xff] %v5182_v46  ;;  %7049 = vst [vmem:[#allocation223_spill] sm:$0xff] %v5185_v22  ;;  %v1609_v40 = vmul.f32 255.0, %v1513_v33  ;;  %v1199_v13 = vadd.f32 %v5182_v46, %v5174_v32  ;;  %v5196_v57 = vmul.f32 %v716_v21, %v3873_v58  ;;  %v5199_v63 = vmul.f32 %v748_v56, %v3873_v58  ;;  %v718_v56 = vld [vmem:[%s3731_s21 + $0x738] sm:$0xff]  ;;  %v719_v46 = vld [vmem:[%s3731_s21 + $0x740] sm:$0xff] }
 0x12b   : > { %1896 = vst [vmem:[%s3980_s23 + $0x1f8] sm:$0xff] %v1800_v3  ;;  %v5204_v45 = vmul.f32 0.003921569, %v1704_v12  ;;  %v1514_v62 = vmin.f32 %v1418_v48, 1.0  ;;  %v1323_v29 = vmul.f32 0.33333334, %v1198_v37  ;;  %v5207_v18 = vmul.f32 %v685_v5, %v3917_v23 }
 0x12c   : > { %7050 = vst [vmem:[#allocation224_spill] sm:$0xff] %v5196_v57  ;;  %7051 = vst [vmem:[#allocation225_spill] sm:$0xff] %v5199_v63  ;;  %v1705_v33 = vfloor.f32 %v1609_v40  ;;  %v1200_v47 = vadd.f32 %v1199_v13, %v5185_v22  ;;  %v1201_v21 = vadd.f32 %v5196_v57, %v5188_v38  ;;  %v5213_v58 = vmul.f32 %v717_v36, %v3917_v23  ;;  %v750_v3 = vld [vmem:[%s3731_s21 + $0x838] sm:$0xff]  ;;  %v687_v40 = vld [vmem:[%s3731_s21 + $0x640] sm:$0xff] }
 0x12d   : > { %7052 = vst [vmem:[#allocation226_spill] sm:$0xff] %v5204_v45  ;;  %1897 = vst [vmem:[%s3980_s23 + $0x200] sm:$0xff] %v5204_v45  ;;  %v1610_v12 = vmul.f32 255.0, %v1514_v62  ;;  %v1419_v48 = vmax.f32 %v1323_v29, 0.0  ;;  %v5220_v5 = vmul.f32 %v749_v28, %v3917_v23  ;;  %v5223_v37 = vmul.f32 %v686_v14, %v3959_v15  ;;  %v751_v28 = vld [vmem:[%s3731_s21 + $0x840] sm:$0xff] }
 0x12e   : > { %7053 = vst [vmem:[#allocation227_spill] sm:$0xff] %v5213_v58  ;;  %v1802_v13 = vmul.f32 0.003921569, %v1705_v33  ;;  %v1324_v22 = vmul.f32 0.33333334, %v1200_v47  ;;  %v1202_v36 = vadd.f32 %v1201_v21, %v5199_v63  ;;  %v1203_v57 = vadd.f32 %v5213_v58, %v5207_v18  ;;  %v688_v63 = vld [vmem:[%s3731_s21 + $0x648] sm:$0xff] }
 0x12f   : > { %7054 = vst [vmem:[#allocation228_spill] sm:$0xff] %v5220_v5  ;;  %v1706_v45 = vfloor.f32 %v1610_v12  ;;  %v1515_v62 = vmin.f32 %v1419_v48, 1.0  ;;  %v5231_v29 = vmul.f32 %v718_v56, %v3959_v15  ;;  %v5234_v23 = vmul.f32 %v750_v3, %v3959_v15  ;;  %v720_v3 = vld [vmem:[%s3731_s21 + $0x748] sm:$0xff] }
 0x130   : > { %1898 = vst [vmem:[%s3980_s23 + $0x208] sm:$0xff] %v1802_v13  ;;  %v1420_v47 = vmax.f32 %v1324_v22, 0.0  ;;  %v1325_v14 = vmul.f32 0.33333334, %v1202_v36  ;;  %v1204_v33 = vadd.f32 %v1203_v57, %v5220_v5  ;;  %v5240_v21 = vmul.f32 %v687_v40, %v4010_v10  ;;  %v752_v40 = vld [vmem:[%s3731_s21 + $0x848] sm:$0xff] }
 0x131   : > { %7055 = vst [vmem:[#allocation229_spill] sm:$0xff] %v5231_v29  ;;  %7056 = vst [vmem:[#allocation230_spill] sm:$0xff] %v5234_v23  ;;  %v1803_v12 = vmul.f32 0.003921569, %v1706_v45  ;;  %v1611_v48 = vmul.f32 255.0, %v1515_v62  ;;  %v1205_v56 = vadd.f32 %v5231_v29, %v5223_v37  ;;  %v5246_v15 = vmul.f32 %v719_v46, %v4010_v10 }
 0x132   : > { %v1516_v13 = vmin.f32 %v1420_v47, 1.0  ;;  %v1421_v22 = vmax.f32 %v1325_v14, 0.0  ;;  %v1326_v36 = vmul.f32 0.33333334, %v1204_v33  ;;  %v5250_v57 = vmul.f32 %v751_v28, %v4010_v10  ;;  %v689_v10 = vld [vmem:[%s3731_s21 + $0x650] sm:$0xff] }
 0x133   : > { %7057 = vst [vmem:[#allocation231_spill] sm:$0xff] %v5246_v15  ;;  %1899 = vst [vmem:[%s3980_s23 + $0x210] sm:$0xff] %v1803_v12  ;;  %v1707_v5 = vfloor.f32 %v1611_v48  ;;  %v1206_v45 = vadd.f32 %v1205_v56, %v5234_v23  ;;  %v1207_v62 = vadd.f32 %v5246_v15, %v5240_v21  ;;  %v5258_v46 = vmul.f32 %v688_v63, %v4040_v49  ;;  %v721_v28 = vld [vmem:[%s3731_s21 + $0x750] sm:$0xff] }
 0x134   : > { %7058 = vst [vmem:[#allocation232_spill] sm:$0xff] %v5250_v57  ;;  %v1612_v29 = vmul.f32 255.0, %v1516_v13  ;;  %v1517_v47 = vmin.f32 %v1421_v22, 1.0  ;;  %v1422_v14 = vmax.f32 %v1326_v36, 0.0  ;;  %v5261_v33 = vmul.f32 %v720_v3, %v4040_v49  ;;  %v753_v22 = vld [vmem:[%s3731_s21 + $0x850] sm:$0xff] }
 0x135   : > { %v1804_v12 = vmul.f32 0.003921569, %v1707_v5  ;;  %v1327_v48 = vmul.f32 0.33333334, %v1206_v45  ;;  %v1208_v56 = vadd.f32 %v1207_v62, %v5250_v57  ;;  %v5267_v23 = vmul.f32 %v752_v40, %v4040_v49  ;;  %v690_v40 = vld [vmem:[%s3731_s21 + $0x658] sm:$0xff] }
 0x136   : > { %7059 = vst [vmem:[#allocation233_spill] sm:$0xff] %v5261_v33  ;;  %v1708_v63 = vfloor.f32 %v1612_v29  ;;  %v1613_v15 = vmul.f32 255.0, %v1517_v47  ;;  %v1518_v58 = vmin.f32 %v1422_v14, 1.0  ;;  %v1209_v13 = vadd.f32 %v5261_v33, %v5258_v46  ;;  %v722_v14 = vld [vmem:[%s3731_s21 + $0x758] sm:$0xff]  ;;  %v692_v33 = vld [vmem:[%s3731_s21 + $0x668] sm:$0xff] }
 0x137   : > { %7060 = vst [vmem:[#allocation234_spill] sm:$0xff] %v5267_v23  ;;  %1900 = vst [vmem:[%s3980_s23 + $0x218] sm:$0xff] %v1804_v12  ;;  %v1423_v3 = vmax.f32 %v1327_v48, 0.0  ;;  %v1328_v5 = vmul.f32 0.33333334, %v1208_v56  ;;  %v5274_v36 = vmul.f32 %v689_v10, %v4045_v53  ;;  %v5277_v49 = vmul.f32 %v721_v28, %v4045_v53  ;;  %v754_v28 = vld [vmem:[%s3731_s21 + $0x858] sm:$0xff] }
 0x138   : > { %v1805_v29 = vmul.f32 0.003921569, %v1708_v63  ;;  %v1709_v45 = vfloor.f32 %v1613_v15  ;;  %v1614_v62 = vmul.f32 255.0, %v1518_v58  ;;  %v1210_v47 = vadd.f32 %v1209_v13, %v5267_v23  ;;  %v691_v56 = vld [vmem:[%s3731_s21 + $0x660] sm:$0xff] }
 0x139   : > { %7061 = vst [vmem:[#allocation235_spill] sm:$0xff] %v5277_v49  ;;  %v1519_v57 = vmin.f32 %v1423_v3, 1.0  ;;  %v1424_v12 = vmax.f32 %v1328_v5, 0.0  ;;  %v5283_v48 = vmul.f32 %v753_v22, %v4045_v53  ;;  %v1211_v10 = vadd.f32 %v5277_v49, %v5274_v36  ;;  %v723_v23 = vld [vmem:[%s3731_s21 + $0x760] sm:$0xff] }
 0x13a   : > { %1901 = vst [vmem:[%s3980_s23 + $0x220] sm:$0xff] %v1805_v29  ;;  %v1806_v15 = vmul.f32 0.003921569, %v1709_v45  ;;  %v1710_v58 = vfloor.f32 %v1614_v62  ;;  %v1329_v63 = vmul.f32 0.33333334, %v1210_v47  ;;  %v5291_v13 = vmul.f32 %v690_v40, %v4087_v4  ;;  %v755_v49 = vld [vmem:[%s3731_s21 + $0x860] sm:$0xff] }
 0x13b   : > { %7062 = vst [vmem:[#allocation236_spill] sm:$0xff] %v5283_v48  ;;  %v1615_v3 = vmul.f32 255.0, %v1519_v57  ;;  %v1520_v5 = vmin.f32 %v1424_v12, 1.0  ;;  %v1212_v53 = vadd.f32 %v1211_v10, %v5283_v48  ;;  %v5295_v22 = vmul.f32 %v722_v14, %v4087_v4  ;;  %v724_v10 = vld [vmem:[%s3731_s21 + $0x768] sm:$0xff] }
 0x13c   : > { %1902 = vst [vmem:[%s3980_s23 + $0x228] sm:$0xff] %v1806_v15  ;;  %v1807_v29 = vmul.f32 0.003921569, %v1710_v58  ;;  %v1425_v45 = vmax.f32 %v1329_v63, 0.0  ;;  %v5302_v40 = vmul.f32 %v754_v28, %v4087_v4  ;;  %v5305_v57 = vmul.f32 %v691_v56, %v4120_v39  ;;  %v756_v48 = vld [vmem:[%s3731_s21 + $0x868] sm:$0xff]  ;;  %v693_v58 = vld [vmem:[%s3731_s21 + $0x670] sm:$0xff] }
 0x13d   : > { %7063 = vst [vmem:[#allocation237_spill] sm:$0xff] %v5295_v22  ;;  %v1711_v62 = vfloor.f32 %v1615_v3  ;;  %v1616_v47 = vmul.f32 255.0, %v1520_v5  ;;  %v1330_v12 = vmul.f32 0.33333334, %v1212_v53  ;;  %v1213_v14 = vadd.f32 %v5295_v22, %v5291_v13  ;;  %v725_v22 = vld [vmem:[%s3731_s21 + $0x770] sm:$0xff] }
 0x13e   : > { %7064 = vst [vmem:[#allocation238_spill] sm:$0xff] %v5302_v40  ;;  %1903 = vst [vmem:[%s3980_s23 + $0x230] sm:$0xff] %v1807_v29  ;;  %v1521_v15 = vmin.f32 %v1425_v45, 1.0  ;;  %v5313_v4 = vmul.f32 %v723_v23, %v4120_v39  ;;  %v5316_v28 = vmul.f32 %v755_v49, %v4120_v39  ;;  %v5319_v56 = vmul.f32 %v692_v33, %v4144_v6  ;;  %v757_v49 = vld [vmem:[%s3731_s21 + $0x870] sm:$0xff]  ;;  %v694_v45 = vld [vmem:[%s3731_s21 + $0x678] sm:$0xff] }
 0x13f   : > { %v1808_v63 = vmul.f32 0.003921569, %v1711_v62  ;;  %v1712_v3 = vfloor.f32 %v1616_v47  ;;  %v1426_v5 = vmax.f32 %v1330_v12, 0.0  ;;  %v1214_v53 = vadd.f32 %v1213_v14, %v5302_v40 }
 0x140   : > { %7065 = vst [vmem:[#allocation239_spill] sm:$0xff] %v5313_v4  ;;  %7066 = vst [vmem:[#allocation240_spill] sm:$0xff] %v5316_v28  ;;  %v1617_v29 = vmul.f32 255.0, %v1521_v15  ;;  %v1215_v23 = vadd.f32 %v5313_v4, %v5305_v57  ;;  %v5327_v39 = vmul.f32 %v724_v10, %v4144_v6  ;;  %v5330_v33 = vmul.f32 %v756_v48, %v4144_v6  ;;  %v726_v48 = vld [vmem:[%s3731_s21 + $0x778] sm:$0xff] }
 0x141   : > { %1904 = vst [vmem:[%s3980_s23 + $0x238] sm:$0xff] %v1808_v63  ;;  %v1809_v62 = vmul.f32 0.003921569, %v1712_v3  ;;  %v1522_v47 = vmin.f32 %v1426_v5, 1.0  ;;  %v1331_v12 = vmul.f32 0.33333334, %v1214_v53  ;;  %v5336_v14 = vmul.f32 %v693_v58, %v4166_v55 }
 0x142   : > { %7067 = vst [vmem:[#allocation241_spill] sm:$0xff] %v5327_v39  ;;  %7068 = vst [vmem:[#allocation242_spill] sm:$0xff] %v5330_v33  ;;  %v1713_v15 = vfloor.f32 %v1617_v29  ;;  %v1216_v40 = vadd.f32 %v1215_v23, %v5316_v28  ;;  %v1217_v10 = vadd.f32 %v5327_v39, %v5319_v56  ;;  %v5342_v6 = vmul.f32 %v725_v22, %v4166_v55  ;;  %v758_v4 = vld [vmem:[%s3731_s21 + $0x878] sm:$0xff]  ;;  %v695_v53 = vld [vmem:[%s3731_s21 + $0x680] sm:$0xff] }
 0x143   : > { %1905 = vst [vmem:[%s3980_s23 + $0x240] sm:$0xff] %v1809_v62  ;;  %v1618_v63 = vmul.f32 255.0, %v1522_v47  ;;  %v1427_v3 = vmax.f32 %v1331_v12, 0.0  ;;  %v5348_v58 = vmul.f32 %v757_v49, %v4166_v55  ;;  %v5351_v5 = vmul.f32 %v694_v45, %v4189_v20  ;;  %v727_v39 = vld [vmem:[%s3731_s21 + $0x780] sm:$0xff] }
 0x144   : > { %7069 = vst [vmem:[#allocation243_spill] sm:$0xff] %v5342_v6  ;;  %v1810_v29 = vmul.f32 0.003921569, %v1713_v15  ;;  %v1332_v23 = vmul.f32 0.33333334, %v1216_v40  ;;  %v1218_v22 = vadd.f32 %v1217_v10, %v5330_v33  ;;  %v1219_v28 = vadd.f32 %v5342_v6, %v5336_v14  ;;  %v759_v49 = vld [vmem:[%s3731_s21 + $0x880] sm:$0xff] }
 0x145   : > { %7070 = vst [vmem:[#allocation244_spill] sm:$0xff] %v5348_v58  ;;  %v1714_v62 = vfloor.f32 %v1618_v63  ;;  %v1523_v47 = vmin.f32 %v1427_v3, 1.0  ;;  %v5359_v12 = vmul.f32 %v726_v48, %v4189_v20  ;;  %v5362_v55 = vmul.f32 %v758_v4, %v4189_v20  ;;  %v696_v33 = vld [vmem:[%s3731_s21 + $0x688] sm:$0xff] }
 0x146   : > { %1906 = vst [vmem:[%s3980_s23 + $0x248] sm:$0xff] %v1810_v29  ;;  %v1428_v40 = vmax.f32 %v1332_v23, 0.0  ;;  %v1333_v45 = vmul.f32 0.33333334, %v1218_v22  ;;  %v1220_v15 = vadd.f32 %v1219_v28, %v5348_v58  ;;  %v5368_v10 = vmul.f32 %v695_v53, %v4227_v30  ;;  %v728_v4 = vld [vmem:[%s3731_s21 + $0x788] sm:$0xff] }
 0x147   : > { %7071 = vst [vmem:[#allocation245_spill] sm:$0xff] %v5359_v12  ;;  %7072 = vst [vmem:[#allocation246_spill] sm:$0xff] %v5362_v55  ;;  %v1811_v63 = vmul.f32 0.003921569, %v1714_v62  ;;  %v1619_v3 = vmul.f32 255.0, %v1523_v47  ;;  %v1221_v48 = vadd.f32 %v5359_v12, %v5351_v5  ;;  %v5374_v20 = vmul.f32 %v727_v39, %v4227_v30  ;;  %v760_v53 = vld [vmem:[%s3731_s21 + $0x888] sm:$0xff] }
 0x148   : > { %v1524_v29 = vmin.f32 %v1428_v40, 1.0  ;;  %v1429_v23 = vmax.f32 %v1333_v45, 0.0  ;;  %v1334_v22 = vmul.f32 0.33333334, %v1220_v15  ;;  %v5378_v28 = vmul.f32 %v759_v49, %v4227_v30  ;;  %v697_v30 = vld [vmem:[%s3731_s21 + $0x690] sm:$0xff] }
 0x149   : > { %7073 = vst [vmem:[#allocation247_spill] sm:$0xff] %v5374_v20  ;;  %1907 = vst [vmem:[%s3980_s23 + $0x250] sm:$0xff] %v1811_v63  ;;  %v1715_v58 = vfloor.f32 %v1619_v3  ;;  %v1222_v62 = vadd.f32 %v1221_v48, %v5362_v55  ;;  %v1223_v47 = vadd.f32 %v5374_v20, %v5368_v10  ;;  %v5386_v39 = vmul.f32 %v696_v33, %v4247_v16  ;;  %v729_v49 = vld [vmem:[%s3731_s21 + $0x790] sm:$0xff] }
 0x14a   : > { %7074 = vst [vmem:[#allocation248_spill] sm:$0xff] %v5378_v28  ;;  %v1620_v12 = vmul.f32 255.0, %v1524_v29  ;;  %v1525_v40 = vmin.f32 %v1429_v23, 1.0  ;;  %v1430_v45 = vmax.f32 %v1334_v22, 0.0  ;;  %v5389_v15 = vmul.f32 %v728_v4, %v4247_v16  ;;  %v761_v23 = vld [vmem:[%s3731_s21 + $0x890] sm:$0xff] }
 0x14b   : > { %v1812_v63 = vmul.f32 0.003921569, %v1715_v58  ;;  %v1335_v3 = vmul.f32 0.33333334, %v1222_v62  ;;  %v1224_v48 = vadd.f32 %v1223_v47, %v5378_v28  ;;  %v5395_v55 = vmul.f32 %v760_v53, %v4247_v16  ;;  %v698_v53 = vld [vmem:[%s3731_s21 + $0x698] sm:$0xff] }
 0x14c   : > { %7075 = vst [vmem:[#allocation249_spill] sm:$0xff] %v5389_v15  ;;  %v1716_v33 = vfloor.f32 %v1620_v12  ;;  %v1621_v20 = vmul.f32 255.0, %v1525_v40  ;;  %v1526_v6 = vmin.f32 %v1430_v45, 1.0  ;;  %v1225_v29 = vadd.f32 %v5389_v15, %v5386_v39  ;;  %v730_v45 = vld [vmem:[%s3731_s21 + $0x798] sm:$0xff]  ;;  %v700_v15 = vld [vmem:[%s3731_s21 + $0x6a8] sm:$0xff] }
 0x14d   : > { %7076 = vst [vmem:[#allocation250_spill] sm:$0xff] %v5395_v55  ;;  %1908 = vst [vmem:[%s3980_s23 + $0x258] sm:$0xff] %v1812_v63  ;;  %v1431_v4 = vmax.f32 %v1335_v3, 0.0  ;;  %v1336_v58 = vmul.f32 0.33333334, %v1224_v48  ;;  %v5402_v22 = vmul.f32 %v697_v30, %v4277_v8  ;;  %v5405_v16 = vmul.f32 %v729_v49, %v4277_v8  ;;  %v762_v49 = vld [vmem:[%s3731_s21 + $0x898] sm:$0xff] }
 0x14e   : > { %v1813_v12 = vmul.f32 0.003921569, %v1716_v33  ;;  %v1717_v62 = vfloor.f32 %v1621_v20  ;;  %v1622_v47 = vmul.f32 255.0, %v1526_v6  ;;  %v1226_v40 = vadd.f32 %v1225_v29, %v5395_v55  ;;  %v699_v48 = vld [vmem:[%s3731_s21 + $0x6a0] sm:$0xff] }
 0x14f   : > { %7077 = vst [vmem:[#allocation251_spill] sm:$0xff] %v5405_v16  ;;  %v1527_v28 = vmin.f32 %v1431_v4, 1.0  ;;  %v1432_v63 = vmax.f32 %v1336_v58, 0.0  ;;  %v5411_v3 = vmul.f32 %v761_v23, %v4277_v8  ;;  %v1227_v30 = vadd.f32 %v5405_v16, %v5402_v22  ;;  %v731_v55 = vld [vmem:[%s3731_s21 + $0x7a0] sm:$0xff] }
 0x150   : > { %1909 = vst [vmem:[%s3980_s23 + $0x260] sm:$0xff] %v1813_v12  ;;  %v1814_v20 = vmul.f32 0.003921569, %v1717_v62  ;;  %v1718_v6 = vfloor.f32 %v1622_v47  ;;  %v1337_v33 = vmul.f32 0.33333334, %v1226_v40  ;;  %v5419_v29 = vmul.f32 %v698_v53, %v4297_v42  ;;  %v763_v16 = vld [vmem:[%s3731_s21 + $0x8a0] sm:$0xff] }
 0x151   : > { %7078 = vst [vmem:[#allocation252_spill] sm:$0xff] %v5411_v3  ;;  %v1623_v4 = vmul.f32 255.0, %v1527_v28  ;;  %v1528_v58 = vmin.f32 %v1432_v63, 1.0  ;;  %v1228_v8 = vadd.f32 %v1227_v30, %v5411_v3  ;;  %v5423_v23 = vmul.f32 %v730_v45, %v4297_v42  ;;  %v732_v30 = vld [vmem:[%s3731_s21 + $0x7a8] sm:$0xff] }
 0x152   : > { %1910 = vst [vmem:[%s3980_s23 + $0x268] sm:$0xff] %v1814_v20  ;;  %v1815_v12 = vmul.f32 0.003921569, %v1718_v6  ;;  %v1433_v62 = vmax.f32 %v1337_v33, 0.0  ;;  %v5430_v53 = vmul.f32 %v762_v49, %v4297_v42  ;;  %v5433_v28 = vmul.f32 %v699_v48, %v4319_v50  ;;  %v764_v3 = vld [vmem:[%s3731_s21 + $0x8a8] sm:$0xff]  ;;  %v701_v6 = vld [vmem:[%s3731_s21 + $0x6b0] sm:$0xff] }
 0x153   : > { %7079 = vst [vmem:[#allocation253_spill] sm:$0xff] %v5423_v23  ;;  %v1719_v47 = vfloor.f32 %v1623_v4  ;;  %v1624_v40 = vmul.f32 255.0, %v1528_v58  ;;  %v1338_v63 = vmul.f32 0.33333334, %v1228_v8  ;;  %v1229_v45 = vadd.f32 %v5423_v23, %v5419_v29  ;;  %v733_v23 = vld [vmem:[%s3731_s21 + $0x7b0] sm:$0xff] }
 0x154   : > { %7080 = vst [vmem:[#allocation254_spill] sm:$0xff] %v5430_v53  ;;  %1911 = vst [vmem:[%s3980_s23 + $0x270] sm:$0xff] %v1815_v12  ;;  %v1529_v20 = vmin.f32 %v1433_v62, 1.0  ;;  %v5441_v42 = vmul.f32 %v731_v55, %v4319_v50  ;;  %v5444_v49 = vmul.f32 %v763_v16, %v4319_v50  ;;  %v5447_v48 = vmul.f32 %v700_v15, %v4322_v11  ;;  %v765_v16 = vld [vmem:[%s3731_s21 + $0x8b0] sm:$0xff]  ;;  %v702_v62 = vld [vmem:[%s3731_s21 + $0x6b8] sm:$0xff] }
 0x155   : > { %v1816_v33 = vmul.f32 0.003921569, %v1719_v47  ;;  %v1720_v4 = vfloor.f32 %v1624_v40  ;;  %v1434_v58 = vmax.f32 %v1338_v63, 0.0  ;;  %v1230_v8 = vadd.f32 %v1229_v45, %v5430_v53 }
 0x156   : > { %7081 = vst [vmem:[#allocation255_spill] sm:$0xff] %v5441_v42  ;;  %7082 = vst [vmem:[#allocation256_spill] sm:$0xff] %v5444_v49  ;;  %v1625_v12 = vmul.f32 255.0, %v1529_v20  ;;  %v1231_v55 = vadd.f32 %v5441_v42, %v5433_v28  ;;  %v5455_v50 = vmul.f32 %v732_v30, %v4322_v11  ;;  %v5458_v15 = vmul.f32 %v764_v3, %v4322_v11  ;;  %v734_v3 = vld [vmem:[%s3731_s21 + $0x7b8] sm:$0xff] }
 0x157   : > { %1912 = vst [vmem:[%s3980_s23 + $0x278] sm:$0xff] %v1816_v33  ;;  %v1817_v47 = vmul.f32 0.003921569, %v1720_v4  ;;  %v1530_v40 = vmin.f32 %v1434_v58, 1.0  ;;  %v1339_v63 = vmul.f32 0.33333334, %v1230_v8  ;;  %v5464_v45 = vmul.f32 %v701_v6, %v4368_v26 }
 0x158   : > { %7083 = vst [vmem:[#allocation257_spill] sm:$0xff] %v5455_v50  ;;  %7084 = vst [vmem:[#allocation258_spill] sm:$0xff] %v5458_v15  ;;  %v1721_v20 = vfloor.f32 %v1625_v12  ;;  %v1232_v53 = vadd.f32 %v1231_v55, %v5444_v49  ;;  %v1233_v30 = vadd.f32 %v5455_v50, %v5447_v48  ;;  %v5470_v11 = vmul.f32 %v733_v23, %v4368_v26  ;;  %v766_v42 = vld [vmem:[%s3731_s21 + $0x8b8] sm:$0xff]  ;;  %v703_v8 = vld [vmem:[%s3731_s21 + $0x6c0] sm:$0xff] }
 0x159   : > { %1913 = vst [vmem:[%s3980_s23 + $0x280] sm:$0xff] %v1817_v47  ;;  %v1626_v33 = vmul.f32 255.0, %v1530_v40  ;;  %v1435_v4 = vmax.f32 %v1339_v63, 0.0  ;;  %v5476_v6 = vmul.f32 %v765_v16, %v4368_v26  ;;  %v5479_v58 = vmul.f32 %v702_v62, %v4371_v61  ;;  %v735_v50 = vld [vmem:[%s3731_s21 + $0x7c0] sm:$0xff] }
 0x15a   : > { %7085 = vst [vmem:[#allocation259_spill] sm:$0xff] %v5470_v11  ;;  %v1818_v12 = vmul.f32 0.003921569, %v1721_v20  ;;  %v1340_v55 = vmul.f32 0.33333334, %v1232_v53  ;;  %v1234_v23 = vadd.f32 %v1233_v30, %v5458_v15  ;;  %v1235_v49 = vadd.f32 %v5470_v11, %v5464_v45  ;;  %v767_v16 = vld [vmem:[%s3731_s21 + $0x8c0] sm:$0xff] }
 0x15b   : > { %7086 = vst [vmem:[#allocation260_spill] sm:$0xff] %v5476_v6  ;;  %v1722_v47 = vfloor.f32 %v1626_v33  ;;  %v1531_v40 = vmin.f32 %v1435_v4, 1.0  ;;  %v5487_v63 = vmul.f32 %v734_v3, %v4371_v61  ;;  %v5490_v26 = vmul.f32 %v766_v42, %v4371_v61  ;;  %v704_v15 = vld [vmem:[%s3731_s21 + $0x6c8] sm:$0xff] }
 0x15c   : > { %1914 = vst [vmem:[%s3980_s23 + $0x288] sm:$0xff] %v1818_v12  ;;  %v1436_v53 = vmax.f32 %v1340_v55, 0.0  ;;  %v1341_v62 = vmul.f32 0.33333334, %v1234_v23  ;;  %v1236_v20 = vadd.f32 %v1235_v49, %v5476_v6  ;;  %v5496_v30 = vmul.f32 %v703_v8, %v4410_v7  ;;  %v736_v42 = vld [vmem:[%s3731_s21 + $0x7c8] sm:$0xff] }
 0x15d   : > { %7087 = vst [vmem:[#allocation261_spill] sm:$0xff] %v5487_v63  ;;  %7088 = vst [vmem:[#allocation262_spill] sm:$0xff] %v5490_v26  ;;  %v1819_v33 = vmul.f32 0.003921569, %v1722_v47  ;;  %v1627_v4 = vmul.f32 255.0, %v1531_v40  ;;  %v1237_v3 = vadd.f32 %v5487_v63, %v5479_v58  ;;  %v5502_v61 = vmul.f32 %v735_v50, %v4410_v7  ;;  %v768_v8 = vld [vmem:[%s3731_s21 + $0x8c8] sm:$0xff] }
 0x15e   : > { %v1532_v12 = vmin.f32 %v1436_v53, 1.0  ;;  %v1437_v55 = vmax.f32 %v1341_v62, 0.0  ;;  %v1342_v23 = vmul.f32 0.33333334, %v1236_v20  ;;  %v5506_v49 = vmul.f32 %v767_v16, %v4410_v7  ;;  %v705_v7 = vld [vmem:[%s3731_s21 + $0x6d0] sm:$0xff] }
 0x15f   : > { %7089 = vst [vmem:[#allocation263_spill] sm:$0xff] %v5502_v61  ;;  %1915 = vst [vmem:[%s3980_s23 + $0x290] sm:$0xff] %v1819_v33  ;;  %v1723_v6 = vfloor.f32 %v1627_v4  ;;  %v1238_v47 = vadd.f32 %v1237_v3, %v5490_v26  ;;  %v1239_v40 = vadd.f32 %v5502_v61, %v5496_v30  ;;  %v5514_v50 = vmul.f32 %v704_v15, %v4443_v43  ;;  %v737_v16 = vld [vmem:[%s3731_s21 + $0x7d0] sm:$0xff] }
 0x160   : > { %7090 = vst [vmem:[#allocation264_spill] sm:$0xff] %v5506_v49  ;;  %v1628_v63 = vmul.f32 255.0, %v1532_v12  ;;  %v1533_v53 = vmin.f32 %v1437_v55, 1.0  ;;  %v1438_v62 = vmax.f32 %v1342_v23, 0.0  ;;  %v5517_v20 = vmul.f32 %v736_v42, %v4443_v43  ;;  %v769_v55 = vld [vmem:[%s3731_s21 + $0x8d0] sm:$0xff] }
 0x161   : > { %v1820_v33 = vmul.f32 0.003921569, %v1723_v6  ;;  %v1343_v4 = vmul.f32 0.33333334, %v1238_v47  ;;  %v1240_v3 = vadd.f32 %v1239_v40, %v5506_v49  ;;  %v5523_v26 = vmul.f32 %v768_v8, %v4443_v43  ;;  %v706_v8 = vld [vmem:[%s3731_s21 + $0x6d8] sm:$0xff] }
 0x162   : > { %7091 = vst [vmem:[#allocation265_spill] sm:$0xff] %v5517_v20  ;;  %v1724_v15 = vfloor.f32 %v1628_v63  ;;  %v1629_v61 = vmul.f32 255.0, %v1533_v53  ;;  %v1534_v11 = vmin.f32 %v1438_v62, 1.0  ;;  %v1241_v12 = vadd.f32 %v5517_v20, %v5514_v50  ;;  %v738_v62 = vld [vmem:[%s3731_s21 + $0x7d8] sm:$0xff]  ;;  %v708_v20 = vld [vmem:[%s3731_s21 + $0x6e8] sm:$0xff] }
 0x163   : > { %7092 = vst [vmem:[#allocation266_spill] sm:$0xff] %v5523_v26  ;;  %1916 = vst [vmem:[%s3980_s23 + $0x298] sm:$0xff] %v1820_v33  ;;  %v1439_v42 = vmax.f32 %v1343_v4, 0.0  ;;  %v1344_v6 = vmul.f32 0.33333334, %v1240_v3  ;;  %v5530_v23 = vmul.f32 %v705_v7, %v4480_v2  ;;  %v5533_v43 = vmul.f32 %v737_v16, %v4480_v2  ;;  %v770_v16 = vld [vmem:[%s3731_s21 + $0x8d8] sm:$0xff] }
 0x164   : > { %v1821_v63 = vmul.f32 0.003921569, %v1724_v15  ;;  %v1725_v47 = vfloor.f32 %v1629_v61  ;;  %v1630_v40 = vmul.f32 255.0, %v1534_v11  ;;  %v1242_v53 = vadd.f32 %v1241_v12, %v5523_v26  ;;  %v707_v3 = vld [vmem:[%s3731_s21 + $0x6e0] sm:$0xff] }
 0x165   : > { %7093 = vst [vmem:[#allocation267_spill] sm:$0xff] %v5533_v43  ;;  %v1535_v49 = vmin.f32 %v1439_v42, 1.0  ;;  %v1440_v33 = vmax.f32 %v1344_v6, 0.0  ;;  %v5539_v4 = vmul.f32 %v769_v55, %v4480_v2  ;;  %v1243_v7 = vadd.f32 %v5533_v43, %v5530_v23  ;;  %v739_v26 = vld [vmem:[%s3731_s21 + $0x7e0] sm:$0xff] }
 0x166   : > { %1917 = vst [vmem:[%s3980_s23 + $0x2a0] sm:$0xff] %v1821_v63  ;;  %v1822_v61 = vmul.f32 0.003921569, %v1725_v47  ;;  %v1726_v11 = vfloor.f32 %v1630_v40  ;;  %v1345_v15 = vmul.f32 0.33333334, %v1242_v53  ;;  %v5547_v12 = vmul.f32 %v706_v8, %v4498_v1  ;;  %v771_v43 = vld [vmem:[%s3731_s21 + $0x8e0] sm:$0xff] }
 0x167   : > { %7094 = vst [vmem:[#allocation268_spill] sm:$0xff] %v5539_v4  ;;  %v1631_v42 = vmul.f32 255.0, %v1535_v49  ;;  %v1536_v6 = vmin.f32 %v1440_v33, 1.0  ;;  %v1244_v2 = vadd.f32 %v1243_v7, %v5539_v4  ;;  %v5551_v55 = vmul.f32 %v738_v62, %v4498_v1  ;;  %v740_v7 = vld [vmem:[%s3731_s21 + $0x7e8] sm:$0xff] }
 0x168   : > { %1918 = vst [vmem:[%s3980_s23 + $0x2a8] sm:$0xff] %v1822_v61  ;;  %v1823_v63 = vmul.f32 0.003921569, %v1726_v11  ;;  %v1441_v47 = vmax.f32 %v1345_v15, 0.0  ;;  %v5558_v8 = vmul.f32 %v770_v16, %v4498_v1  ;;  %v5561_v49 = vmul.f32 %v707_v3, %v4530_v35  ;;  %v772_v4 = vld [vmem:[%s3731_s21 + $0x8e8] sm:$0xff]  ;;  %v709_v11 = vld [vmem:[%s3731_s21 + $0x6f0] sm:$0xff] }
 0x169   : > { %7095 = vst [vmem:[#allocation269_spill] sm:$0xff] %v5551_v55  ;;  %v1727_v40 = vfloor.f32 %v1631_v42  ;;  %v1632_v53 = vmul.f32 255.0, %v1536_v6  ;;  %v1346_v33 = vmul.f32 0.33333334, %v1244_v2  ;;  %v1245_v62 = vadd.f32 %v5551_v55, %v5547_v12  ;;  %v741_v55 = vld [vmem:[%s3731_s21 + $0x7f0] sm:$0xff] }
 0x16a   : > { %7096 = vst [vmem:[#allocation270_spill] sm:$0xff] %v5558_v8  ;;  %1919 = vst [vmem:[%s3980_s23 + $0x2b0] sm:$0xff] %v1823_v63  ;;  %v1537_v61 = vmin.f32 %v1441_v47, 1.0  ;;  %v5569_v1 = vmul.f32 %v739_v26, %v4530_v35  ;;  %v5572_v16 = vmul.f32 %v771_v43, %v4530_v35  ;;  %v5575_v3 = vmul.f32 %v708_v20, %v4554_v19  ;;  %v773_v43 = vld [vmem:[%s3731_s21 + $0x8f0] sm:$0xff]  ;;  %v710_v47 = vld [vmem:[%s3731_s21 + $0x6f8] sm:$0xff] }
 0x16b   : > { %v1824_v15 = vmul.f32 0.003921569, %v1727_v40  ;;  %v1728_v42 = vfloor.f32 %v1632_v53  ;;  %v1442_v6 = vmax.f32 %v1346_v33, 0.0  ;;  %v1246_v2 = vadd.f32 %v1245_v62, %v5558_v8 }
 0x16c   : > { %7097 = vst [vmem:[#allocation271_spill] sm:$0xff] %v5569_v1  ;;  %7098 = vst [vmem:[#allocation272_spill] sm:$0xff] %v5572_v16  ;;  %v1633_v63 = vmul.f32 255.0, %v1537_v61  ;;  %v1247_v26 = vadd.f32 %v5569_v1, %v5561_v49  ;;  %v5583_v35 = vmul.f32 %v740_v7, %v4554_v19  ;;  %v5586_v20 = vmul.f32 %v772_v4, %v4554_v19  ;;  %v742_v4 = vld [vmem:[%s3731_s21 + $0x7f8] sm:$0xff] }
 0x16d   : > { %1920 = vst [vmem:[%s3980_s23 + $0x2b8] sm:$0xff] %v1824_v15  ;;  %v1825_v40 = vmul.f32 0.003921569, %v1728_v42  ;;  %v1538_v53 = vmin.f32 %v1442_v6, 1.0  ;;  %v1347_v33 = vmul.f32 0.33333334, %v1246_v2  ;;  %v5592_v62 = vmul.f32 %v709_v11, %v4577_v17 }
 0x16e   : > { %7099 = vst [vmem:[#allocation273_spill] sm:$0xff] %v5583_v35  ;;  %7100 = vst [vmem:[#allocation274_spill] sm:$0xff] %v5586_v20  ;;  %v1729_v61 = vfloor.f32 %v1633_v63  ;;  %v1248_v8 = vadd.f32 %v1247_v26, %v5572_v16  ;;  %v1249_v7 = vadd.f32 %v5583_v35, %v5575_v3  ;;  %v5598_v19 = vmul.f32 %v741_v55, %v4577_v17  ;;  %v774_v1 = vld [vmem:[%s3731_s21 + $0x8f8] sm:$0xff]  ;;  %v1929_v2 = vld [vmem:[%s3739_s22] sm:$0xff]  ;;  %s3105_s21 = smul.f32 (!%p3367_p4), 255.0, %s3104_s12 }
 0x16f   : > { %1921 = vst [vmem:[%s3980_s23 + $0x2c0] sm:$0xff] %v1825_v40  ;;  %v1634_v15 = vmul.f32 255.0, %v1538_v53  ;;  %v1443_v42 = vmax.f32 %v1347_v33, 0.0  ;;  %v5604_v6 = vmul.f32 %v773_v43, %v4577_v17  ;;  %v5607_v11 = vmul.f32 %v710_v47, %v4580_v27  ;;  %v1930_v35 = vld [vmem:[%s3739_s22 + $0x8] sm:$0xff] }
 0x170   : > { %7101 = vst [vmem:[#allocation275_spill] sm:$0xff] %v5598_v19  ;;  %v1826_v63 = vmul.f32 0.003921569, %v1729_v61  ;;  %v1348_v26 = vmul.f32 0.33333334, %v1248_v8  ;;  %v1250_v16 = vadd.f32 %v1249_v7, %v5586_v20  ;;  %v1251_v55 = vadd.f32 %v5598_v19, %v5592_v62  ;;  %v1931_v7 = vld [vmem:[%s3739_s22 + $0x10] sm:$0xff]  ;;  %s3106_s1 = sfloor.f32 (!%p3367_p4), %s3105_s21 }
 0x171   : > { %7102 = vst [vmem:[#allocation276_spill] sm:$0xff] %v5604_v6  ;;  %v1730_v40 = vfloor.f32 %v1634_v15  ;;  %v1539_v53 = vmin.f32 %v1443_v42, 1.0  ;;  %v5615_v33 = vmul.f32 %v742_v4, %v4580_v27  ;;  %v5618_v17 = vmul.f32 %v774_v1, %v4580_v27  ;;  %v1932_v27 = vld [vmem:[%s3739_s22 + $0x18] sm:$0xff]  ;;  %s3109_s24 = smul.f32 (!%p3367_p4), 0.003921569, %s3106_s1 }
 0x172   : > { %1922 = vst [vmem:[%s3980_s23 + $0x2c8] sm:$0xff] %v1826_v63  ;;  %v1444_v43 = vmax.f32 %v1348_v26, 0.0  ;;  %v1349_v8 = vmul.f32 0.33333334, %v1250_v16  ;;  %v1252_v47 = vadd.f32 %v1251_v55, %v5604_v6  ;;  %v2217_v61 = vsub.f32 %v3790_v25, %v1929_v2  ;;  %v1933_v26 = vld [vmem:[%s3739_s22 + $0x20] sm:$0xff] }
 0x173   : > { %7103 = vst [vmem:[#allocation277_spill] sm:$0xff] %v5615_v33  ;;  %v1827_v20 = vmul.f32 0.003921569, %v1730_v40  ;;  %v1635_v19 = vmul.f32 255.0, %v1539_v53  ;;  %v1253_v15 = vadd.f32 %v5615_v33, %v5607_v11  ;;  %v2218_v4 = vsub.f32 %v3806_v31, %v1930_v35  ;;  %v1934_v35 = vld [vmem:[%s3739_s22 + $0x28] sm:$0xff] }
 0x174   : > { %v1540_v1 = vmin.f32 %v1444_v43, 1.0  ;;  %v1445_v42 = vmax.f32 %v1349_v8, 0.0  ;;  %v1350_v63 = vmul.f32 0.33333334, %v1252_v47  ;;  %v2505_v16 = vmul.f32 %v2217_v61, %v2217_v61  ;;  %v1936_v47 = vld [vmem:[%s3739_s22 + $0x38] sm:$0xff] }
 0x175   : > { %1923 = vst [vmem:[%s3980_s23 + $0x2d0] sm:$0xff] %v1827_v20  ;;  %v1731_v55 = vfloor.f32 %v1635_v19  ;;  %v1254_v25 = vadd.f32 %v1253_v15, %v5618_v17  ;;  %v2506_v2 = vmul.f32 %v2218_v4, %v2218_v4  ;;  %v2219_v40 = vsub.f32 %v3832_v41, %v1931_v7  ;;  %v1935_v20 = vld [vmem:[%s3739_s22 + $0x30] sm:$0xff] }
 0x176   : > { %v1636_v53 = vmul.f32 255.0, %v1540_v1  ;;  %v1541_v6 = vmin.f32 %v1445_v42, 1.0  ;;  %v1446_v33 = vmax.f32 %v1350_v63, 0.0  ;;  %2793 = vst [vmem:[%s5633_s19] sm:$0xff] %v2505_v16  ;;  %v2220_v31 = vsub.f32 %v3857_v51, %v1932_v27  ;;  %v1937_v1 = vld [vmem:[%s3739_s22 + $0x40] sm:$0xff]  ;;  %v1938_v63 = vld [vmem:[%s3739_s22 + $0x48] sm:$0xff] }
 0x177   : > { %v1828_v19 = vmul.f32 0.003921569, %v1731_v55  ;;  %v1351_v43 = vmul.f32 0.33333334, %v1254_v25  ;;  %2794 = vst [vmem:[%s5633_s19 + $0x8] sm:$0xff] %v2506_v2  ;;  %v2507_v41 = vmul.f32 %v2219_v40, %v2219_v40  ;;  %v2221_v8 = vsub.f32 %v3888_v0, %v1933_v26  ;;  %v1939_v25 = vld [vmem:[%s3739_s22 + $0x50] sm:$0xff] }
 0x178   : > { %v1732_v61 = vfloor.f32 %v1636_v53  ;;  %v1637_v7 = vmul.f32 255.0, %v1541_v6  ;;  %v1542_v15 = vmin.f32 %v1446_v33, 1.0  ;;  %v2508_v4 = vmul.f32 %v2220_v31, %v2220_v31  ;;  %v7104_v33 = vld [vmem:[#allocation44_spill] sm:$0xff]  ;;  %v1940_v2 = vld [vmem:[%s3739_s22 + $0x58] sm:$0xff]  ;;  %v7105_v31 = vld [vmem:[#allocation47_spill] sm:$0xff] }
 0x179   : > { %1924 = vst [vmem:[%s3980_s23 + $0x2d8] sm:$0xff] %v1828_v19  ;;  %v1447_v51 = vmax.f32 %v1351_v43, 0.0  ;;  %2795 = vst [vmem:[%s5633_s19 + $0x10] sm:$0xff] %v2507_v41  ;;  %v2509_v27 = vmul.f32 %v2221_v8, %v2221_v8  ;;  %v2222_v42 = vsub.f32 %v3902_v9, %v1934_v35  ;;  %v2223_v0 = vsub.f32 %v3924_v44, %v1935_v20  ;;  %v1941_v35 = vld [vmem:[%s3739_s22 + $0x60] sm:$0xff]  ;;  %v1942_v20 = vld [vmem:[%s3739_s22 + $0x68] sm:$0xff] }
 0x17a   : > { %v1829_v16 = vmul.f32 0.003921569, %v1732_v61  ;;  %v1733_v6 = vfloor.f32 %v1637_v7  ;;  %v1638_v26 = vmul.f32 255.0, %v1542_v15  ;;  %2796 = vst [vmem:[%s5633_s19 + $0x18] sm:$0xff] %v2508_v4  ;;  %v2224_v55 = vsub.f32 %v7104_v33, %v1936_v47  ;;  %v7106_v8 = vld [vmem:[#allocation50_spill] sm:$0xff]  ;;  %v1943_v61 = vld [vmem:[%s3739_s22 + $0x70] sm:$0xff] }
 0x17b   : > { %v1543_v40 = vmin.f32 %v1447_v51, 1.0  ;;  %2797 = vst [vmem:[%s5633_s19 + $0x20] sm:$0xff] %v2509_v27  ;;  %v2510_v53 = vmul.f32 %v2222_v42, %v2222_v42  ;;  %v2511_v9 = vmul.f32 %v2223_v0, %v2223_v0  ;;  %v2225_v44 = vsub.f32 %v7105_v31, %v1937_v1  ;;  %v7107_v4 = vld [vmem:[#allocation53_spill] sm:$0xff]  ;;  %v7108_v51 = vld [vmem:[#allocation56_spill] sm:$0xff]  ;;  %v1944_v42 = vld [vmem:[%s3739_s22 + $0x78] sm:$0xff] }
 0x17c   : > { %1925 = vst [vmem:[%s3980_s23 + $0x2e0] sm:$0xff] %v1829_v16  ;;  %v1830_v19 = vmul.f32 0.003921569, %v1733_v6  ;;  %v1734_v43 = vfloor.f32 %v1638_v26  ;;  %v2512_v41 = vmul.f32 %v2224_v55, %v2224_v55  ;;  %v2226_v47 = vsub.f32 %v7106_v8, %v1938_v63  ;;  %v1945_v0 = vld [vmem:[%s3739_s22 + $0x80] sm:$0xff]  ;;  %v7110_v33 = vld [vmem:[#allocation62_spill] sm:$0xff]  ;;  %v7111_v31 = vld [vmem:[#allocation65_spill] sm:$0xff] }
 0x17d   : > { %v1639_v7 = vmul.f32 255.0, %v1543_v40  ;;  %2798 = vst [vmem:[%s5633_s19 + $0x28] sm:$0xff] %v2510_v53  ;;  %2799 = vst [vmem:[%s5633_s19 + $0x30] sm:$0xff] %v2511_v9  ;;  %v2513_v15 = vmul.f32 %v2225_v44, %v2225_v44  ;;  %v2227_v1 = vsub.f32 %v7107_v4, %v1939_v25  ;;  %v2228_v27 = vsub.f32 %v7108_v51, %v1940_v2  ;;  %v7109_v6 = vld [vmem:[#allocation59_spill] sm:$0xff]  ;;  %v1946_v40 = vld [vmem:[%s3739_s22 + $0x88] sm:$0xff] }
 0x17e   : > { %1926 = vst [vmem:[%s3980_s23 + $0x2e8] sm:$0xff] %v1830_v19  ;;  %v1831_v63 = vmul.f32 0.003921569, %v1734_v43  ;;  %2800 = vst [vmem:[%s5633_s19 + $0x38] sm:$0xff] %v2512_v41  ;;  %v2514_v16 = vmul.f32 %v2226_v47, %v2226_v47  ;;  %v2229_v26 = vsub.f32 %v7109_v6, %v1941_v35  ;;  %v2230_v55 = vsub.f32 %v7110_v33, %v1942_v20  ;;  %v1947_v25 = vld [vmem:[%s3739_s22 + $0x90] sm:$0xff]  ;;  %v1948_v19 = vld [vmem:[%s3739_s22 + $0x98] sm:$0xff] }
 0x17f   : > { %v1735_v53 = vfloor.f32 %v1639_v7  ;;  %2801 = vst [vmem:[%s5633_s19 + $0x40] sm:$0xff] %v2513_v15  ;;  %v2515_v2 = vmul.f32 %v2227_v1, %v2227_v1  ;;  %v2516_v9 = vmul.f32 %v2228_v27, %v2228_v27  ;;  %v2231_v44 = vsub.f32 %v7111_v31, %v1943_v61  ;;  %v1949_v43 = vld [vmem:[%s3739_s22 + $0xa0] sm:$0xff]  ;;  %v7112_v41 = vld [vmem:[#allocation68_spill] sm:$0xff]  ;;  %v1951_v4 = vld [vmem:[%s3739_s22 + $0xb0] sm:$0xff] }
 0x180   : > { %1927 = vst [vmem:[%s3980_s23 + $0x2f0] sm:$0xff] %v1831_v63  ;;  %2802 = vst [vmem:[%s5633_s19 + $0x48] sm:$0xff] %v2514_v16  ;;  %v2517_v35 = vmul.f32 %v2229_v26, %v2229_v26  ;;  %v2518_v20 = vmul.f32 %v2230_v55, %v2230_v55  ;;  %v2232_v8 = vsub.f32 %v7112_v41, %v1944_v42  ;;  %v7113_v47 = vld [vmem:[#allocation71_spill] sm:$0xff]  ;;  %v1950_v15 = vld [vmem:[%s3739_s22 + $0xa8] sm:$0xff] }
 0x181   : > { %v2233_v7 = vsub.f32 %v7113_v47, %v1945_v0  ;;  %v1832_v1 = vmul.f32 0.003921569, %v1735_v53  ;;  %2803 = vst [vmem:[%s5633_s19 + $0x50] sm:$0xff] %v2515_v2  ;;  %2804 = vst [vmem:[%s5633_s19 + $0x58] sm:$0xff] %v2516_v9  ;;  %v2519_v61 = vmul.f32 %v2231_v44, %v2231_v44  ;;  %v7114_v51 = vld [vmem:[#allocation74_spill] sm:$0xff]  ;;  %v7115_v63 = vld [vmem:[#allocation77_spill] sm:$0xff] }
 0x182   : > { %v2234_v27 = vsub.f32 %v7114_v51, %v1946_v40  ;;  %v2235_v16 = vsub.f32 %v7115_v63, %v1947_v25  ;;  %v1952_v6 = vld [vmem:[%s3739_s22 + $0xb8] sm:$0xff]  ;;  %v1953_v26 = vld [vmem:[%s3739_s22 + $0xc0] sm:$0xff]  ;;  %2805 = vst [vmem:[%s5633_s19 + $0x60] sm:$0xff] %v2517_v35  ;;  %2806 = vst [vmem:[%s5633_s19 + $0x68] sm:$0xff] %v2518_v20  ;;  %v2520_v42 = vmul.f32 %v2232_v8, %v2232_v8 }
 0x183   : > { %v2521_v0 = vmul.f32 %v2233_v7, %v2233_v7  ;;  %v7116_v33 = vld [vmem:[#allocation80_spill] sm:$0xff]  ;;  %v7117_v53 = vld [vmem:[#allocation83_spill] sm:$0xff]  ;;  %v1955_v31 = vld [vmem:[%s3739_s22 + $0xd0] sm:$0xff]  ;;  %1928 = vst [vmem:[%s3980_s23 + $0x2f8] sm:$0xff] %v1832_v1 }
 0x184   : > { %v2236_v55 = vsub.f32 %v7116_v33, %v1948_v19  ;;  %v2237_v2 = vsub.f32 %v7117_v53, %v1949_v43  ;;  %v1954_v9 = vld [vmem:[%s3739_s22 + $0xc8] sm:$0xff]  ;;  %2807 = vst [vmem:[%s5633_s19 + $0x70] sm:$0xff] %v2519_v61  ;;  %v2522_v40 = vmul.f32 %v2234_v27, %v2234_v27  ;;  %v2523_v25 = vmul.f32 %v2235_v16, %v2235_v16  ;;  %v7118_v44 = vld [vmem:[#allocation86_spill] sm:$0xff]  ;;  %v7119_v20 = vld [vmem:[#allocation89_spill] sm:$0xff] }
 0x185   : > { %v2238_v35 = vsub.f32 %v7118_v44, %v1950_v15  ;;  %v2239_v41 = vsub.f32 %v7119_v20, %v1951_v4  ;;  %v1956_v8 = vld [vmem:[%s3739_s22 + $0xd8] sm:$0xff]  ;;  %v1957_v47 = vld [vmem:[%s3739_s22 + $0xe0] sm:$0xff]  ;;  %2808 = vst [vmem:[%s5633_s19 + $0x78] sm:$0xff] %v2520_v42  ;;  %2809 = vst [vmem:[%s5633_s19 + $0x80] sm:$0xff] %v2521_v0 }
 0x186   : > { %v2524_v19 = vmul.f32 %v2236_v55, %v2236_v55  ;;  %v2525_v43 = vmul.f32 %v2237_v2, %v2237_v2  ;;  %v7120_v7 = vld [vmem:[#allocation92_spill] sm:$0xff]  ;;  %v7121_v61 = vld [vmem:[#allocation95_spill] sm:$0xff]  ;;  %v1959_v63 = vld [vmem:[%s3739_s22 + $0xf0] sm:$0xff]  ;;  %2810 = vst [vmem:[%s5633_s19 + $0x88] sm:$0xff] %v2522_v40 }
 0x187   : > { %v2240_v1 = vsub.f32 %v7120_v7, %v1952_v6  ;;  %v2241_v51 = vsub.f32 %v7121_v61, %v1953_v26  ;;  %v1958_v27 = vld [vmem:[%s3739_s22 + $0xe8] sm:$0xff]  ;;  %2811 = vst [vmem:[%s5633_s19 + $0x90] sm:$0xff] %v2523_v25  ;;  %v2526_v15 = vmul.f32 %v2238_v35, %v2238_v35  ;;  %v2527_v4 = vmul.f32 %v2239_v41, %v2239_v41  ;;  %v7122_v16 = vld [vmem:[#allocation98_spill] sm:$0xff]  ;;  %v7123_v0 = vld [vmem:[#allocation103_spill] sm:$0xff] }
 0x188   : > { %v2242_v42 = vsub.f32 %v7122_v16, %v1954_v9  ;;  %v2243_v33 = vsub.f32 %v7123_v0, %v1955_v31  ;;  %v1960_v55 = vld [vmem:[%s3739_s22 + $0xf8] sm:$0xff]  ;;  %v1961_v53 = vld [vmem:[%s3739_s22 + $0x100] sm:$0xff]  ;;  %2812 = vst [vmem:[%s5633_s19 + $0x98] sm:$0xff] %v2524_v19  ;;  %2813 = vst [vmem:[%s5633_s19 + $0xa0] sm:$0xff] %v2525_v43 }
 0x189   : > { %v2528_v6 = vmul.f32 %v2240_v1, %v2240_v1  ;;  %v2529_v26 = vmul.f32 %v2241_v51, %v2241_v51  ;;  %v7124_v2 = vld [vmem:[#allocation106_spill] sm:$0xff]  ;;  %v7125_v25 = vld [vmem:[#allocation111_spill] sm:$0xff]  ;;  %v1962_v35 = vld [vmem:[%s3739_s22 + $0x108] sm:$0xff]  ;;  %2814 = vst [vmem:[%s5633_s19 + $0xa8] sm:$0xff] %v2526_v15 }
 0x18a   : > { %v2244_v40 = vsub.f32 %v7124_v2, %v1956_v8  ;;  %v2245_v44 = vsub.f32 %v7125_v25, %v1957_v47  ;;  %v1963_v20 = vld [vmem:[%s3739_s22 + $0x110] sm:$0xff]  ;;  %2815 = vst [vmem:[%s5633_s19 + $0xb0] sm:$0xff] %v2527_v4  ;;  %v2530_v9 = vmul.f32 %v2242_v42, %v2242_v42  ;;  %v2531_v31 = vmul.f32 %v2243_v33, %v2243_v33  ;;  %v7126_v41 = vld [vmem:[#allocation114_spill] sm:$0xff]  ;;  %v1965_v61 = vld [vmem:[%s3739_s22 + $0x120] sm:$0xff] }
 0x18b   : > { %v2246_v19 = vsub.f32 %v7126_v41, %v1958_v27  ;;  %v7127_v43 = vld [vmem:[#allocation117_spill] sm:$0xff]  ;;  %v1964_v1 = vld [vmem:[%s3739_s22 + $0x118] sm:$0xff]  ;;  %2816 = vst [vmem:[%s5633_s19 + $0xb8] sm:$0xff] %v2528_v6  ;;  %2817 = vst [vmem:[%s5633_s19 + $0xc0] sm:$0xff] %v2529_v26 }
 0x18c   : > { %v2247_v7 = vsub.f32 %v7127_v43, %v1959_v63  ;;  %v2532_v8 = vmul.f32 %v2244_v40, %v2244_v40  ;;  %v2533_v47 = vmul.f32 %v2245_v44, %v2245_v44  ;;  %v7128_v51 = vld [vmem:[#allocation120_spill] sm:$0xff]  ;;  %v7129_v4 = vld [vmem:[#allocation29_spill] sm:$0xff]  ;;  %2818 = vst [vmem:[%s5633_s19 + $0xc8] sm:$0xff] %v2530_v9  ;;  %2819 = vst [vmem:[%s5633_s19 + $0xd0] sm:$0xff] %v2531_v31 }
 0x18d   : > { %v2248_v15 = vsub.f32 %v7128_v51, %v1960_v55  ;;  %v2249_v16 = vsub.f32 %v7129_v4, %v1961_v53  ;;  %v1966_v42 = vld [vmem:[%s3739_s22 + $0x128] sm:$0xff]  ;;  %v1967_v0 = vld [vmem:[%s3739_s22 + $0x130] sm:$0xff]  ;;  %v2534_v27 = vmul.f32 %v2246_v19, %v2246_v19  ;;  %v7130_v33 = vld [vmem:[#allocation31_spill] sm:$0xff] }
 0x18e   : > { %v2535_v63 = vmul.f32 %v2247_v7, %v2247_v7  ;;  %v2250_v6 = vsub.f32 %v7130_v33, %v1962_v35  ;;  %v7131_v26 = vld [vmem:[#allocation33_spill] sm:$0xff]  ;;  %v1968_v40 = vld [vmem:[%s3739_s22 + $0x138] sm:$0xff]  ;;  %v1969_v25 = vld [vmem:[%s3739_s22 + $0x140] sm:$0xff]  ;;  %2820 = vst [vmem:[%s5633_s19 + $0xd8] sm:$0xff] %v2532_v8 }
 0x18f   : > { %v2251_v2 = vsub.f32 %v7131_v26, %v1963_v20  ;;  %2821 = vst [vmem:[%s5633_s19 + $0xe0] sm:$0xff] %v2533_v47  ;;  %v2536_v55 = vmul.f32 %v2248_v15, %v2248_v15  ;;  %v2537_v53 = vmul.f32 %v2249_v16, %v2249_v16  ;;  %v7132_v44 = vld [vmem:[#allocation35_spill] sm:$0xff]  ;;  %v7133_v31 = vld [vmem:[#allocation37_spill] sm:$0xff]  ;;  %v1970_v19 = vld [vmem:[%s3739_s22 + $0x148] sm:$0xff] }
 0x190   : > { %v2252_v9 = vsub.f32 %v7132_v44, %v1964_v1  ;;  %v2253_v41 = vsub.f32 %v7133_v31, %v1965_v61  ;;  %v1971_v43 = vld [vmem:[%s3739_s22 + $0x150] sm:$0xff]  ;;  %2822 = vst [vmem:[%s5633_s19 + $0xe8] sm:$0xff] %v2534_v27  ;;  %2823 = vst [vmem:[%s5633_s19 + $0xf0] sm:$0xff] %v2535_v63  ;;  %v2538_v35 = vmul.f32 %v2250_v6, %v2250_v6  ;;  %v7134_v7 = vld [vmem:[#allocation39_spill] sm:$0xff] }
 0x191   : > { %v2539_v20 = vmul.f32 %v2251_v2, %v2251_v2  ;;  %v2254_v8 = vsub.f32 %v7134_v7, %v1966_v42  ;;  %v7135_v47 = vld [vmem:[#allocation41_spill] sm:$0xff]  ;;  %v1972_v15 = vld [vmem:[%s3739_s22 + $0x158] sm:$0xff]  ;;  %v1973_v4 = vld [vmem:[%s3739_s22 + $0x160] sm:$0xff]  ;;  %2824 = vst [vmem:[%s5633_s19 + $0xf8] sm:$0xff] %v2536_v55 }
 0x192   : > { %v2255_v51 = vsub.f32 %v7135_v47, %v1967_v0  ;;  %2825 = vst [vmem:[%s5633_s19 + $0x100] sm:$0xff] %v2537_v53  ;;  %v2540_v1 = vmul.f32 %v2252_v9, %v2252_v9  ;;  %v2541_v61 = vmul.f32 %v2253_v41, %v2253_v41  ;;  %v7136_v16 = vld [vmem:[#allocation45_spill] sm:$0xff]  ;;  %v7137_v63 = vld [vmem:[#allocation48_spill] sm:$0xff]  ;;  %2826 = vst [vmem:[%s5633_s19 + $0x108] sm:$0xff] %v2538_v35 }
 0x193   : > { %v2256_v27 = vsub.f32 %v7136_v16, %v1968_v40  ;;  %v2257_v33 = vsub.f32 %v7137_v63, %v1969_v25  ;;  %v1974_v6 = vld [vmem:[%s3739_s22 + $0x168] sm:$0xff]  ;;  %v1975_v26 = vld [vmem:[%s3739_s22 + $0x170] sm:$0xff]  ;;  %2827 = vst [vmem:[%s5633_s19 + $0x110] sm:$0xff] %v2539_v20  ;;  %v2542_v42 = vmul.f32 %v2254_v8, %v2254_v8  ;;  %v7138_v2 = vld [vmem:[#allocation51_spill] sm:$0xff] }
 0x194   : > { %v2543_v0 = vmul.f32 %v2255_v51, %v2255_v51  ;;  %v2258_v55 = vsub.f32 %v7138_v2, %v1970_v19  ;;  %v7139_v53 = vld [vmem:[#allocation54_spill] sm:$0xff]  ;;  %v1977_v31 = vld [vmem:[%s3739_s22 + $0x180] sm:$0xff]  ;;  %2828 = vst [vmem:[%s5633_s19 + $0x118] sm:$0xff] %v2540_v1  ;;  %2829 = vst [vmem:[%s5633_s19 + $0x120] sm:$0xff] %v2541_v61 }
 0x195   : > { %v2259_v44 = vsub.f32 %v7139_v53, %v1971_v43  ;;  %v1976_v9 = vld [vmem:[%s3739_s22 + $0x178] sm:$0xff]  ;;  %v2544_v40 = vmul.f32 %v2256_v27, %v2256_v27  ;;  %v2545_v25 = vmul.f32 %v2257_v33, %v2257_v33  ;;  %v7140_v41 = vld [vmem:[#allocation57_spill] sm:$0xff]  ;;  %v7141_v20 = vld [vmem:[#allocation60_spill] sm:$0xff]  ;;  %2830 = vst [vmem:[%s5633_s19 + $0x128] sm:$0xff] %v2542_v42 }
 0x196   : > { %v2260_v35 = vsub.f32 %v7140_v41, %v1972_v15  ;;  %v2261_v7 = vsub.f32 %v7141_v20, %v1973_v4  ;;  %v1978_v8 = vld [vmem:[%s3739_s22 + $0x188] sm:$0xff]  ;;  %v1979_v47 = vld [vmem:[%s3739_s22 + $0x190] sm:$0xff]  ;;  %2831 = vst [vmem:[%s5633_s19 + $0x130] sm:$0xff] %v2543_v0  ;;  %v2546_v19 = vmul.f32 %v2258_v55, %v2258_v55  ;;  %v7142_v51 = vld [vmem:[#allocation63_spill] sm:$0xff] }
 0x197   : > { %v2547_v43 = vmul.f32 %v2259_v44, %v2259_v44  ;;  %v2262_v1 = vsub.f32 %v7142_v51, %v1974_v6  ;;  %v7143_v61 = vld [vmem:[#allocation66_spill] sm:$0xff]  ;;  %v1981_v63 = vld [vmem:[%s3739_s22 + $0x1a0] sm:$0xff]  ;;  %2832 = vst [vmem:[%s5633_s19 + $0x138] sm:$0xff] %v2544_v40  ;;  %2833 = vst [vmem:[%s5633_s19 + $0x140] sm:$0xff] %v2545_v25 }
 0x198   : > { %v2263_v16 = vsub.f32 %v7143_v61, %v1975_v26  ;;  %v1980_v27 = vld [vmem:[%s3739_s22 + $0x198] sm:$0xff]  ;;  %v2548_v15 = vmul.f32 %v2260_v35, %v2260_v35  ;;  %v2549_v4 = vmul.f32 %v2261_v7, %v2261_v7  ;;  %v7144_v33 = vld [vmem:[#allocation69_spill] sm:$0xff]  ;;  %v7145_v0 = vld [vmem:[#allocation72_spill] sm:$0xff]  ;;  %2834 = vst [vmem:[%s5633_s19 + $0x148] sm:$0xff] %v2546_v19 }
 0x199   : > { %v2264_v42 = vsub.f32 %v7144_v33, %v1976_v9  ;;  %v2265_v2 = vsub.f32 %v7145_v0, %v1977_v31  ;;  %v1982_v55 = vld [vmem:[%s3739_s22 + $0x1a8] sm:$0xff]  ;;  %v1983_v53 = vld [vmem:[%s3739_s22 + $0x1b0] sm:$0xff]  ;;  %2835 = vst [vmem:[%s5633_s19 + $0x150] sm:$0xff] %v2547_v43  ;;  %v2550_v6 = vmul.f32 %v2262_v1, %v2262_v1  ;;  %v7146_v44 = vld [vmem:[#allocation75_spill] sm:$0xff] }
 0x19a   : > { %v2551_v26 = vmul.f32 %v2263_v16, %v2263_v16  ;;  %v2266_v40 = vsub.f32 %v7146_v44, %v1978_v8  ;;  %v7147_v25 = vld [vmem:[#allocation78_spill] sm:$0xff]  ;;  %v1985_v20 = vld [vmem:[%s3739_s22 + $0x1c0] sm:$0xff]  ;;  %2836 = vst [vmem:[%s5633_s19 + $0x158] sm:$0xff] %v2548_v15  ;;  %2837 = vst [vmem:[%s5633_s19 + $0x160] sm:$0xff] %v2549_v4 }
 0x19b   : > { %v2267_v41 = vsub.f32 %v7147_v25, %v1979_v47  ;;  %v1984_v35 = vld [vmem:[%s3739_s22 + $0x1b8] sm:$0xff]  ;;  %v2552_v9 = vmul.f32 %v2264_v42, %v2264_v42  ;;  %v2553_v31 = vmul.f32 %v2265_v2, %v2265_v2  ;;  %v7148_v7 = vld [vmem:[#allocation81_spill] sm:$0xff]  ;;  %v7149_v43 = vld [vmem:[#allocation84_spill] sm:$0xff]  ;;  %2838 = vst [vmem:[%s5633_s19 + $0x168] sm:$0xff] %v2550_v6 }
 0x19c   : > { %v2268_v19 = vsub.f32 %v7148_v7, %v1980_v27  ;;  %v2269_v51 = vsub.f32 %v7149_v43, %v1981_v63  ;;  %v1986_v1 = vld [vmem:[%s3739_s22 + $0x1c8] sm:$0xff]  ;;  %v1987_v61 = vld [vmem:[%s3739_s22 + $0x1d0] sm:$0xff]  ;;  %2839 = vst [vmem:[%s5633_s19 + $0x170] sm:$0xff] %v2551_v26  ;;  %v2554_v8 = vmul.f32 %v2266_v40, %v2266_v40  ;;  %v7150_v16 = vld [vmem:[#allocation87_spill] sm:$0xff] }
 0x19d   : > { %v2555_v47 = vmul.f32 %v2267_v41, %v2267_v41  ;;  %v2270_v15 = vsub.f32 %v7150_v16, %v1982_v55  ;;  %v7151_v4 = vld [vmem:[#allocation90_spill] sm:$0xff]  ;;  %v1989_v0 = vld [vmem:[%s3739_s22 + $0x1e0] sm:$0xff]  ;;  %2840 = vst [vmem:[%s5633_s19 + $0x178] sm:$0xff] %v2552_v9  ;;  %2841 = vst [vmem:[%s5633_s19 + $0x180] sm:$0xff] %v2553_v31 }
 0x19e   : > { %v2271_v33 = vsub.f32 %v7151_v4, %v1983_v53  ;;  %v1988_v42 = vld [vmem:[%s3739_s22 + $0x1d8] sm:$0xff]  ;;  %v2556_v27 = vmul.f32 %v2268_v19, %v2268_v19  ;;  %v2557_v63 = vmul.f32 %v2269_v51, %v2269_v51  ;;  %v7152_v2 = vld [vmem:[#allocation93_spill] sm:$0xff]  ;;  %v7153_v26 = vld [vmem:[#allocation96_spill] sm:$0xff]  ;;  %2842 = vst [vmem:[%s5633_s19 + $0x188] sm:$0xff] %v2554_v8 }
 0x19f   : > { %v2272_v6 = vsub.f32 %v7152_v2, %v1984_v35  ;;  %v2273_v44 = vsub.f32 %v7153_v26, %v1985_v20  ;;  %v1990_v40 = vld [vmem:[%s3739_s22 + $0x1e8] sm:$0xff]  ;;  %v1991_v25 = vld [vmem:[%s3739_s22 + $0x1f0] sm:$0xff]  ;;  %2843 = vst [vmem:[%s5633_s19 + $0x190] sm:$0xff] %v2555_v47  ;;  %v2558_v55 = vmul.f32 %v2270_v15, %v2270_v15  ;;  %v7154_v41 = vld [vmem:[#allocation99_spill] sm:$0xff] }
 0x1a0   : > { %v2559_v53 = vmul.f32 %v2271_v33, %v2271_v33  ;;  %v2274_v9 = vsub.f32 %v7154_v41, %v1986_v1  ;;  %v7155_v31 = vld [vmem:[#allocation104_spill] sm:$0xff]  ;;  %v1992_v19 = vld [vmem:[%s3739_s22 + $0x1f8] sm:$0xff]  ;;  %v1993_v43 = vld [vmem:[%s3739_s22 + $0x200] sm:$0xff]  ;;  %2844 = vst [vmem:[%s5633_s19 + $0x198] sm:$0xff] %v2556_v27 }
 0x1a1   : > { %v2275_v7 = vsub.f32 %v7155_v31, %v1987_v61  ;;  %2845 = vst [vmem:[%s5633_s19 + $0x1a0] sm:$0xff] %v2557_v63  ;;  %v2560_v35 = vmul.f32 %v2272_v6, %v2272_v6  ;;  %v2561_v20 = vmul.f32 %v2273_v44, %v2273_v44  ;;  %v7156_v51 = vld [vmem:[#allocation107_spill] sm:$0xff]  ;;  %v7157_v47 = vld [vmem:[#allocation112_spill] sm:$0xff]  ;;  %v1995_v4 = vld [vmem:[%s3739_s22 + $0x210] sm:$0xff] }
 0x1a2   : > { %v2276_v8 = vsub.f32 %v7156_v51, %v1988_v42  ;;  %v2277_v16 = vsub.f32 %v7157_v47, %v1989_v0  ;;  %v1994_v15 = vld [vmem:[%s3739_s22 + $0x208] sm:$0xff]  ;;  %2846 = vst [vmem:[%s5633_s19 + $0x1a8] sm:$0xff] %v2558_v55  ;;  %2847 = vst [vmem:[%s5633_s19 + $0x1b0] sm:$0xff] %v2559_v53  ;;  %v2562_v1 = vmul.f32 %v2274_v9, %v2274_v9  ;;  %v7158_v33 = vld [vmem:[#allocation115_spill] sm:$0xff] }
 0x1a3   : > { %v2563_v61 = vmul.f32 %v2275_v7, %v2275_v7  ;;  %v2278_v27 = vsub.f32 %v7158_v33, %v1990_v40  ;;  %v7159_v63 = vld [vmem:[#allocation118_spill] sm:$0xff]  ;;  %v1997_v26 = vld [vmem:[%s3739_s22 + $0x220] sm:$0xff]  ;;  %2848 = vst [vmem:[%s5633_s19 + $0x1b8] sm:$0xff] %v2560_v35  ;;  %2849 = vst [vmem:[%s5633_s19 + $0x1c0] sm:$0xff] %v2561_v20 }
 0x1a4   : > { %v2279_v2 = vsub.f32 %v7159_v63, %v1991_v25  ;;  %v1996_v6 = vld [vmem:[%s3739_s22 + $0x218] sm:$0xff]  ;;  %v2564_v42 = vmul.f32 %v2276_v8, %v2276_v8  ;;  %v2565_v0 = vmul.f32 %v2277_v16, %v2277_v16  ;;  %v7160_v44 = vld [vmem:[#allocation121_spill] sm:$0xff]  ;;  %v1998_v9 = vld [vmem:[%s3739_s22 + $0x228] sm:$0xff]  ;;  %2850 = vst [vmem:[%s5633_s19 + $0x1c8] sm:$0xff] %v2562_v1 }
 0x1a5   : > { %v2280_v55 = vsub.f32 %v7160_v44, %v1992_v19  ;;  %v7161_v53 = vld [vmem:[#allocation30_spill] sm:$0xff]  ;;  %v1999_v31 = vld [vmem:[%s3739_s22 + $0x230] sm:$0xff]  ;;  %2851 = vst [vmem:[%s5633_s19 + $0x1d0] sm:$0xff] %v2563_v61  ;;  %v2566_v40 = vmul.f32 %v2278_v27, %v2278_v27  ;;  %v7162_v7 = vld [vmem:[#allocation32_spill] sm:$0xff] }
 0x1a6   : > { %v2281_v41 = vsub.f32 %v7161_v53, %v1993_v43  ;;  %v2567_v25 = vmul.f32 %v2279_v2, %v2279_v2  ;;  %v2282_v35 = vsub.f32 %v7162_v7, %v1994_v15  ;;  %v7163_v20 = vld [vmem:[#allocation34_spill] sm:$0xff]  ;;  %v2001_v47 = vld [vmem:[%s3739_s22 + $0x240] sm:$0xff]  ;;  %2852 = vst [vmem:[%s5633_s19 + $0x1d8] sm:$0xff] %v2564_v42  ;;  %2853 = vst [vmem:[%s5633_s19 + $0x1e0] sm:$0xff] %v2565_v0 }
 0x1a7   : > { %v2283_v51 = vsub.f32 %v7163_v20, %v1995_v4  ;;  %v2000_v8 = vld [vmem:[%s3739_s22 + $0x238] sm:$0xff]  ;;  %v2568_v19 = vmul.f32 %v2280_v55, %v2280_v55  ;;  %v7164_v16 = vld [vmem:[#allocation36_spill] sm:$0xff]  ;;  %v2003_v63 = vld [vmem:[%s3739_s22 + $0x250] sm:$0xff]  ;;  %2854 = vst [vmem:[%s5633_s19 + $0x1e8] sm:$0xff] %v2566_v40 }
 0x1a8   : > { %v2569_v43 = vmul.f32 %v2281_v41, %v2281_v41  ;;  %v2284_v1 = vsub.f32 %v7164_v16, %v1996_v6  ;;  %v7165_v61 = vld [vmem:[#allocation38_spill] sm:$0xff]  ;;  %v2002_v27 = vld [vmem:[%s3739_s22 + $0x248] sm:$0xff]  ;;  %2855 = vst [vmem:[%s5633_s19 + $0x1f0] sm:$0xff] %v2567_v25  ;;  %v2570_v15 = vmul.f32 %v2282_v35, %v2282_v35  ;;  %v2005_v53 = vld [vmem:[%s3739_s22 + $0x260] sm:$0xff] }
 0x1a9   : > { %v2285_v33 = vsub.f32 %v7165_v61, %v1997_v26  ;;  %v2571_v4 = vmul.f32 %v2283_v51, %v2283_v51  ;;  %v7166_v2 = vld [vmem:[#allocation40_spill] sm:$0xff]  ;;  %v7167_v0 = vld [vmem:[#allocation42_spill] sm:$0xff]  ;;  %2856 = vst [vmem:[%s5633_s19 + $0x1f8] sm:$0xff] %v2568_v19  ;;  %v7169_v25 = vld [vmem:[#allocation49_spill] sm:$0xff] }
 0x1aa   : > { %v2286_v42 = vsub.f32 %v7166_v2, %v1998_v9  ;;  %v2287_v44 = vsub.f32 %v7167_v0, %v1999_v31  ;;  %v2004_v55 = vld [vmem:[%s3739_s22 + $0x258] sm:$0xff]  ;;  %2857 = vst [vmem:[%s5633_s19 + $0x200] sm:$0xff] %v2569_v43  ;;  %v2572_v6 = vmul.f32 %v2284_v1, %v2284_v1  ;;  %v2289_v7 = vsub.f32 %v7169_v25, %v2001_v47  ;;  %v2006_v35 = vld [vmem:[%s3739_s22 + $0x268] sm:$0xff]  ;;  %v2007_v20 = vld [vmem:[%s3739_s22 + $0x270] sm:$0xff] }
 0x1ab   : > { %v2573_v26 = vmul.f32 %v2285_v33, %v2285_v33  ;;  %v7168_v41 = vld [vmem:[#allocation46_spill] sm:$0xff]  ;;  %2858 = vst [vmem:[%s5633_s19 + $0x208] sm:$0xff] %v2570_v15  ;;  %2859 = vst [vmem:[%s5633_s19 + $0x210] sm:$0xff] %v2571_v4  ;;  %v7170_v51 = vld [vmem:[#allocation52_spill] sm:$0xff] }
 0x1ac   : > { %v2288_v40 = vsub.f32 %v7168_v41, %v2000_v8  ;;  %v2574_v9 = vmul.f32 %v2286_v42, %v2286_v42  ;;  %v2575_v31 = vmul.f32 %v2287_v44, %v2287_v44  ;;  %v2290_v19 = vsub.f32 %v7170_v51, %v2002_v27  ;;  %v7171_v43 = vld [vmem:[#allocation55_spill] sm:$0xff]  ;;  %v2008_v1 = vld [vmem:[%s3739_s22 + $0x278] sm:$0xff]  ;;  %2860 = vst [vmem:[%s5633_s19 + $0x218] sm:$0xff] %v2572_v6  ;;  %v7173_v4 = vld [vmem:[#allocation61_spill] sm:$0xff] }
 0x1ad   : > { %v2291_v16 = vsub.f32 %v7171_v43, %v2003_v63  ;;  %v2009_v61 = vld [vmem:[%s3739_s22 + $0x280] sm:$0xff]  ;;  %2861 = vst [vmem:[%s5633_s19 + $0x220] sm:$0xff] %v2573_v26  ;;  %v2577_v47 = vmul.f32 %v2289_v7, %v2289_v7  ;;  %v7172_v33 = vld [vmem:[#allocation58_spill] sm:$0xff]  ;;  %v2293_v2 = vsub.f32 %v7173_v4, %v2005_v53  ;;  %v2010_v42 = vld [vmem:[%s3739_s22 + $0x288] sm:$0xff] }
 0x1ae   : > { %v2576_v8 = vmul.f32 %v2288_v40, %v2288_v40  ;;  %v2292_v15 = vsub.f32 %v7172_v33, %v2004_v55  ;;  %v2011_v0 = vld [vmem:[%s3739_s22 + $0x290] sm:$0xff]  ;;  %2862 = vst [vmem:[%s5633_s19 + $0x228] sm:$0xff] %v2574_v9  ;;  %2863 = vst [vmem:[%s5633_s19 + $0x230] sm:$0xff] %v2575_v31  ;;  %v2578_v27 = vmul.f32 %v2290_v19, %v2290_v19  ;;  %v7174_v44 = vld [vmem:[#allocation64_spill] sm:$0xff] }
 0x1af   : > { %v2579_v63 = vmul.f32 %v2291_v16, %v2291_v16  ;;  %v2294_v6 = vsub.f32 %v7174_v44, %v2006_v35  ;;  %v7175_v26 = vld [vmem:[#allocation67_spill] sm:$0xff]  ;;  %v2012_v40 = vld [vmem:[%s3739_s22 + $0x298] sm:$0xff]  ;;  %2865 = vst [vmem:[%s5633_s19 + $0x240] sm:$0xff] %v2577_v47  ;;  %v2581_v53 = vmul.f32 %v2293_v2, %v2293_v2  ;;  %v7177_v31 = vld [vmem:[#allocation73_spill] sm:$0xff] }
 0x1b0   : > { %v2295_v41 = vsub.f32 %v7175_v26, %v2007_v20  ;;  %v2013_v25 = vld [vmem:[%s3739_s22 + $0x2a0] sm:$0xff]  ;;  %2864 = vst [vmem:[%s5633_s19 + $0x238] sm:$0xff] %v2576_v8  ;;  %v2580_v55 = vmul.f32 %v2292_v15, %v2292_v15  ;;  %v7176_v7 = vld [vmem:[#allocation70_spill] sm:$0xff]  ;;  %v2297_v51 = vsub.f32 %v7177_v31, %v2009_v61  ;;  %v2014_v19 = vld [vmem:[%s3739_s22 + $0x2a8] sm:$0xff] }
 0x1b1   : > { %v2296_v9 = vsub.f32 %v7176_v7, %v2008_v1  ;;  %v2015_v43 = vld [vmem:[%s3739_s22 + $0x2b0] sm:$0xff]  ;;  %2866 = vst [vmem:[%s5633_s19 + $0x248] sm:$0xff] %v2578_v27  ;;  %2867 = vst [vmem:[%s5633_s19 + $0x250] sm:$0xff] %v2579_v63  ;;  %v2582_v35 = vmul.f32 %v2294_v6, %v2294_v6  ;;  %v7178_v16 = vld [vmem:[#allocation76_spill] sm:$0xff] }
 0x1b2   : > { %v2583_v20 = vmul.f32 %v2295_v41, %v2295_v41  ;;  %v2298_v8 = vsub.f32 %v7178_v16, %v2010_v42  ;;  %v7179_v47 = vld [vmem:[#allocation79_spill] sm:$0xff]  ;;  %v2016_v15 = vld [vmem:[%s3739_s22 + $0x2b8] sm:$0xff]  ;;  %2868 = vst [vmem:[%s5633_s19 + $0x258] sm:$0xff] %v2580_v55  ;;  %2869 = vst [vmem:[%s5633_s19 + $0x260] sm:$0xff] %v2581_v53  ;;  %v2585_v61 = vmul.f32 %v2297_v51, %v2297_v51 }
 0x1b3   : > { %v2299_v33 = vsub.f32 %v7179_v47, %v2011_v0  ;;  %v2017_v4 = vld [vmem:[%s3739_s22 + $0x2c0] sm:$0xff]  ;;  %v2584_v1 = vmul.f32 %v2296_v9, %v2296_v9  ;;  %v7180_v2 = vld [vmem:[#allocation82_spill] sm:$0xff]  ;;  %v7181_v63 = vld [vmem:[#allocation85_spill] sm:$0xff]  ;;  %2870 = vst [vmem:[%s5633_s19 + $0x268] sm:$0xff] %v2582_v35 }
 0x1b4   : > { %v2300_v27 = vsub.f32 %v7180_v2, %v2012_v40  ;;  %v2301_v44 = vsub.f32 %v7181_v63, %v2013_v25  ;;  %v2018_v6 = vld [vmem:[%s3739_s22 + $0x2c8] sm:$0xff]  ;;  %v2019_v26 = vld [vmem:[%s3739_s22 + $0x2d0] sm:$0xff]  ;;  %2871 = vst [vmem:[%s5633_s19 + $0x270] sm:$0xff] %v2583_v20  ;;  %v2586_v42 = vmul.f32 %v2298_v8, %v2298_v8  ;;  %v7183_v53 = vld [vmem:[#allocation91_spill] sm:$0xff] }
 0x1b5   : > { %v2587_v0 = vmul.f32 %v2299_v33, %v2299_v33  ;;  %v7182_v41 = vld [vmem:[#allocation88_spill] sm:$0xff]  ;;  %v2303_v7 = vsub.f32 %v7183_v53, %v2015_v43  ;;  %v2020_v9 = vld [vmem:[%s3739_s22 + $0x2d8] sm:$0xff]  ;;  %v2021_v31 = vld [vmem:[%s3739_s22 + $0x2e0] sm:$0xff]  ;;  %2872 = vst [vmem:[%s5633_s19 + $0x278] sm:$0xff] %v2584_v1 }
 0x1b6   : > { %v2302_v55 = vsub.f32 %v7182_v41, %v2014_v19  ;;  %2873 = vst [vmem:[%s5633_s19 + $0x280] sm:$0xff] %v2585_v61  ;;  %v2588_v40 = vmul.f32 %v2300_v27, %v2300_v27  ;;  %v2589_v25 = vmul.f32 %v2301_v44, %v2301_v44  ;;  %v7184_v51 = vld [vmem:[#allocation94_spill] sm:$0xff]  ;;  %v7185_v20 = vld [vmem:[#allocation97_spill] sm:$0xff]  ;;  %v2022_v8 = vld [vmem:[%s3739_s22 + $0x2e8] sm:$0xff] }
 0x1b7   : > { %v2304_v35 = vsub.f32 %v7184_v51, %v2016_v15  ;;  %v2305_v16 = vsub.f32 %v7185_v20, %v2017_v4  ;;  %v2023_v47 = vld [vmem:[%s3739_s22 + $0x2f0] sm:$0xff]  ;;  %2874 = vst [vmem:[%s5633_s19 + $0x288] sm:$0xff] %v2586_v42  ;;  %2875 = vst [vmem:[%s5633_s19 + $0x290] sm:$0xff] %v2587_v0  ;;  %v2591_v43 = vmul.f32 %v2303_v7, %v2303_v7  ;;  %v7186_v33 = vld [vmem:[#allocation100_spill] sm:$0xff] }
 0x1b8   : > { %v2590_v19 = vmul.f32 %v2302_v55, %v2302_v55  ;;  %v2306_v1 = vsub.f32 %v7186_v33, %v2018_v6  ;;  %v7187_v61 = vld [vmem:[#allocation105_spill] sm:$0xff]  ;;  %v2024_v27 = vld [vmem:[%s3739_s22 + $0x2f8] sm:$0xff]  ;;  %v2025_v63 = vld [vmem:[%s3739_s22 + $0x300] sm:$0xff]  ;;  %2876 = vst [vmem:[%s5633_s19 + $0x298] sm:$0xff] %v2588_v40 }
 0x1b9   : > { %v2307_v2 = vsub.f32 %v7187_v61, %v2019_v26  ;;  %2877 = vst [vmem:[%s5633_s19 + $0x2a0] sm:$0xff] %v2589_v25  ;;  %v2592_v15 = vmul.f32 %v2304_v35, %v2304_v35  ;;  %v2593_v4 = vmul.f32 %v2305_v16, %v2305_v16  ;;  %v7188_v44 = vld [vmem:[#allocation108_spill] sm:$0xff]  ;;  %v7189_v0 = vld [vmem:[#allocation113_spill] sm:$0xff]  ;;  %2879 = vst [vmem:[%s5633_s19 + $0x2b0] sm:$0xff] %v2591_v43 }
 0x1ba   : > { %v2308_v42 = vsub.f32 %v7188_v44, %v2020_v9  ;;  %v2309_v41 = vsub.f32 %v7189_v0, %v2021_v31  ;;  %v2026_v55 = vld [vmem:[%s3739_s22 + $0x308] sm:$0xff]  ;;  %v2027_v53 = vld [vmem:[%s3739_s22 + $0x310] sm:$0xff]  ;;  %2878 = vst [vmem:[%s5633_s19 + $0x2a8] sm:$0xff] %v2590_v19  ;;  %v2594_v6 = vmul.f32 %v2306_v1, %v2306_v1  ;;  %v7191_v25 = vld [vmem:[#allocation119_spill] sm:$0xff]  ;;  %v2312_v16 = vsub.f32 %v4607_v60, %v2024_v27 }
 0x1bb   : > { %v2595_v26 = vmul.f32 %v2307_v2, %v2307_v2  ;;  %v7190_v7 = vld [vmem:[#allocation116_spill] sm:$0xff]  ;;  %v2311_v51 = vsub.f32 %v7191_v25, %v2023_v47  ;;  %v2028_v35 = vld [vmem:[%s3739_s22 + $0x318] sm:$0xff]  ;;  %v2029_v20 = vld [vmem:[%s3739_s22 + $0x320] sm:$0xff]  ;;  %2880 = vst [vmem:[%s5633_s19 + $0x2b8] sm:$0xff] %v2592_v15 }
 0x1bc   : > { %v2310_v40 = vsub.f32 %v7190_v7, %v2022_v8  ;;  %2881 = vst [vmem:[%s5633_s19 + $0x2c0] sm:$0xff] %v2593_v4  ;;  %v2596_v9 = vmul.f32 %v2308_v42, %v2308_v42  ;;  %v2597_v31 = vmul.f32 %v2309_v41, %v2309_v41  ;;  %v7192_v19 = vld [vmem:[#allocation101_spill] sm:$0xff]  ;;  %v2030_v33 = vld [vmem:[%s3739_s22 + $0x328] sm:$0xff]  ;;  %2882 = vst [vmem:[%s5633_s19 + $0x2c8] sm:$0xff] %v2594_v6 }
 0x1bd   : > { %v2313_v43 = vsub.f32 %v7192_v19, %v2025_v63  ;;  %v2031_v1 = vld [vmem:[%s3739_s22 + $0x330] sm:$0xff]  ;;  %2883 = vst [vmem:[%s5633_s19 + $0x2d0] sm:$0xff] %v2595_v26  ;;  %v2599_v47 = vmul.f32 %v2311_v51, %v2311_v51  ;;  %v7193_v61 = vld [vmem:[#allocation110_spill] sm:$0xff]  ;;  %v7194_v15 = vld [vmem:[#allocation124_spill] sm:$0xff]  ;;  %v2600_v60 = vmul.f32 %v2312_v16, %v2312_v16 }
 0x1be   : > { %v2598_v8 = vmul.f32 %v2310_v40, %v2310_v40  ;;  %v2314_v2 = vsub.f32 %v7193_v61, %v2026_v55  ;;  %v2315_v4 = vsub.f32 %v7194_v15, %v2027_v53  ;;  %v2032_v44 = vld [vmem:[%s3739_s22 + $0x338] sm:$0xff]  ;;  %v2033_v42 = vld [vmem:[%s3739_s22 + $0x340] sm:$0xff]  ;;  %2884 = vst [vmem:[%s5633_s19 + $0x2d8] sm:$0xff] %v2596_v9  ;;  %2885 = vst [vmem:[%s5633_s19 + $0x2e0] sm:$0xff] %v2597_v31 }
 0x1bf   : > { %v2601_v27 = vmul.f32 %v2313_v43, %v2313_v43  ;;  %v7195_v63 = vld [vmem:[#allocation127_spill] sm:$0xff]  ;;  %v2034_v26 = vld [vmem:[%s3739_s22 + $0x348] sm:$0xff]  ;;  %v2035_v7 = vld [vmem:[%s3739_s22 + $0x350] sm:$0xff]  ;;  %2887 = vst [vmem:[%s5633_s19 + $0x2f0] sm:$0xff] %v2599_v47 }
 0x1c0   : > { %v2316_v0 = vsub.f32 %v7195_v63, %v2028_v35  ;;  %v7196_v41 = vld [vmem:[#allocation131_spill] sm:$0xff]  ;;  %2886 = vst [vmem:[%s5633_s19 + $0x2e8] sm:$0xff] %v2598_v8  ;;  %v2602_v55 = vmul.f32 %v2314_v2, %v2314_v2  ;;  %v2603_v53 = vmul.f32 %v2315_v4, %v2315_v4  ;;  %v7197_v40 = vld [vmem:[#allocation134_spill] sm:$0xff]  ;;  %v7198_v51 = vld [vmem:[#allocation137_spill] sm:$0xff] }
 0x1c1   : > { %v2317_v6 = vsub.f32 %v7196_v41, %v2029_v20  ;;  %v2318_v25 = vsub.f32 %v7197_v40, %v2030_v33  ;;  %v2319_v9 = vsub.f32 %v7198_v51, %v2031_v1  ;;  %v2036_v31 = vld [vmem:[%s3739_s22 + $0x358] sm:$0xff]  ;;  %v2037_v16 = vld [vmem:[%s3739_s22 + $0x360] sm:$0xff]  ;;  %2888 = vst [vmem:[%s5633_s19 + $0x2f8] sm:$0xff] %v2600_v60  ;;  %2889 = vst [vmem:[%s5633_s19 + $0x300] sm:$0xff] %v2601_v27 }
 0x1c2   : > { %v2604_v35 = vmul.f32 %v2316_v0, %v2316_v0  ;;  %v7199_v19 = vld [vmem:[#allocation140_spill] sm:$0xff]  ;;  %v7200_v8 = vld [vmem:[#allocation143_spill] sm:$0xff]  ;;  %v2039_v2 = vld [vmem:[%s3739_s22 + $0x370] sm:$0xff]  ;;  %2890 = vst [vmem:[%s5633_s19 + $0x308] sm:$0xff] %v2602_v55 }
 0x1c3   : > { %v2605_v20 = vmul.f32 %v2317_v6, %v2317_v6  ;;  %v2320_v43 = vsub.f32 %v7199_v19, %v2032_v44  ;;  %v2321_v47 = vsub.f32 %v7200_v8, %v2033_v42  ;;  %v2038_v61 = vld [vmem:[%s3739_s22 + $0x368] sm:$0xff]  ;;  %2891 = vst [vmem:[%s5633_s19 + $0x310] sm:$0xff] %v2603_v53  ;;  %v2606_v33 = vmul.f32 %v2318_v25, %v2318_v25  ;;  %v7201_v15 = vld [vmem:[#allocation146_spill] sm:$0xff]  ;;  %v7202_v60 = vld [vmem:[#allocation149_spill] sm:$0xff] }
 0x1c4   : > { %v2607_v1 = vmul.f32 %v2319_v9, %v2319_v9  ;;  %v2322_v4 = vsub.f32 %v7201_v15, %v2034_v26  ;;  %v2323_v27 = vsub.f32 %v7202_v60, %v2035_v7  ;;  %v2040_v63 = vld [vmem:[%s3739_s22 + $0x378] sm:$0xff]  ;;  %v2041_v0 = vld [vmem:[%s3739_s22 + $0x380] sm:$0xff]  ;;  %2892 = vst [vmem:[%s5633_s19 + $0x318] sm:$0xff] %v2604_v35  ;;  %v7203_v41 = vld [vmem:[#allocation152_spill] sm:$0xff] }
 0x1c5   : > { %2893 = vst [vmem:[%s5633_s19 + $0x320] sm:$0xff] %v2605_v20  ;;  %v2608_v44 = vmul.f32 %v2320_v43, %v2320_v43  ;;  %v2609_v42 = vmul.f32 %v2321_v47, %v2321_v47  ;;  %v2324_v6 = vsub.f32 %v7203_v41, %v2036_v31  ;;  %v7204_v55 = vld [vmem:[#allocation155_spill] sm:$0xff]  ;;  %v2042_v40 = vld [vmem:[%s3739_s22 + $0x388] sm:$0xff]  ;;  %v2043_v25 = vld [vmem:[%s3739_s22 + $0x390] sm:$0xff] }
 0x1c6   : > { %v2325_v53 = vsub.f32 %v7204_v55, %v2037_v16  ;;  %2894 = vst [vmem:[%s5633_s19 + $0x328] sm:$0xff] %v2606_v33  ;;  %2895 = vst [vmem:[%s5633_s19 + $0x330] sm:$0xff] %v2607_v1  ;;  %v2610_v26 = vmul.f32 %v2322_v4, %v2322_v4  ;;  %v2611_v7 = vmul.f32 %v2323_v27, %v2323_v27  ;;  %v7205_v51 = vld [vmem:[#allocation158_spill] sm:$0xff]  ;;  %v7206_v35 = vld [vmem:[#allocation161_spill] sm:$0xff] }
 0x1c7   : > { %v2326_v9 = vsub.f32 %v7205_v51, %v2038_v61  ;;  %v2327_v20 = vsub.f32 %v7206_v35, %v2039_v2  ;;  %v2044_v19 = vld [vmem:[%s3739_s22 + $0x398] sm:$0xff]  ;;  %v2045_v43 = vld [vmem:[%s3739_s22 + $0x3a0] sm:$0xff]  ;;  %2896 = vst [vmem:[%s5633_s19 + $0x338] sm:$0xff] %v2608_v44  ;;  %2897 = vst [vmem:[%s5633_s19 + $0x340] sm:$0xff] %v2609_v42  ;;  %v2612_v31 = vmul.f32 %v2324_v6, %v2324_v6 }
 0x1c8   : > { %v2613_v16 = vmul.f32 %v2325_v53, %v2325_v53  ;;  %v7207_v8 = vld [vmem:[#allocation164_spill] sm:$0xff]  ;;  %v7208_v33 = vld [vmem:[#allocation167_spill] sm:$0xff]  ;;  %v2047_v4 = vld [vmem:[%s3739_s22 + $0x3b0] sm:$0xff]  ;;  %2898 = vst [vmem:[%s5633_s19 + $0x348] sm:$0xff] %v2610_v26 }
 0x1c9   : > { %v2328_v47 = vsub.f32 %v7207_v8, %v2040_v63  ;;  %v2329_v1 = vsub.f32 %v7208_v33, %v2041_v0  ;;  %v2046_v15 = vld [vmem:[%s3739_s22 + $0x3a8] sm:$0xff]  ;;  %2899 = vst [vmem:[%s5633_s19 + $0x350] sm:$0xff] %v2611_v7  ;;  %v2614_v61 = vmul.f32 %v2326_v9, %v2326_v9  ;;  %v2615_v2 = vmul.f32 %v2327_v20, %v2327_v20  ;;  %v7209_v60 = vld [vmem:[#allocation170_spill] sm:$0xff]  ;;  %v7210_v44 = vld [vmem:[#allocation173_spill] sm:$0xff] }
 0x1ca   : > { %v2330_v27 = vsub.f32 %v7209_v60, %v2042_v40  ;;  %v2331_v42 = vsub.f32 %v7210_v44, %v2043_v25  ;;  %v2048_v41 = vld [vmem:[%s3739_s22 + $0x3b8] sm:$0xff]  ;;  %v2049_v6 = vld [vmem:[%s3739_s22 + $0x3c0] sm:$0xff]  ;;  %2900 = vst [vmem:[%s5633_s19 + $0x358] sm:$0xff] %v2612_v31  ;;  %2901 = vst [vmem:[%s5633_s19 + $0x360] sm:$0xff] %v2613_v16 }
 0x1cb   : > { %v2616_v63 = vmul.f32 %v2328_v47, %v2328_v47  ;;  %v2617_v0 = vmul.f32 %v2329_v1, %v2329_v1  ;;  %v7211_v55 = vld [vmem:[#allocation176_spill] sm:$0xff]  ;;  %v7212_v26 = vld [vmem:[#allocation179_spill] sm:$0xff]  ;;  %v2051_v9 = vld [vmem:[%s3739_s22 + $0x3d0] sm:$0xff]  ;;  %2902 = vst [vmem:[%s5633_s19 + $0x368] sm:$0xff] %v2614_v61 }
 0x1cc   : > { %v2332_v53 = vsub.f32 %v7211_v55, %v2044_v19  ;;  %v2333_v7 = vsub.f32 %v7212_v26, %v2045_v43  ;;  %v2050_v51 = vld [vmem:[%s3739_s22 + $0x3c8] sm:$0xff]  ;;  %2903 = vst [vmem:[%s5633_s19 + $0x370] sm:$0xff] %v2615_v2  ;;  %v2618_v40 = vmul.f32 %v2330_v27, %v2330_v27  ;;  %v2619_v25 = vmul.f32 %v2331_v42, %v2331_v42  ;;  %v7213_v35 = vld [vmem:[#allocation182_spill] sm:$0xff]  ;;  %v7214_v31 = vld [vmem:[#allocation185_spill] sm:$0xff] }
 0x1cd   : > { %v2334_v20 = vsub.f32 %v7213_v35, %v2046_v15  ;;  %v2335_v16 = vsub.f32 %v7214_v31, %v2047_v4  ;;  %v2052_v8 = vld [vmem:[%s3739_s22 + $0x3d8] sm:$0xff]  ;;  %v2053_v47 = vld [vmem:[%s3739_s22 + $0x3e0] sm:$0xff]  ;;  %2904 = vst [vmem:[%s5633_s19 + $0x378] sm:$0xff] %v2616_v63  ;;  %2905 = vst [vmem:[%s5633_s19 + $0x380] sm:$0xff] %v2617_v0 }
 0x1ce   : > { %v2620_v19 = vmul.f32 %v2332_v53, %v2332_v53  ;;  %v2621_v43 = vmul.f32 %v2333_v7, %v2333_v7  ;;  %v7215_v33 = vld [vmem:[#allocation188_spill] sm:$0xff]  ;;  %v7216_v61 = vld [vmem:[#allocation191_spill] sm:$0xff]  ;;  %v2055_v27 = vld [vmem:[%s3739_s22 + $0x3f0] sm:$0xff]  ;;  %2906 = vst [vmem:[%s5633_s19 + $0x388] sm:$0xff] %v2618_v40 }
 0x1cf   : > { %v2336_v1 = vsub.f32 %v7215_v33, %v2048_v41  ;;  %v2337_v2 = vsub.f32 %v7216_v61, %v2049_v6  ;;  %v2054_v60 = vld [vmem:[%s3739_s22 + $0x3e8] sm:$0xff]  ;;  %2907 = vst [vmem:[%s5633_s19 + $0x390] sm:$0xff] %v2619_v25  ;;  %v2622_v15 = vmul.f32 %v2334_v20, %v2334_v20  ;;  %v2623_v4 = vmul.f32 %v2335_v16, %v2335_v16  ;;  %v7217_v44 = vld [vmem:[#allocation194_spill] sm:$0xff]  ;;  %v7218_v63 = vld [vmem:[#allocation197_spill] sm:$0xff] }
 0x1d0   : > { %v2338_v42 = vsub.f32 %v7217_v44, %v2050_v51  ;;  %v2339_v0 = vsub.f32 %v7218_v63, %v2051_v9  ;;  %v2056_v55 = vld [vmem:[%s3739_s22 + $0x3f8] sm:$0xff]  ;;  %v2057_v53 = vld [vmem:[%s3739_s22 + $0x400] sm:$0xff]  ;;  %2908 = vst [vmem:[%s5633_s19 + $0x398] sm:$0xff] %v2620_v19  ;;  %2909 = vst [vmem:[%s5633_s19 + $0x3a0] sm:$0xff] %v2621_v43  ;;  %v2342_v31 = vsub.f32 %v5060_v59, %v2054_v60 }
 0x1d1   : > { %v2624_v41 = vmul.f32 %v2336_v1, %v2336_v1  ;;  %v2625_v6 = vmul.f32 %v2337_v2, %v2337_v2  ;;  %v7219_v26 = vld [vmem:[#allocation200_spill] sm:$0xff]  ;;  %v7220_v40 = vld [vmem:[#allocation203_spill] sm:$0xff]  ;;  %v2059_v20 = vld [vmem:[%s3739_s22 + $0x410] sm:$0xff]  ;;  %2910 = vst [vmem:[%s5633_s19 + $0x3a8] sm:$0xff] %v2622_v15  ;;  %v2344_v1 = vsub.f32 %v5092_v24, %v2056_v55 }
 0x1d2   : > { %v2340_v7 = vsub.f32 %v7219_v26, %v2052_v8  ;;  %v2341_v25 = vsub.f32 %v7220_v40, %v2053_v47  ;;  %v2058_v35 = vld [vmem:[%s3739_s22 + $0x408] sm:$0xff]  ;;  %2911 = vst [vmem:[%s5633_s19 + $0x3b0] sm:$0xff] %v2623_v4  ;;  %v2626_v51 = vmul.f32 %v2338_v42, %v2338_v42  ;;  %v2627_v9 = vmul.f32 %v2339_v0, %v2339_v0  ;;  %v2060_v43 = vld [vmem:[%s3739_s22 + $0x418] sm:$0xff]  ;;  %v2061_v33 = vld [vmem:[%s3739_s22 + $0x420] sm:$0xff] }
 0x1d3   : > { %v7221_v16 = vld [vmem:[#allocation208_spill] sm:$0xff]  ;;  %2912 = vst [vmem:[%s5633_s19 + $0x3b8] sm:$0xff] %v2624_v41  ;;  %2913 = vst [vmem:[%s5633_s19 + $0x3c0] sm:$0xff] %v2625_v6  ;;  %v7222_v61 = vld [vmem:[#allocation102_spill] sm:$0xff]  ;;  %v2630_v59 = vmul.f32 %v2342_v31, %v2342_v31  ;;  %v2632_v24 = vmul.f32 %v2344_v1, %v2344_v1 }
 0x1d4   : > { %v2343_v19 = vsub.f32 %v7221_v16, %v2055_v27  ;;  %v2628_v8 = vmul.f32 %v2340_v7, %v2340_v7  ;;  %v2629_v47 = vmul.f32 %v2341_v25, %v2341_v25  ;;  %v2345_v2 = vsub.f32 %v7222_v61, %v2057_v53  ;;  %v2062_v15 = vld [vmem:[%s3739_s22 + $0x428] sm:$0xff]  ;;  %v2063_v4 = vld [vmem:[%s3739_s22 + $0x430] sm:$0xff]  ;;  %2914 = vst [vmem:[%s5633_s19 + $0x3c8] sm:$0xff] %v2626_v51  ;;  %v7223_v27 = vld [vmem:[#allocation122_spill] sm:$0xff] }
 0x1d5   : > { %2915 = vst [vmem:[%s5633_s19 + $0x3d0] sm:$0xff] %v2627_v9  ;;  %v2346_v44 = vsub.f32 %v7223_v27, %v2058_v35  ;;  %v7224_v42 = vld [vmem:[#allocation125_spill] sm:$0xff]  ;;  %v2064_v0 = vld [vmem:[%s3739_s22 + $0x438] sm:$0xff]  ;;  %v2065_v41 = vld [vmem:[%s3739_s22 + $0x440] sm:$0xff] }
 0x1d6   : > { %v2631_v60 = vmul.f32 %v2343_v19, %v2343_v19  ;;  %v2347_v63 = vsub.f32 %v7224_v42, %v2059_v20  ;;  %2916 = vst [vmem:[%s5633_s19 + $0x3d8] sm:$0xff] %v2628_v8  ;;  %2917 = vst [vmem:[%s5633_s19 + $0x3e0] sm:$0xff] %v2629_v47  ;;  %v2633_v55 = vmul.f32 %v2345_v2, %v2345_v2  ;;  %v7225_v53 = vld [vmem:[#allocation129_spill] sm:$0xff]  ;;  %v7226_v26 = vld [vmem:[#allocation132_spill] sm:$0xff] }
 0x1d7   : > { %v2348_v6 = vsub.f32 %v7225_v53, %v2060_v43  ;;  %v2349_v7 = vsub.f32 %v7226_v26, %v2061_v33  ;;  %v2066_v40 = vld [vmem:[%s3739_s22 + $0x448] sm:$0xff]  ;;  %v2067_v25 = vld [vmem:[%s3739_s22 + $0x450] sm:$0xff]  ;;  %2918 = vst [vmem:[%s5633_s19 + $0x3e8] sm:$0xff] %v2630_v59  ;;  %v2634_v35 = vmul.f32 %v2346_v44, %v2346_v44  ;;  %v7227_v51 = vld [vmem:[#allocation135_spill] sm:$0xff] }
 0x1d8   : > { %2919 = vst [vmem:[%s5633_s19 + $0x3f0] sm:$0xff] %v2631_v60  ;;  %v2635_v20 = vmul.f32 %v2347_v63, %v2347_v63  ;;  %v2350_v9 = vsub.f32 %v7227_v51, %v2062_v15  ;;  %v7228_v31 = vld [vmem:[#allocation138_spill] sm:$0xff]  ;;  %v2069_v8 = vld [vmem:[%s3739_s22 + $0x460] sm:$0xff]  ;;  %2920 = vst [vmem:[%s5633_s19 + $0x3f8] sm:$0xff] %v2632_v24 }
 0x1d9   : > { %v2351_v16 = vsub.f32 %v7228_v31, %v2063_v4  ;;  %v2068_v19 = vld [vmem:[%s3739_s22 + $0x458] sm:$0xff]  ;;  %2921 = vst [vmem:[%s5633_s19 + $0x400] sm:$0xff] %v2633_v55  ;;  %v2636_v43 = vmul.f32 %v2348_v6, %v2348_v6  ;;  %v2637_v33 = vmul.f32 %v2349_v7, %v2349_v7  ;;  %v7229_v47 = vld [vmem:[#allocation141_spill] sm:$0xff]  ;;  %v7230_v61 = vld [vmem:[#allocation144_spill] sm:$0xff] }
 0x1da   : > { %v2352_v1 = vsub.f32 %v7229_v47, %v2064_v0  ;;  %v2353_v2 = vsub.f32 %v7230_v61, %v2065_v41  ;;  %v2070_v59 = vld [vmem:[%s3739_s22 + $0x468] sm:$0xff]  ;;  %v2071_v60 = vld [vmem:[%s3739_s22 + $0x470] sm:$0xff]  ;;  %2922 = vst [vmem:[%s5633_s19 + $0x408] sm:$0xff] %v2634_v35  ;;  %2923 = vst [vmem:[%s5633_s19 + $0x410] sm:$0xff] %v2635_v20  ;;  %v2638_v15 = vmul.f32 %v2350_v9, %v2350_v9 }
 0x1db   : > { %v2639_v4 = vmul.f32 %v2351_v16, %v2351_v16  ;;  %v7231_v27 = vld [vmem:[#allocation147_spill] sm:$0xff]  ;;  %v7232_v42 = vld [vmem:[#allocation150_spill] sm:$0xff]  ;;  %2924 = vst [vmem:[%s5633_s19 + $0x418] sm:$0xff] %v2636_v43  ;;  %2925 = vst [vmem:[%s5633_s19 + $0x420] sm:$0xff] %v2637_v33 }
 0x1dc   : > { %v2354_v44 = vsub.f32 %v7231_v27, %v2066_v40  ;;  %v2355_v63 = vsub.f32 %v7232_v42, %v2067_v25  ;;  %v2072_v24 = vld [vmem:[%s3739_s22 + $0x478] sm:$0xff]  ;;  %v2073_v55 = vld [vmem:[%s3739_s22 + $0x480] sm:$0xff]  ;;  %v2640_v0 = vmul.f32 %v2352_v1, %v2352_v1  ;;  %v2641_v41 = vmul.f32 %v2353_v2, %v2353_v2  ;;  %v7233_v53 = vld [vmem:[#allocation153_spill] sm:$0xff]  ;;  %2926 = vst [vmem:[%s5633_s19 + $0x428] sm:$0xff] %v2638_v15 }
 0x1dd   : > { %v2356_v6 = vsub.f32 %v7233_v53, %v2068_v19  ;;  %v7234_v26 = vld [vmem:[#allocation156_spill] sm:$0xff]  ;;  %v2075_v20 = vld [vmem:[%s3739_s22 + $0x490] sm:$0xff]  ;;  %2927 = vst [vmem:[%s5633_s19 + $0x430] sm:$0xff] %v2639_v4  ;;  %v7235_v51 = vld [vmem:[#allocation159_spill] sm:$0xff] }
 0x1de   : > { %v2357_v7 = vsub.f32 %v7234_v26, %v2069_v8  ;;  %v2074_v35 = vld [vmem:[%s3739_s22 + $0x488] sm:$0xff]  ;;  %v2642_v40 = vmul.f32 %v2354_v44, %v2354_v44  ;;  %v2643_v25 = vmul.f32 %v2355_v63, %v2355_v63  ;;  %v2358_v9 = vsub.f32 %v7235_v51, %v2070_v59  ;;  %v7236_v31 = vld [vmem:[#allocation162_spill] sm:$0xff]  ;;  %v2077_v33 = vld [vmem:[%s3739_s22 + $0x4a0] sm:$0xff]  ;;  %2928 = vst [vmem:[%s5633_s19 + $0x438] sm:$0xff] %v2640_v0 }
 0x1df   : > { %v2359_v16 = vsub.f32 %v7236_v31, %v2071_v60  ;;  %v2076_v43 = vld [vmem:[%s3739_s22 + $0x498] sm:$0xff]  ;;  %2929 = vst [vmem:[%s5633_s19 + $0x440] sm:$0xff] %v2641_v41  ;;  %v2644_v19 = vmul.f32 %v2356_v6, %v2356_v6  ;;  %v7237_v47 = vld [vmem:[#allocation165_spill] sm:$0xff]  ;;  %v7238_v61 = vld [vmem:[#allocation168_spill] sm:$0xff] }
 0x1e0   : > { %v2645_v8 = vmul.f32 %v2357_v7, %v2357_v7  ;;  %v2360_v1 = vsub.f32 %v7237_v47, %v2072_v24  ;;  %v2361_v2 = vsub.f32 %v7238_v61, %v2073_v55  ;;  %v2078_v15 = vld [vmem:[%s3739_s22 + $0x4a8] sm:$0xff]  ;;  %v2079_v4 = vld [vmem:[%s3739_s22 + $0x4b0] sm:$0xff]  ;;  %2930 = vst [vmem:[%s5633_s19 + $0x448] sm:$0xff] %v2642_v40  ;;  %2931 = vst [vmem:[%s5633_s19 + $0x450] sm:$0xff] %v2643_v25 }
 0x1e1   : > { %v2646_v59 = vmul.f32 %v2358_v9, %v2358_v9  ;;  %v2647_v60 = vmul.f32 %v2359_v16, %v2359_v16  ;;  %v7239_v27 = vld [vmem:[#allocation171_spill] sm:$0xff]  ;;  %v7240_v42 = vld [vmem:[#allocation174_spill] sm:$0xff]  ;;  %2932 = vst [vmem:[%s5633_s19 + $0x458] sm:$0xff] %v2644_v19  ;;  %v7241_v53 = vld [vmem:[#allocation177_spill] sm:$0xff] }
 0x1e2   : > { %v2362_v44 = vsub.f32 %v7239_v27, %v2074_v35  ;;  %v2363_v63 = vsub.f32 %v7240_v42, %v2075_v20  ;;  %v2080_v0 = vld [vmem:[%s3739_s22 + $0x4b8] sm:$0xff]  ;;  %v2081_v41 = vld [vmem:[%s3739_s22 + $0x4c0] sm:$0xff]  ;;  %2933 = vst [vmem:[%s5633_s19 + $0x460] sm:$0xff] %v2645_v8  ;;  %v2648_v24 = vmul.f32 %v2360_v1, %v2360_v1  ;;  %v2649_v55 = vmul.f32 %v2361_v2, %v2361_v2  ;;  %v7242_v26 = vld [vmem:[#allocation180_spill] sm:$0xff] }
 0x1e3   : > { %v2364_v6 = vsub.f32 %v7241_v53, %v2076_v43  ;;  %v2365_v7 = vsub.f32 %v7242_v26, %v2077_v33  ;;  %v2082_v40 = vld [vmem:[%s3739_s22 + $0x4c8] sm:$0xff]  ;;  %v2083_v25 = vld [vmem:[%s3739_s22 + $0x4d0] sm:$0xff]  ;;  %2934 = vst [vmem:[%s5633_s19 + $0x468] sm:$0xff] %v2646_v59  ;;  %2935 = vst [vmem:[%s5633_s19 + $0x470] sm:$0xff] %v2647_v60 }
 0x1e4   : > { %v2650_v35 = vmul.f32 %v2362_v44, %v2362_v44  ;;  %v2651_v20 = vmul.f32 %v2363_v63, %v2363_v63  ;;  %v7243_v51 = vld [vmem:[#allocation183_spill] sm:$0xff]  ;;  %v7244_v31 = vld [vmem:[#allocation186_spill] sm:$0xff]  ;;  %2936 = vst [vmem:[%s5633_s19 + $0x478] sm:$0xff] %v2648_v24  ;;  %2937 = vst [vmem:[%s5633_s19 + $0x480] sm:$0xff] %v2649_v55 }
 0x1e5   : > { %v2366_v9 = vsub.f32 %v7243_v51, %v2078_v15  ;;  %v2367_v16 = vsub.f32 %v7244_v31, %v2079_v4  ;;  %v2084_v19 = vld [vmem:[%s3739_s22 + $0x4d8] sm:$0xff]  ;;  %v2085_v8 = vld [vmem:[%s3739_s22 + $0x4e0] sm:$0xff]  ;;  %v2652_v43 = vmul.f32 %v2364_v6, %v2364_v6  ;;  %v2653_v33 = vmul.f32 %v2365_v7, %v2365_v7  ;;  %v7245_v47 = vld [vmem:[#allocation189_spill] sm:$0xff] }
 0x1e6   : > { %v2368_v1 = vsub.f32 %v7245_v47, %v2080_v0  ;;  %v7246_v61 = vld [vmem:[#allocation192_spill] sm:$0xff]  ;;  %v2087_v60 = vld [vmem:[%s3739_s22 + $0x4f0] sm:$0xff]  ;;  %2938 = vst [vmem:[%s5633_s19 + $0x488] sm:$0xff] %v2650_v35  ;;  %2939 = vst [vmem:[%s5633_s19 + $0x490] sm:$0xff] %v2651_v20 }
 0x1e7   : > { %v2369_v2 = vsub.f32 %v7246_v61, %v2081_v41  ;;  %v2086_v59 = vld [vmem:[%s3739_s22 + $0x4e8] sm:$0xff]  ;;  %v2654_v15 = vmul.f32 %v2366_v9, %v2366_v9  ;;  %v2655_v4 = vmul.f32 %v2367_v16, %v2367_v16  ;;  %v7247_v27 = vld [vmem:[#allocation195_spill] sm:$0xff]  ;;  %v7248_v42 = vld [vmem:[#allocation198_spill] sm:$0xff]  ;;  %2940 = vst [vmem:[%s5633_s19 + $0x498] sm:$0xff] %v2652_v43 }
 0x1e8   : > { %v2370_v44 = vsub.f32 %v7247_v27, %v2082_v40  ;;  %v2371_v63 = vsub.f32 %v7248_v42, %v2083_v25  ;;  %v2088_v24 = vld [vmem:[%s3739_s22 + $0x4f8] sm:$0xff]  ;;  %v2089_v55 = vld [vmem:[%s3739_s22 + $0x500] sm:$0xff]  ;;  %2941 = vst [vmem:[%s5633_s19 + $0x4a0] sm:$0xff] %v2653_v33  ;;  %v2656_v0 = vmul.f32 %v2368_v1, %v2368_v1  ;;  %v7249_v53 = vld [vmem:[#allocation201_spill] sm:$0xff] }
 0x1e9   : > { %v2657_v41 = vmul.f32 %v2369_v2, %v2369_v2  ;;  %v2372_v6 = vsub.f32 %v7249_v53, %v2084_v19  ;;  %v7250_v26 = vld [vmem:[#allocation204_spill] sm:$0xff]  ;;  %v2091_v20 = vld [vmem:[%s3739_s22 + $0x510] sm:$0xff]  ;;  %2942 = vst [vmem:[%s5633_s19 + $0x4a8] sm:$0xff] %v2654_v15  ;;  %2943 = vst [vmem:[%s5633_s19 + $0x4b0] sm:$0xff] %v2655_v4 }
 0x1ea   : > { %v2373_v7 = vsub.f32 %v7250_v26, %v2085_v8  ;;  %v2090_v35 = vld [vmem:[%s3739_s22 + $0x508] sm:$0xff]  ;;  %v2658_v40 = vmul.f32 %v2370_v44, %v2370_v44  ;;  %v2659_v25 = vmul.f32 %v2371_v63, %v2371_v63  ;;  %v7251_v51 = vld [vmem:[#allocation206_spill] sm:$0xff]  ;;  %v7252_v31 = vld [vmem:[#allocation209_spill] sm:$0xff]  ;;  %2944 = vst [vmem:[%s5633_s19 + $0x4b8] sm:$0xff] %v2656_v0 }
 0x1eb   : > { %v2374_v9 = vsub.f32 %v7251_v51, %v2086_v59  ;;  %v2375_v16 = vsub.f32 %v7252_v31, %v2087_v60  ;;  %v2092_v43 = vld [vmem:[%s3739_s22 + $0x518] sm:$0xff]  ;;  %v2093_v33 = vld [vmem:[%s3739_s22 + $0x520] sm:$0xff]  ;;  %2945 = vst [vmem:[%s5633_s19 + $0x4c0] sm:$0xff] %v2657_v41  ;;  %v2660_v19 = vmul.f32 %v2372_v6, %v2372_v6  ;;  %v7254_v61 = vld [vmem:[#allocation109_spill] sm:$0xff] }
 0x1ec   : > { %v2661_v8 = vmul.f32 %v2373_v7, %v2373_v7  ;;  %v7253_v47 = vld [vmem:[#allocation211_spill] sm:$0xff]  ;;  %v2377_v2 = vsub.f32 %v7254_v61, %v2089_v55  ;;  %v2094_v15 = vld [vmem:[%s3739_s22 + $0x528] sm:$0xff]  ;;  %v2095_v4 = vld [vmem:[%s3739_s22 + $0x530] sm:$0xff]  ;;  %2946 = vst [vmem:[%s5633_s19 + $0x4c8] sm:$0xff] %v2658_v40 }
 0x1ed   : > { %v2376_v1 = vsub.f32 %v7253_v47, %v2088_v24  ;;  %2947 = vst [vmem:[%s5633_s19 + $0x4d0] sm:$0xff] %v2659_v25  ;;  %v2662_v59 = vmul.f32 %v2374_v9, %v2374_v9  ;;  %v2663_v60 = vmul.f32 %v2375_v16, %v2375_v16  ;;  %v7255_v27 = vld [vmem:[#allocation123_spill] sm:$0xff]  ;;  %v7256_v42 = vld [vmem:[#allocation126_spill] sm:$0xff]  ;;  %2948 = vst [vmem:[%s5633_s19 + $0x4d8] sm:$0xff] %v2660_v19 }
 0x1ee   : > { %v2378_v44 = vsub.f32 %v7255_v27, %v2090_v35  ;;  %v2379_v63 = vsub.f32 %v7256_v42, %v2091_v20  ;;  %v2096_v0 = vld [vmem:[%s3739_s22 + $0x538] sm:$0xff]  ;;  %v2097_v41 = vld [vmem:[%s3739_s22 + $0x540] sm:$0xff]  ;;  %2949 = vst [vmem:[%s5633_s19 + $0x4e0] sm:$0xff] %v2661_v8  ;;  %v2665_v55 = vmul.f32 %v2377_v2, %v2377_v2  ;;  %v7258_v26 = vld [vmem:[#allocation133_spill] sm:$0xff] }
 0x1ef   : > { %v2664_v24 = vmul.f32 %v2376_v1, %v2376_v1  ;;  %v7257_v53 = vld [vmem:[#allocation130_spill] sm:$0xff]  ;;  %v2381_v7 = vsub.f32 %v7258_v26, %v2093_v33  ;;  %v2098_v40 = vld [vmem:[%s3739_s22 + $0x548] sm:$0xff]  ;;  %v2099_v25 = vld [vmem:[%s3739_s22 + $0x550] sm:$0xff]  ;;  %2950 = vst [vmem:[%s5633_s19 + $0x4e8] sm:$0xff] %v2662_v59 }
 0x1f0   : > { %v2380_v6 = vsub.f32 %v7257_v53, %v2092_v43  ;;  %2951 = vst [vmem:[%s5633_s19 + $0x4f0] sm:$0xff] %v2663_v60  ;;  %v2666_v35 = vmul.f32 %v2378_v44, %v2378_v44  ;;  %v2667_v20 = vmul.f32 %v2379_v63, %v2379_v63  ;;  %v7259_v51 = vld [vmem:[#allocation136_spill] sm:$0xff]  ;;  %v7260_v31 = vld [vmem:[#allocation139_spill] sm:$0xff]  ;;  %v2100_v19 = vld [vmem:[%s3739_s22 + $0x558] sm:$0xff] }
 0x1f1   : > { %v2382_v9 = vsub.f32 %v7259_v51, %v2094_v15  ;;  %v2383_v16 = vsub.f32 %v7260_v31, %v2095_v4  ;;  %v2101_v8 = vld [vmem:[%s3739_s22 + $0x560] sm:$0xff]  ;;  %2952 = vst [vmem:[%s5633_s19 + $0x4f8] sm:$0xff] %v2664_v24  ;;  %2953 = vst [vmem:[%s5633_s19 + $0x500] sm:$0xff] %v2665_v55  ;;  %v2669_v33 = vmul.f32 %v2381_v7, %v2381_v7  ;;  %v7261_v47 = vld [vmem:[#allocation142_spill] sm:$0xff] }
 0x1f2   : > { %v2668_v43 = vmul.f32 %v2380_v6, %v2380_v6  ;;  %v2384_v1 = vsub.f32 %v7261_v47, %v2096_v0  ;;  %v7262_v61 = vld [vmem:[#allocation145_spill] sm:$0xff]  ;;  %v2102_v59 = vld [vmem:[%s3739_s22 + $0x568] sm:$0xff]  ;;  %2954 = vst [vmem:[%s5633_s19 + $0x508] sm:$0xff] %v2666_v35  ;;  %2955 = vst [vmem:[%s5633_s19 + $0x510] sm:$0xff] %v2667_v20 }
 0x1f3   : > { %v2385_v2 = vsub.f32 %v7262_v61, %v2097_v41  ;;  %v2103_v60 = vld [vmem:[%s3739_s22 + $0x570] sm:$0xff]  ;;  %v2670_v15 = vmul.f32 %v2382_v9, %v2382_v9  ;;  %v2671_v4 = vmul.f32 %v2383_v16, %v2383_v16  ;;  %v7263_v27 = vld [vmem:[#allocation148_spill] sm:$0xff]  ;;  %v7264_v42 = vld [vmem:[#allocation151_spill] sm:$0xff]  ;;  %2957 = vst [vmem:[%s5633_s19 + $0x520] sm:$0xff] %v2669_v33 }
 0x1f4   : > { %v2386_v44 = vsub.f32 %v7263_v27, %v2098_v40  ;;  %v2387_v63 = vsub.f32 %v7264_v42, %v2099_v25  ;;  %v2104_v24 = vld [vmem:[%s3739_s22 + $0x578] sm:$0xff]  ;;  %v2105_v55 = vld [vmem:[%s3739_s22 + $0x580] sm:$0xff]  ;;  %2956 = vst [vmem:[%s5633_s19 + $0x518] sm:$0xff] %v2668_v43  ;;  %v2672_v0 = vmul.f32 %v2384_v1, %v2384_v1  ;;  %v7266_v26 = vld [vmem:[#allocation157_spill] sm:$0xff] }
 0x1f5   : > { %v2673_v41 = vmul.f32 %v2385_v2, %v2385_v2  ;;  %v7265_v53 = vld [vmem:[#allocation154_spill] sm:$0xff]  ;;  %v2389_v7 = vsub.f32 %v7266_v26, %v2101_v8  ;;  %v2106_v35 = vld [vmem:[%s3739_s22 + $0x588] sm:$0xff]  ;;  %v2107_v20 = vld [vmem:[%s3739_s22 + $0x590] sm:$0xff]  ;;  %2958 = vst [vmem:[%s5633_s19 + $0x528] sm:$0xff] %v2670_v15 }
 0x1f6   : > { %v2388_v6 = vsub.f32 %v7265_v53, %v2100_v19  ;;  %2959 = vst [vmem:[%s5633_s19 + $0x530] sm:$0xff] %v2671_v4  ;;  %v2674_v40 = vmul.f32 %v2386_v44, %v2386_v44  ;;  %v2675_v25 = vmul.f32 %v2387_v63, %v2387_v63  ;;  %v7267_v51 = vld [vmem:[#allocation160_spill] sm:$0xff]  ;;  %v7268_v31 = vld [vmem:[#allocation163_spill] sm:$0xff]  ;;  %v2108_v43 = vld [vmem:[%s3739_s22 + $0x598] sm:$0xff] }
 0x1f7   : > { %v2390_v9 = vsub.f32 %v7267_v51, %v2102_v59  ;;  %v2391_v16 = vsub.f32 %v7268_v31, %v2103_v60  ;;  %v2109_v33 = vld [vmem:[%s3739_s22 + $0x5a0] sm:$0xff]  ;;  %2960 = vst [vmem:[%s5633_s19 + $0x538] sm:$0xff] %v2672_v0  ;;  %2961 = vst [vmem:[%s5633_s19 + $0x540] sm:$0xff] %v2673_v41  ;;  %v2677_v8 = vmul.f32 %v2389_v7, %v2389_v7  ;;  %v7269_v47 = vld [vmem:[#allocation166_spill] sm:$0xff] }
 0x1f8   : > { %v2676_v19 = vmul.f32 %v2388_v6, %v2388_v6  ;;  %v2392_v1 = vsub.f32 %v7269_v47, %v2104_v24  ;;  %v7270_v61 = vld [vmem:[#allocation169_spill] sm:$0xff]  ;;  %v2110_v15 = vld [vmem:[%s3739_s22 + $0x5a8] sm:$0xff]  ;;  %2962 = vst [vmem:[%s5633_s19 + $0x548] sm:$0xff] %v2674_v40  ;;  %2963 = vst [vmem:[%s5633_s19 + $0x550] sm:$0xff] %v2675_v25 }
 0x1f9   : > { %v2393_v2 = vsub.f32 %v7270_v61, %v2105_v55  ;;  %v2111_v4 = vld [vmem:[%s3739_s22 + $0x5b0] sm:$0xff]  ;;  %v2678_v59 = vmul.f32 %v2390_v9, %v2390_v9  ;;  %v2679_v60 = vmul.f32 %v2391_v16, %v2391_v16  ;;  %v7271_v27 = vld [vmem:[#allocation172_spill] sm:$0xff]  ;;  %v7272_v42 = vld [vmem:[#allocation175_spill] sm:$0xff]  ;;  %2965 = vst [vmem:[%s5633_s19 + $0x560] sm:$0xff] %v2677_v8 }
 0x1fa   : > { %v2394_v44 = vsub.f32 %v7271_v27, %v2106_v35  ;;  %v2395_v63 = vsub.f32 %v7272_v42, %v2107_v20  ;;  %v2112_v0 = vld [vmem:[%s3739_s22 + $0x5b8] sm:$0xff]  ;;  %v2113_v41 = vld [vmem:[%s3739_s22 + $0x5c0] sm:$0xff]  ;;  %2964 = vst [vmem:[%s5633_s19 + $0x558] sm:$0xff] %v2676_v19  ;;  %v2680_v24 = vmul.f32 %v2392_v1, %v2392_v1  ;;  %v7274_v26 = vld [vmem:[#allocation181_spill] sm:$0xff] }
 0x1fb   : > { %v2681_v55 = vmul.f32 %v2393_v2, %v2393_v2  ;;  %v7273_v53 = vld [vmem:[#allocation178_spill] sm:$0xff]  ;;  %v2397_v7 = vsub.f32 %v7274_v26, %v2109_v33  ;;  %v2114_v40 = vld [vmem:[%s3739_s22 + $0x5c8] sm:$0xff]  ;;  %v2115_v25 = vld [vmem:[%s3739_s22 + $0x5d0] sm:$0xff]  ;;  %2966 = vst [vmem:[%s5633_s19 + $0x568] sm:$0xff] %v2678_v59 }
 0x1fc   : > { %v2396_v6 = vsub.f32 %v7273_v53, %v2108_v43  ;;  %2967 = vst [vmem:[%s5633_s19 + $0x570] sm:$0xff] %v2679_v60  ;;  %v2682_v35 = vmul.f32 %v2394_v44, %v2394_v44  ;;  %v2683_v20 = vmul.f32 %v2395_v63, %v2395_v63  ;;  %v7275_v51 = vld [vmem:[#allocation184_spill] sm:$0xff]  ;;  %v7276_v31 = vld [vmem:[#allocation187_spill] sm:$0xff]  ;;  %v2116_v19 = vld [vmem:[%s3739_s22 + $0x5d8] sm:$0xff] }
 0x1fd   : > { %v2398_v9 = vsub.f32 %v7275_v51, %v2110_v15  ;;  %v2399_v16 = vsub.f32 %v7276_v31, %v2111_v4  ;;  %v2117_v8 = vld [vmem:[%s3739_s22 + $0x5e0] sm:$0xff]  ;;  %2968 = vst [vmem:[%s5633_s19 + $0x578] sm:$0xff] %v2680_v24  ;;  %2969 = vst [vmem:[%s5633_s19 + $0x580] sm:$0xff] %v2681_v55  ;;  %v2685_v33 = vmul.f32 %v2397_v7, %v2397_v7  ;;  %v7277_v47 = vld [vmem:[#allocation190_spill] sm:$0xff] }
 0x1fe   : > { %v2684_v43 = vmul.f32 %v2396_v6, %v2396_v6  ;;  %v2400_v1 = vsub.f32 %v7277_v47, %v2112_v0  ;;  %v7278_v61 = vld [vmem:[#allocation193_spill] sm:$0xff]  ;;  %v2118_v59 = vld [vmem:[%s3739_s22 + $0x5e8] sm:$0xff]  ;;  %2970 = vst [vmem:[%s5633_s19 + $0x588] sm:$0xff] %v2682_v35  ;;  %2971 = vst [vmem:[%s5633_s19 + $0x590] sm:$0xff] %v2683_v20 }
 0x1ff   : > { %v2401_v2 = vsub.f32 %v7278_v61, %v2113_v41  ;;  %v2119_v60 = vld [vmem:[%s3739_s22 + $0x5f0] sm:$0xff]  ;;  %v2686_v15 = vmul.f32 %v2398_v9, %v2398_v9  ;;  %v2687_v4 = vmul.f32 %v2399_v16, %v2399_v16  ;;  %v7279_v27 = vld [vmem:[#allocation196_spill] sm:$0xff]  ;;  %v7280_v42 = vld [vmem:[#allocation199_spill] sm:$0xff]  ;;  %2973 = vst [vmem:[%s5633_s19 + $0x5a0] sm:$0xff] %v2685_v33 }
 0x200   : > { %v2402_v44 = vsub.f32 %v7279_v27, %v2114_v40  ;;  %v2403_v63 = vsub.f32 %v7280_v42, %v2115_v25  ;;  %v2120_v24 = vld [vmem:[%s3739_s22 + $0x5f8] sm:$0xff]  ;;  %v2121_v55 = vld [vmem:[%s3739_s22 + $0x600] sm:$0xff]  ;;  %2972 = vst [vmem:[%s5633_s19 + $0x598] sm:$0xff] %v2684_v43  ;;  %v2688_v0 = vmul.f32 %v2400_v1, %v2400_v1  ;;  %v7282_v26 = vld [vmem:[#allocation205_spill] sm:$0xff] }
 0x201   : > { %v2689_v41 = vmul.f32 %v2401_v2, %v2401_v2  ;;  %v7281_v53 = vld [vmem:[#allocation202_spill] sm:$0xff]  ;;  %v2405_v7 = vsub.f32 %v7282_v26, %v2117_v8  ;;  %v2122_v35 = vld [vmem:[%s3739_s22 + $0x608] sm:$0xff]  ;;  %v2123_v20 = vld [vmem:[%s3739_s22 + $0x610] sm:$0xff]  ;;  %2974 = vst [vmem:[%s5633_s19 + $0x5a8] sm:$0xff] %v2686_v15 }
 0x202   : > { %v2404_v6 = vsub.f32 %v7281_v53, %v2116_v19  ;;  %2975 = vst [vmem:[%s5633_s19 + $0x5b0] sm:$0xff] %v2687_v4  ;;  %v2690_v40 = vmul.f32 %v2402_v44, %v2402_v44  ;;  %v2691_v25 = vmul.f32 %v2403_v63, %v2403_v63  ;;  %v7283_v51 = vld [vmem:[#allocation207_spill] sm:$0xff]  ;;  %v7284_v31 = vld [vmem:[#allocation210_spill] sm:$0xff]  ;;  %2976 = vst [vmem:[%s5633_s19 + $0x5b8] sm:$0xff] %v2688_v0 }
 0x203   : > { %v2406_v9 = vsub.f32 %v7283_v51, %v2118_v59  ;;  %v2407_v16 = vsub.f32 %v7284_v31, %v2119_v60  ;;  %v2124_v43 = vld [vmem:[%s3739_s22 + $0x618] sm:$0xff]  ;;  %v2125_v33 = vld [vmem:[%s3739_s22 + $0x620] sm:$0xff]  ;;  %2977 = vst [vmem:[%s5633_s19 + $0x5c0] sm:$0xff] %v2689_v41  ;;  %v2693_v8 = vmul.f32 %v2405_v7, %v2405_v7  ;;  %v7285_v47 = vld [vmem:[#allocation212_spill] sm:$0xff]  ;;  %v2410_v27 = vsub.f32 %v5127_v52, %v2122_v35 }
 0x204   : > { %v2692_v19 = vmul.f32 %v2404_v6, %v2404_v6  ;;  %v2408_v1 = vsub.f32 %v7285_v47, %v2120_v24  ;;  %v7286_v61 = vld [vmem:[#allocation213_spill] sm:$0xff]  ;;  %v2126_v15 = vld [vmem:[%s3739_s22 + $0x628] sm:$0xff]  ;;  %2978 = vst [vmem:[%s5633_s19 + $0x5c8] sm:$0xff] %v2690_v40  ;;  %2979 = vst [vmem:[%s5633_s19 + $0x5d0] sm:$0xff] %v2691_v25  ;;  %v2411_v44 = vsub.f32 %v5143_v34, %v2123_v20 }
 0x205   : > { %v2409_v2 = vsub.f32 %v7286_v61, %v2121_v55  ;;  %v2127_v4 = vld [vmem:[%s3739_s22 + $0x630] sm:$0xff]  ;;  %v2694_v59 = vmul.f32 %v2406_v9, %v2406_v9  ;;  %v2695_v60 = vmul.f32 %v2407_v16, %v2407_v16  ;;  %v2128_v42 = vld [vmem:[%s3739_s22 + $0x638] sm:$0xff]  ;;  %v2129_v63 = vld [vmem:[%s3739_s22 + $0x640] sm:$0xff]  ;;  %2981 = vst [vmem:[%s5633_s19 + $0x5e0] sm:$0xff] %v2693_v8  ;;  %v2412_v0 = vsub.f32 %v5160_v54, %v2124_v43 }
 0x206   : > { %2980 = vst [vmem:[%s5633_s19 + $0x5d8] sm:$0xff] %v2692_v19  ;;  %v2696_v24 = vmul.f32 %v2408_v1, %v2408_v1  ;;  %v2413_v41 = vsub.f32 %v5174_v32, %v2125_v33  ;;  %v2130_v53 = vld [vmem:[%s3739_s22 + $0x648] sm:$0xff]  ;;  %v2131_v6 = vld [vmem:[%s3739_s22 + $0x650] sm:$0xff]  ;;  %v2698_v52 = vmul.f32 %v2410_v27, %v2410_v27  ;;  %v2699_v34 = vmul.f32 %v2411_v44, %v2411_v44  ;;  %v2132_v35 = vld [vmem:[%s3739_s22 + $0x658] sm:$0xff] }
 0x207   : > { %v2697_v55 = vmul.f32 %v2409_v2, %v2409_v2  ;;  %2982 = vst [vmem:[%s5633_s19 + $0x5e8] sm:$0xff] %v2694_v59  ;;  %2983 = vst [vmem:[%s5633_s19 + $0x5f0] sm:$0xff] %v2695_v60  ;;  %v2414_v26 = vsub.f32 %v5188_v38, %v2126_v15  ;;  %v2415_v7 = vsub.f32 %v5207_v18, %v2127_v4  ;;  %v2133_v20 = vld [vmem:[%s3739_s22 + $0x660] sm:$0xff]  ;;  %v2134_v51 = vld [vmem:[%s3739_s22 + $0x668] sm:$0xff] }
 0x208   : > { %2984 = vst [vmem:[%s5633_s19 + $0x5f8] sm:$0xff] %v2696_v24  ;;  %v2700_v54 = vmul.f32 %v2412_v0, %v2412_v0  ;;  %v2701_v32 = vmul.f32 %v2413_v41, %v2413_v41  ;;  %v2416_v40 = vsub.f32 %v5223_v37, %v2128_v42  ;;  %v2417_v25 = vsub.f32 %v5240_v21, %v2129_v63  ;;  %v2135_v9 = vld [vmem:[%s3739_s22 + $0x670] sm:$0xff]  ;;  %v2136_v43 = vld [vmem:[%s3739_s22 + $0x678] sm:$0xff]  ;;  %v2137_v33 = vld [vmem:[%s3739_s22 + $0x680] sm:$0xff] }
 0x209   : > { %2985 = vst [vmem:[%s5633_s19 + $0x600] sm:$0xff] %v2697_v55  ;;  %2986 = vst [vmem:[%s5633_s19 + $0x608] sm:$0xff] %v2698_v52  ;;  %v2702_v38 = vmul.f32 %v2414_v26, %v2414_v26  ;;  %v2703_v18 = vmul.f32 %v2415_v7, %v2415_v7  ;;  %v2418_v31 = vsub.f32 %v5258_v46, %v2130_v53  ;;  %v2138_v47 = vld [vmem:[%s3739_s22 + $0x688] sm:$0xff]  ;;  %v2139_v1 = vld [vmem:[%s3739_s22 + $0x690] sm:$0xff] }
 0x20a   : > { %2987 = vst [vmem:[%s5633_s19 + $0x610] sm:$0xff] %v2699_v34  ;;  %v2419_v16 = vsub.f32 %v5274_v36, %v2131_v6  ;;  %2988 = vst [vmem:[%s5633_s19 + $0x618] sm:$0xff] %v2700_v54  ;;  %v2704_v37 = vmul.f32 %v2416_v40, %v2416_v40  ;;  %v2705_v21 = vmul.f32 %v2417_v25, %v2417_v25  ;;  %v2140_v15 = vld [vmem:[%s3739_s22 + $0x698] sm:$0xff]  ;;  %v2141_v4 = vld [vmem:[%s3739_s22 + $0x6a0] sm:$0xff] }
 0x20b   : > { %2989 = vst [vmem:[%s5633_s19 + $0x620] sm:$0xff] %v2701_v32  ;;  %v2420_v19 = vsub.f32 %v5291_v13, %v2132_v35  ;;  %v2421_v8 = vsub.f32 %v5305_v57, %v2133_v20  ;;  %2990 = vst [vmem:[%s5633_s19 + $0x628] sm:$0xff] %v2702_v38  ;;  %v2706_v46 = vmul.f32 %v2418_v31, %v2418_v31  ;;  %v2142_v27 = vld [vmem:[%s3739_s22 + $0x6a8] sm:$0xff]  ;;  %v2143_v44 = vld [vmem:[%s3739_s22 + $0x6b0] sm:$0xff] }
 0x20c   : > { %2991 = vst [vmem:[%s5633_s19 + $0x630] sm:$0xff] %v2703_v18  ;;  %v2707_v36 = vmul.f32 %v2419_v16, %v2419_v16  ;;  %v2422_v61 = vsub.f32 %v5319_v56, %v2134_v51  ;;  %v2423_v2 = vsub.f32 %v5336_v14, %v2135_v9  ;;  %2992 = vst [vmem:[%s5633_s19 + $0x638] sm:$0xff] %v2704_v37  ;;  %v2144_v24 = vld [vmem:[%s3739_s22 + $0x6b8] sm:$0xff]  ;;  %v2145_v55 = vld [vmem:[%s3739_s22 + $0x6c0] sm:$0xff] }
 0x20d   : > { %2993 = vst [vmem:[%s5633_s19 + $0x640] sm:$0xff] %v2705_v21  ;;  %v2708_v13 = vmul.f32 %v2420_v19, %v2420_v19  ;;  %v2709_v57 = vmul.f32 %v2421_v8, %v2421_v8  ;;  %v2424_v59 = vsub.f32 %v5351_v5, %v2136_v43  ;;  %v2425_v60 = vsub.f32 %v5368_v10, %v2137_v33  ;;  %v2146_v53 = vld [vmem:[%s3739_s22 + $0x6c8] sm:$0xff]  ;;  %v2147_v6 = vld [vmem:[%s3739_s22 + $0x6d0] sm:$0xff]  ;;  %v2148_v26 = vld [vmem:[%s3739_s22 + $0x6d8] sm:$0xff] }
 0x20e   : > { %2994 = vst [vmem:[%s5633_s19 + $0x648] sm:$0xff] %v2706_v46  ;;  %2995 = vst [vmem:[%s5633_s19 + $0x650] sm:$0xff] %v2707_v36  ;;  %v2710_v56 = vmul.f32 %v2422_v61, %v2422_v61  ;;  %v2711_v14 = vmul.f32 %v2423_v2, %v2423_v2  ;;  %v2426_v42 = vsub.f32 %v5386_v39, %v2138_v47  ;;  %v2149_v7 = vld [vmem:[%s3739_s22 + $0x6e0] sm:$0xff]  ;;  %v2150_v54 = vld [vmem:[%s3739_s22 + $0x6e8] sm:$0xff] }
 0x20f   : > { %v2427_v63 = vsub.f32 %v5402_v22, %v2139_v1  ;;  %2996 = vst [vmem:[%s5633_s19 + $0x658] sm:$0xff] %v2708_v13  ;;  %2997 = vst [vmem:[%s5633_s19 + $0x660] sm:$0xff] %v2709_v57  ;;  %v2712_v5 = vmul.f32 %v2424_v59, %v2424_v59  ;;  %v2713_v10 = vmul.f32 %v2425_v60, %v2425_v60  ;;  %v2151_v32 = vld [vmem:[%s3739_s22 + $0x6f0] sm:$0xff]  ;;  %v2152_v51 = vld [vmem:[%s3739_s22 + $0x6f8] sm:$0xff] }
 0x210   : > { %v2428_v0 = vsub.f32 %v5419_v29, %v2140_v15  ;;  %v2429_v41 = vsub.f32 %v5433_v28, %v2141_v4  ;;  %2998 = vst [vmem:[%s5633_s19 + $0x668] sm:$0xff] %v2710_v56  ;;  %2999 = vst [vmem:[%s5633_s19 + $0x670] sm:$0xff] %v2711_v14  ;;  %v2714_v39 = vmul.f32 %v2426_v42, %v2426_v42  ;;  %v2153_v9 = vld [vmem:[%s3739_s22 + $0x700] sm:$0xff]  ;;  %v2154_v31 = vld [vmem:[%s3739_s22 + $0x708] sm:$0xff] }
 0x211   : > { %v2715_v22 = vmul.f32 %v2427_v63, %v2427_v63  ;;  %v2430_v52 = vsub.f32 %v5447_v48, %v2142_v27  ;;  %v2431_v34 = vsub.f32 %v5464_v45, %v2143_v44  ;;  %3000 = vst [vmem:[%s5633_s19 + $0x678] sm:$0xff] %v2712_v5  ;;  %3001 = vst [vmem:[%s5633_s19 + $0x680] sm:$0xff] %v2713_v10  ;;  %v2155_v16 = vld [vmem:[%s3739_s22 + $0x710] sm:$0xff]  ;;  %v2156_v37 = vld [vmem:[%s3739_s22 + $0x718] sm:$0xff] }
 0x212   : > { %v2716_v29 = vmul.f32 %v2428_v0, %v2428_v0  ;;  %v2717_v28 = vmul.f32 %v2429_v41, %v2429_v41  ;;  %v2432_v35 = vsub.f32 %v5479_v58, %v2144_v24  ;;  %v2433_v20 = vsub.f32 %v5496_v30, %v2145_v55  ;;  %3002 = vst [vmem:[%s5633_s19 + $0x688] sm:$0xff] %v2714_v39  ;;  %v2157_v21 = vld [vmem:[%s3739_s22 + $0x720] sm:$0xff]  ;;  %v7287_v8 = vld [vmem:[#allocation214_spill] sm:$0xff]  ;;  %v2158_v1 = vld [vmem:[%s3739_s22 + $0x728] sm:$0xff] }
 0x213   : > { %3003 = vst [vmem:[%s5633_s19 + $0x690] sm:$0xff] %v2715_v22  ;;  %v2718_v48 = vmul.f32 %v2430_v52, %v2430_v52  ;;  %v2719_v45 = vmul.f32 %v2431_v34, %v2431_v34  ;;  %v2434_v40 = vsub.f32 %v5514_v50, %v2146_v53  ;;  %v2435_v25 = vsub.f32 %v5530_v23, %v2147_v6  ;;  %v2159_v46 = vld [vmem:[%s3739_s22 + $0x730] sm:$0xff]  ;;  %v7288_v36 = vld [vmem:[#allocation216_spill] sm:$0xff]  ;;  %v7289_v2 = vld [vmem:[#allocation218_spill] sm:$0xff] }
 0x214   : > { %3004 = vst [vmem:[%s5633_s19 + $0x698] sm:$0xff] %v2716_v29  ;;  %3005 = vst [vmem:[%s5633_s19 + $0x6a0] sm:$0xff] %v2717_v28  ;;  %v2720_v58 = vmul.f32 %v2432_v35, %v2432_v35  ;;  %v2721_v30 = vmul.f32 %v2433_v20, %v2433_v20  ;;  %v2436_v38 = vsub.f32 %v5547_v12, %v2148_v26  ;;  %v2160_v4 = vld [vmem:[%s3739_s22 + $0x738] sm:$0xff]  ;;  %v2161_v13 = vld [vmem:[%s3739_s22 + $0x740] sm:$0xff] }
 0x215   : > { %v2437_v18 = vsub.f32 %v5561_v49, %v2149_v7  ;;  %3006 = vst [vmem:[%s5633_s19 + $0x6a8] sm:$0xff] %v2718_v48  ;;  %3007 = vst [vmem:[%s5633_s19 + $0x6b0] sm:$0xff] %v2719_v45  ;;  %v2722_v50 = vmul.f32 %v2434_v40, %v2434_v40  ;;  %v2723_v23 = vmul.f32 %v2435_v25, %v2435_v25  ;;  %v7290_v59 = vld [vmem:[#allocation220_spill] sm:$0xff]  ;;  %v7291_v27 = vld [vmem:[#allocation222_spill] sm:$0xff] }
 0x216   : > { %v2438_v43 = vsub.f32 %v5575_v3, %v2150_v54  ;;  %v2439_v33 = vsub.f32 %v5592_v62, %v2151_v32  ;;  %3008 = vst [vmem:[%s5633_s19 + $0x6b8] sm:$0xff] %v2720_v58  ;;  %3009 = vst [vmem:[%s5633_s19 + $0x6c0] sm:$0xff] %v2721_v30  ;;  %v2724_v12 = vmul.f32 %v2436_v38, %v2436_v38  ;;  %v2162_v56 = vld [vmem:[%s3739_s22 + $0x748] sm:$0xff]  ;;  %v2163_v14 = vld [vmem:[%s3739_s22 + $0x750] sm:$0xff] }
 0x217   : > { %v2725_v49 = vmul.f32 %v2437_v18, %v2437_v18  ;;  %v2440_v19 = vsub.f32 %v5607_v11, %v2152_v51  ;;  %v2441_v47 = vsub.f32 %v7287_v8, %v2153_v9  ;;  %3010 = vst [vmem:[%s5633_s19 + $0x6c8] sm:$0xff] %v2722_v50  ;;  %3011 = vst [vmem:[%s5633_s19 + $0x6d0] sm:$0xff] %v2723_v23  ;;  %v7292_v24 = vld [vmem:[#allocation224_spill] sm:$0xff]  ;;  %v7293_v5 = vld [vmem:[#allocation227_spill] sm:$0xff] }
 0x218   : > { %v2726_v3 = vmul.f32 %v2438_v43, %v2438_v43  ;;  %v2727_v62 = vmul.f32 %v2439_v33, %v2439_v33  ;;  %v2442_v61 = vsub.f32 %v7288_v36, %v2154_v31  ;;  %v2443_v15 = vsub.f32 %v7289_v2, %v2155_v16  ;;  %3012 = vst [vmem:[%s5633_s19 + $0x6d8] sm:$0xff] %v2724_v12  ;;  %v2164_v0 = vld [vmem:[%s3739_s22 + $0x758] sm:$0xff]  ;;  %v2165_v41 = vld [vmem:[%s3739_s22 + $0x760] sm:$0xff]  ;;  %v7294_v39 = vld [vmem:[#allocation229_spill] sm:$0xff] }
 0x219   : > { %3013 = vst [vmem:[%s5633_s19 + $0x6e0] sm:$0xff] %v2725_v49  ;;  %v2728_v11 = vmul.f32 %v2440_v19, %v2440_v19  ;;  %v2729_v57 = vmul.f32 %v2441_v47, %v2441_v47  ;;  %v2444_v60 = vsub.f32 %v7290_v59, %v2156_v37  ;;  %v2445_v44 = vsub.f32 %v7291_v27, %v2157_v21  ;;  %v7295_v52 = vld [vmem:[#allocation231_spill] sm:$0xff]  ;;  %v2166_v26 = vld [vmem:[%s3739_s22 + $0x768] sm:$0xff]  ;;  %v2167_v7 = vld [vmem:[%s3739_s22 + $0x770] sm:$0xff] }
 0x21a   : > { %3014 = vst [vmem:[%s5633_s19 + $0x6e8] sm:$0xff] %v2726_v3  ;;  %3015 = vst [vmem:[%s5633_s19 + $0x6f0] sm:$0xff] %v2727_v62  ;;  %v2730_v42 = vmul.f32 %v2442_v61, %v2442_v61  ;;  %v2731_v63 = vmul.f32 %v2443_v15, %v2443_v15  ;;  %v2446_v55 = vsub.f32 %v7292_v24, %v2158_v1  ;;  %v7296_v35 = vld [vmem:[#allocation233_spill] sm:$0xff]  ;;  %v7297_v54 = vld [vmem:[#allocation235_spill] sm:$0xff] }
 0x21b   : > { %v2447_v10 = vsub.f32 %v7293_v5, %v2159_v46  ;;  %3016 = vst [vmem:[%s5633_s19 + $0x6f8] sm:$0xff] %v2728_v11  ;;  %3017 = vst [vmem:[%s5633_s19 + $0x700] sm:$0xff] %v2729_v57  ;;  %v2732_v53 = vmul.f32 %v2444_v60, %v2444_v60  ;;  %v2733_v6 = vmul.f32 %v2445_v44, %v2445_v44  ;;  %v2168_v48 = vld [vmem:[%s3739_s22 + $0x778] sm:$0xff]  ;;  %v2169_v45 = vld [vmem:[%s3739_s22 + $0x780] sm:$0xff] }
 0x21c   : > { %v2448_v22 = vsub.f32 %v7294_v39, %v2160_v4  ;;  %v2449_v34 = vsub.f32 %v7295_v52, %v2161_v13  ;;  %3018 = vst [vmem:[%s5633_s19 + $0x708] sm:$0xff] %v2730_v42  ;;  %3019 = vst [vmem:[%s5633_s19 + $0x710] sm:$0xff] %v2731_v63  ;;  %v2734_v29 = vmul.f32 %v2446_v55, %v2446_v55  ;;  %v7298_v51 = vld [vmem:[#allocation237_spill] sm:$0xff]  ;;  %v7299_v58 = vld [vmem:[#allocation239_spill] sm:$0xff] }
 0x21d   : > { %v2735_v28 = vmul.f32 %v2447_v10, %v2447_v10  ;;  %v2450_v20 = vsub.f32 %v7296_v35, %v2162_v56  ;;  %v2451_v32 = vsub.f32 %v7297_v54, %v2163_v14  ;;  %3020 = vst [vmem:[%s5633_s19 + $0x718] sm:$0xff] %v2732_v53  ;;  %3021 = vst [vmem:[%s5633_s19 + $0x720] sm:$0xff] %v2733_v6  ;;  %v2170_v38 = vld [vmem:[%s3739_s22 + $0x788] sm:$0xff]  ;;  %v2171_v18 = vld [vmem:[%s3739_s22 + $0x790] sm:$0xff] }
 0x21e   : > { %v2736_v40 = vmul.f32 %v2448_v22, %v2448_v22  ;;  %v2737_v25 = vmul.f32 %v2449_v34, %v2449_v34  ;;  %v2452_v9 = vsub.f32 %v7298_v51, %v2164_v0  ;;  %v2453_v30 = vsub.f32 %v7299_v58, %v2165_v41  ;;  %3022 = vst [vmem:[%s5633_s19 + $0x728] sm:$0xff] %v2734_v29  ;;  %v7300_v50 = vld [vmem:[#allocation241_spill] sm:$0xff]  ;;  %v7301_v43 = vld [vmem:[#allocation243_spill] sm:$0xff]  ;;  %v2172_v37 = vld [vmem:[%s3739_s22 + $0x798] sm:$0xff] }
 0x21f   : > { %3023 = vst [vmem:[%s5633_s19 + $0x730] sm:$0xff] %v2735_v28  ;;  %v2738_v31 = vmul.f32 %v2450_v20, %v2450_v20  ;;  %v2739_v16 = vmul.f32 %v2451_v32, %v2451_v32  ;;  %v2454_v23 = vsub.f32 %v7300_v50, %v2166_v26  ;;  %v2455_v33 = vsub.f32 %v7301_v43, %v2167_v7  ;;  %v2173_v21 = vld [vmem:[%s3739_s22 + $0x7a0] sm:$0xff]  ;;  %v7302_v19 = vld [vmem:[#allocation245_spill] sm:$0xff]  ;;  %v2174_v46 = vld [vmem:[%s3739_s22 + $0x7a8] sm:$0xff] }
 0x220   : > { %3024 = vst [vmem:[%s5633_s19 + $0x738] sm:$0xff] %v2736_v40  ;;  %3025 = vst [vmem:[%s5633_s19 + $0x740] sm:$0xff] %v2737_v25  ;;  %v2740_v12 = vmul.f32 %v2452_v9, %v2452_v9  ;;  %v2741_v49 = vmul.f32 %v2453_v30, %v2453_v30  ;;  %v2456_v8 = vsub.f32 %v7302_v19, %v2168_v48  ;;  %v7303_v47 = vld [vmem:[#allocation247_spill] sm:$0xff]  ;;  %v2175_v3 = vld [vmem:[%s3739_s22 + $0x7b0] sm:$0xff] }
 0x221   : > { %v2457_v1 = vsub.f32 %v7303_v47, %v2169_v45  ;;  %3026 = vst [vmem:[%s5633_s19 + $0x748] sm:$0xff] %v2738_v31  ;;  %3027 = vst [vmem:[%s5633_s19 + $0x750] sm:$0xff] %v2739_v16  ;;  %v2742_v62 = vmul.f32 %v2454_v23, %v2454_v23  ;;  %v2743_v36 = vmul.f32 %v2455_v33, %v2455_v33  ;;  %v7304_v61 = vld [vmem:[#allocation249_spill] sm:$0xff]  ;;  %v7305_v15 = vld [vmem:[#allocation251_spill] sm:$0xff] }
 0x222   : > { %v2458_v2 = vsub.f32 %v7304_v61, %v2170_v38  ;;  %v2459_v4 = vsub.f32 %v7305_v15, %v2171_v18  ;;  %v2176_v13 = vld [vmem:[%s3739_s22 + $0x7b8] sm:$0xff]  ;;  %v2177_v11 = vld [vmem:[%s3739_s22 + $0x7c0] sm:$0xff]  ;;  %3028 = vst [vmem:[%s5633_s19 + $0x758] sm:$0xff] %v2740_v12  ;;  %3029 = vst [vmem:[%s5633_s19 + $0x760] sm:$0xff] %v2741_v49  ;;  %v2744_v57 = vmul.f32 %v2456_v8, %v2456_v8 }
 0x223   : > { %v2745_v59 = vmul.f32 %v2457_v1, %v2457_v1  ;;  %v7306_v60 = vld [vmem:[#allocation253_spill] sm:$0xff]  ;;  %v7307_v44 = vld [vmem:[#allocation255_spill] sm:$0xff]  ;;  %v2178_v14 = vld [vmem:[%s3739_s22 + $0x7c8] sm:$0xff]  ;;  %3030 = vst [vmem:[%s5633_s19 + $0x768] sm:$0xff] %v2742_v62 }
 0x224   : > { %v2460_v27 = vsub.f32 %v7306_v60, %v2172_v37  ;;  %v2461_v56 = vsub.f32 %v7307_v44, %v2173_v21  ;;  %v2179_v42 = vld [vmem:[%s3739_s22 + $0x7d0] sm:$0xff]  ;;  %3031 = vst [vmem:[%s5633_s19 + $0x770] sm:$0xff] %v2743_v36  ;;  %v2746_v63 = vmul.f32 %v2458_v2, %v2458_v2  ;;  %v2747_v24 = vmul.f32 %v2459_v4, %v2459_v4  ;;  %v7309_v10 = vld [vmem:[#allocation259_spill] sm:$0xff]  ;;  %v2180_v41 = vld [vmem:[%s3739_s22 + $0x7d8] sm:$0xff] }
 0x225   : > { %v7308_v55 = vld [vmem:[#allocation257_spill] sm:$0xff]  ;;  %v2463_v0 = vsub.f32 %v7309_v10, %v2175_v3  ;;  %v2181_v53 = vld [vmem:[%s3739_s22 + $0x7e0] sm:$0xff]  ;;  %3032 = vst [vmem:[%s5633_s19 + $0x778] sm:$0xff] %v2744_v57  ;;  %3033 = vst [vmem:[%s5633_s19 + $0x780] sm:$0xff] %v2745_v59 }
 0x226   : > { %v2462_v5 = vsub.f32 %v7308_v55, %v2174_v46  ;;  %v2748_v6 = vmul.f32 %v2460_v27, %v2460_v27  ;;  %v2749_v39 = vmul.f32 %v2461_v56, %v2461_v56  ;;  %v7310_v22 = vld [vmem:[#allocation261_spill] sm:$0xff]  ;;  %v7311_v34 = vld [vmem:[#allocation263_spill] sm:$0xff]  ;;  %v2182_v7 = vld [vmem:[%s3739_s22 + $0x7e8] sm:$0xff]  ;;  %3034 = vst [vmem:[%s5633_s19 + $0x788] sm:$0xff] %v2746_v63 }
 0x227   : > { %v2464_v52 = vsub.f32 %v7310_v22, %v2176_v13  ;;  %v2465_v26 = vsub.f32 %v7311_v34, %v2177_v11  ;;  %v2183_v29 = vld [vmem:[%s3739_s22 + $0x7f0] sm:$0xff]  ;;  %3035 = vst [vmem:[%s5633_s19 + $0x790] sm:$0xff] %v2747_v24  ;;  %v2751_v35 = vmul.f32 %v2463_v0, %v2463_v0  ;;  %v7313_v32 = vld [vmem:[#allocation267_spill] sm:$0xff]  ;;  %v2184_v45 = vld [vmem:[%s3739_s22 + $0x7f8] sm:$0xff] }
 0x228   : > { %v2750_v28 = vmul.f32 %v2462_v5, %v2462_v5  ;;  %v7312_v20 = vld [vmem:[#allocation265_spill] sm:$0xff]  ;;  %v2467_v48 = vsub.f32 %v7313_v32, %v2179_v42  ;;  %v2185_v40 = vld [vmem:[%s3739_s22 + $0x800] sm:$0xff]  ;;  %3036 = vst [vmem:[%s5633_s19 + $0x798] sm:$0xff] %v2748_v6  ;;  %3037 = vst [vmem:[%s5633_s19 + $0x7a0] sm:$0xff] %v2749_v39 }
 0x229   : > { %v2466_v54 = vsub.f32 %v7312_v20, %v2178_v14  ;;  %v2752_v25 = vmul.f32 %v2464_v52, %v2464_v52  ;;  %v2753_v51 = vmul.f32 %v2465_v26, %v2465_v26  ;;  %v7314_v9 = vld [vmem:[#allocation269_spill] sm:$0xff]  ;;  %v7315_v30 = vld [vmem:[#allocation271_spill] sm:$0xff]  ;;  %v2186_v18 = vld [vmem:[%s3739_s22 + $0x808] sm:$0xff]  ;;  %3039 = vst [vmem:[%s5633_s19 + $0x7b0] sm:$0xff] %v2751_v35 }
 0x22a   : > { %v2468_v58 = vsub.f32 %v7314_v9, %v2180_v41  ;;  %v2469_v38 = vsub.f32 %v7315_v30, %v2181_v53  ;;  %v2187_v31 = vld [vmem:[%s3739_s22 + $0x810] sm:$0xff]  ;;  %3038 = vst [vmem:[%s5633_s19 + $0x7a8] sm:$0xff] %v2750_v28  ;;  %v2755_v50 = vmul.f32 %v2467_v48, %v2467_v48  ;;  %v7317_v33 = vld [vmem:[#allocation275_spill] sm:$0xff]  ;;  %v2188_v21 = vld [vmem:[%s3739_s22 + $0x818] sm:$0xff] }
 0x22b   : > { %v2754_v16 = vmul.f32 %v2466_v54, %v2466_v54  ;;  %v7316_v23 = vld [vmem:[#allocation273_spill] sm:$0xff]  ;;  %v2471_v37 = vsub.f32 %v7317_v33, %v2183_v29  ;;  %v2189_v12 = vld [vmem:[%s3739_s22 + $0x820] sm:$0xff]  ;;  %3040 = vst [vmem:[%s5633_s19 + $0x7b8] sm:$0xff] %v2752_v25  ;;  %3041 = vst [vmem:[%s5633_s19 + $0x7c0] sm:$0xff] %v2753_v51 }
 0x22c   : > { %v2470_v43 = vsub.f32 %v7316_v23, %v2182_v7  ;;  %v2756_v49 = vmul.f32 %v2468_v58, %v2468_v58  ;;  %v2757_v19 = vmul.f32 %v2469_v38, %v2469_v38  ;;  %v7318_v8 = vld [vmem:[#allocation277_spill] sm:$0xff]  ;;  %v7319_v1 = vld [vmem:[#allocation215_spill] sm:$0xff]  ;;  %v2190_v3 = vld [vmem:[%s3739_s22 + $0x828] sm:$0xff]  ;;  %3043 = vst [vmem:[%s5633_s19 + $0x7d0] sm:$0xff] %v2755_v50 }
 0x22d   : > { %v2472_v47 = vsub.f32 %v7318_v8, %v2184_v45  ;;  %v2473_v46 = vsub.f32 %v7319_v1, %v2185_v40  ;;  %v2191_v62 = vld [vmem:[%s3739_s22 + $0x830] sm:$0xff]  ;;  %3042 = vst [vmem:[%s5633_s19 + $0x7c8] sm:$0xff] %v2754_v16  ;;  %v2759_v61 = vmul.f32 %v2471_v37, %v2471_v37  ;;  %v7321_v4 = vld [vmem:[#allocation219_spill] sm:$0xff]  ;;  %v2192_v11 = vld [vmem:[%s3739_s22 + $0x838] sm:$0xff] }
 0x22e   : > { %v2758_v36 = vmul.f32 %v2470_v43, %v2470_v43  ;;  %v7320_v2 = vld [vmem:[#allocation217_spill] sm:$0xff]  ;;  %v2475_v13 = vsub.f32 %v7321_v4, %v2187_v31  ;;  %v2193_v57 = vld [vmem:[%s3739_s22 + $0x840] sm:$0xff]  ;;  %3044 = vst [vmem:[%s5633_s19 + $0x7d8] sm:$0xff] %v2756_v49  ;;  %3045 = vst [vmem:[%s5633_s19 + $0x7e0] sm:$0xff] %v2757_v19 }
 0x22f   : > { %v2474_v15 = vsub.f32 %v7320_v2, %v2186_v18  ;;  %v2760_v59 = vmul.f32 %v2472_v47, %v2472_v47  ;;  %v2761_v60 = vmul.f32 %v2473_v46, %v2473_v46  ;;  %v7322_v27 = vld [vmem:[#allocation221_spill] sm:$0xff]  ;;  %v7323_v56 = vld [vmem:[#allocation223_spill] sm:$0xff]  ;;  %v2194_v42 = vld [vmem:[%s3739_s22 + $0x848] sm:$0xff]  ;;  %3047 = vst [vmem:[%s5633_s19 + $0x7f0] sm:$0xff] %v2759_v61 }
 0x230   : > { %v2476_v44 = vsub.f32 %v7322_v27, %v2188_v21  ;;  %v2477_v14 = vsub.f32 %v7323_v56, %v2189_v12  ;;  %v2195_v63 = vld [vmem:[%s3739_s22 + $0x850] sm:$0xff]  ;;  %3046 = vst [vmem:[%s5633_s19 + $0x7e8] sm:$0xff] %v2758_v36  ;;  %v2763_v55 = vmul.f32 %v2475_v13, %v2475_v13  ;;  %v7325_v0 = vld [vmem:[#allocation228_spill] sm:$0xff]  ;;  %v2196_v53 = vld [vmem:[%s3739_s22 + $0x858] sm:$0xff] }
 0x231   : > { %v2762_v24 = vmul.f32 %v2474_v15, %v2474_v15  ;;  %v7324_v5 = vld [vmem:[#allocation225_spill] sm:$0xff]  ;;  %v2479_v41 = vsub.f32 %v7325_v0, %v2191_v62  ;;  %v2197_v6 = vld [vmem:[%s3739_s22 + $0x860] sm:$0xff]  ;;  %3048 = vst [vmem:[%s5633_s19 + $0x7f8] sm:$0xff] %v2760_v59  ;;  %3049 = vst [vmem:[%s5633_s19 + $0x800] sm:$0xff] %v2761_v60 }
 0x232   : > { %v2478_v10 = vsub.f32 %v7324_v5, %v2190_v3  ;;  %v2764_v39 = vmul.f32 %v2476_v44, %v2476_v44  ;;  %v2765_v22 = vmul.f32 %v2477_v14, %v2477_v14  ;;  %v7326_v52 = vld [vmem:[#allocation230_spill] sm:$0xff]  ;;  %v7327_v26 = vld [vmem:[#allocation232_spill] sm:$0xff]  ;;  %v2199_v28 = vld [vmem:[%s3739_s22 + $0x870] sm:$0xff]  ;;  %3051 = vst [vmem:[%s5633_s19 + $0x810] sm:$0xff] %v2763_v55 }
 0x233   : > { %v2480_v34 = vsub.f32 %v7326_v52, %v2192_v11  ;;  %v2481_v7 = vsub.f32 %v7327_v26, %v2193_v57  ;;  %v2198_v29 = vld [vmem:[%s3739_s22 + $0x868] sm:$0xff]  ;;  %3050 = vst [vmem:[%s5633_s19 + $0x808] sm:$0xff] %v2762_v24  ;;  %v2767_v20 = vmul.f32 %v2479_v41, %v2479_v41  ;;  %v7328_v54 = vld [vmem:[#allocation234_spill] sm:$0xff]  ;;  %v2201_v25 = vld [vmem:[%s3739_s22 + $0x880] sm:$0xff] }
 0x234   : > { %v2766_v35 = vmul.f32 %v2478_v10, %v2478_v10  ;;  %v2482_v32 = vsub.f32 %v7328_v54, %v2194_v42  ;;  %v7329_v48 = vld [vmem:[#allocation236_spill] sm:$0xff]  ;;  %v2200_v40 = vld [vmem:[%s3739_s22 + $0x878] sm:$0xff]  ;;  %3052 = vst [vmem:[%s5633_s19 + $0x818] sm:$0xff] %v2764_v39  ;;  %3053 = vst [vmem:[%s5633_s19 + $0x820] sm:$0xff] %v2765_v22 }
 0x235   : > { %v2483_v45 = vsub.f32 %v7329_v48, %v2195_v63  ;;  %v2768_v51 = vmul.f32 %v2480_v34, %v2480_v34  ;;  %v2769_v9 = vmul.f32 %v2481_v7, %v2481_v7  ;;  %v7330_v58 = vld [vmem:[#allocation238_spill] sm:$0xff]  ;;  %v7331_v38 = vld [vmem:[#allocation240_spill] sm:$0xff]  ;;  %v2203_v16 = vld [vmem:[%s3739_s22 + $0x890] sm:$0xff]  ;;  %3055 = vst [vmem:[%s5633_s19 + $0x830] sm:$0xff] %v2767_v20 }
 0x236   : > { %v2484_v30 = vsub.f32 %v7330_v58, %v2196_v53  ;;  %v2485_v18 = vsub.f32 %v7331_v38, %v2197_v6  ;;  %v2202_v31 = vld [vmem:[%s3739_s22 + $0x888] sm:$0xff]  ;;  %3054 = vst [vmem:[%s5633_s19 + $0x828] sm:$0xff] %v2766_v35  ;;  %v2770_v50 = vmul.f32 %v2482_v32, %v2482_v32  ;;  %v7332_v43 = vld [vmem:[#allocation242_spill] sm:$0xff]  ;;  %v2205_v49 = vld [vmem:[%s3739_s22 + $0x8a0] sm:$0xff] }
 0x237   : > { %v2771_v23 = vmul.f32 %v2483_v45, %v2483_v45  ;;  %v2486_v33 = vsub.f32 %v7332_v43, %v2198_v29  ;;  %v7333_v37 = vld [vmem:[#allocation244_spill] sm:$0xff]  ;;  %v2204_v12 = vld [vmem:[%s3739_s22 + $0x898] sm:$0xff]  ;;  %3056 = vst [vmem:[%s5633_s19 + $0x838] sm:$0xff] %v2768_v51  ;;  %3057 = vst [vmem:[%s5633_s19 + $0x840] sm:$0xff] %v2769_v9 }
 0x238   : > { %v2487_v21 = vsub.f32 %v7333_v37, %v2199_v28  ;;  %v2772_v19 = vmul.f32 %v2484_v30, %v2484_v30  ;;  %v2773_v8 = vmul.f32 %v2485_v18, %v2485_v18  ;;  %v7334_v47 = vld [vmem:[#allocation246_spill] sm:$0xff]  ;;  %v7335_v46 = vld [vmem:[#allocation248_spill] sm:$0xff]  ;;  %v2207_v36 = vld [vmem:[%s3739_s22 + $0x8b0] sm:$0xff]  ;;  %3058 = vst [vmem:[%s5633_s19 + $0x848] sm:$0xff] %v2770_v50 }
 0x239   : > { %v2488_v1 = vsub.f32 %v7334_v47, %v2200_v40  ;;  %v2489_v3 = vsub.f32 %v7335_v46, %v2201_v25  ;;  %v2206_v62 = vld [vmem:[%s3739_s22 + $0x8a8] sm:$0xff]  ;;  %3059 = vst [vmem:[%s5633_s19 + $0x850] sm:$0xff] %v2771_v23  ;;  %v2774_v61 = vmul.f32 %v2486_v33, %v2486_v33  ;;  %v7336_v15 = vld [vmem:[#allocation250_spill] sm:$0xff]  ;;  %v2209_v59 = vld [vmem:[%s3739_s22 + $0x8c0] sm:$0xff] }
 0x23a   : > { %v2775_v2 = vmul.f32 %v2487_v21, %v2487_v21  ;;  %v2490_v4 = vsub.f32 %v7336_v15, %v2202_v31  ;;  %v7337_v13 = vld [vmem:[#allocation252_spill] sm:$0xff]  ;;  %v2208_v57 = vld [vmem:[%s3739_s22 + $0x8b8] sm:$0xff]  ;;  %3060 = vst [vmem:[%s5633_s19 + $0x858] sm:$0xff] %v2772_v19  ;;  %3061 = vst [vmem:[%s5633_s19 + $0x860] sm:$0xff] %v2773_v8 }
 0x23b   : > { %v2491_v11 = vsub.f32 %v7337_v13, %v2203_v16  ;;  %v2776_v60 = vmul.f32 %v2488_v1, %v2488_v1  ;;  %v2777_v27 = vmul.f32 %v2489_v3, %v2489_v3  ;;  %v7338_v44 = vld [vmem:[#allocation254_spill] sm:$0xff]  ;;  %v7339_v14 = vld [vmem:[#allocation256_spill] sm:$0xff]  ;;  %v2211_v24 = vld [vmem:[%s3739_s22 + $0x8d0] sm:$0xff]  ;;  %3062 = vst [vmem:[%s5633_s19 + $0x868] sm:$0xff] %v2774_v61 }
 0x23c   : > { %v2492_v56 = vsub.f32 %v7338_v44, %v2204_v12  ;;  %v2493_v42 = vsub.f32 %v7339_v14, %v2205_v49  ;;  %v2210_v63 = vld [vmem:[%s3739_s22 + $0x8c8] sm:$0xff]  ;;  %3063 = vst [vmem:[%s5633_s19 + $0x870] sm:$0xff] %v2775_v2  ;;  %v2778_v55 = vmul.f32 %v2490_v4, %v2490_v4  ;;  %v7340_v10 = vld [vmem:[#allocation258_spill] sm:$0xff]  ;;  %v2213_v39 = vld [vmem:[%s3739_s22 + $0x8e0] sm:$0xff]  ;;  %v3122_v2 = vstv (!%p3367_p4), %s3121_s16 }
 0x23d   : > { %v2779_v5 = vmul.f32 %v2491_v11, %v2491_v11  ;;  %v2494_v0 = vsub.f32 %v7340_v10, %v2206_v62  ;;  %v7341_v41 = vld [vmem:[#allocation260_spill] sm:$0xff]  ;;  %v2212_v6 = vld [vmem:[%s3739_s22 + $0x8d8] sm:$0xff]  ;;  %3064 = vst [vmem:[%s5633_s19 + $0x878] sm:$0xff] %v2776_v60  ;;  %3065 = vst [vmem:[%s5633_s19 + $0x880] sm:$0xff] %v2777_v27  ;;  %v3110_v62 = vstv (!%p3367_p4), %s3109_s24 }
 0x23e   : > { %v2495_v53 = vsub.f32 %v7341_v41, %v2207_v36  ;;  %v2780_v22 = vmul.f32 %v2492_v56, %v2492_v56  ;;  %v2781_v52 = vmul.f32 %v2493_v42, %v2493_v42  ;;  %v7342_v34 = vld [vmem:[#allocation262_spill] sm:$0xff]  ;;  %v7343_v7 = vld [vmem:[#allocation264_spill] sm:$0xff]  ;;  %v2215_v35 = vld [vmem:[%s3739_s22 + $0x8f0] sm:$0xff]  ;;  %3066 = vst [vmem:[%s5633_s19 + $0x888] sm:$0xff] %v2778_v55 }
 0x23f   : > { %v2496_v26 = vsub.f32 %v7342_v34, %v2208_v57  ;;  %v2497_v29 = vsub.f32 %v7343_v7, %v2209_v59  ;;  %v2214_v28 = vld [vmem:[%s3739_s22 + $0x8e8] sm:$0xff]  ;;  %3067 = vst [vmem:[%s5633_s19 + $0x890] sm:$0xff] %v2779_v5  ;;  %v2782_v20 = vmul.f32 %v2494_v0, %v2494_v0  ;;  %v7344_v32 = vld [vmem:[#allocation266_spill] sm:$0xff]  ;;  %v7352_v46 = vld [vmem:[#allocation43_spill] sm:$0xff] (!%p3367_p4) }
 0x240   : > { %v2783_v54 = vmul.f32 %v2495_v53, %v2495_v53  ;;  %v2498_v48 = vsub.f32 %v7344_v32, %v2210_v63  ;;  %v7345_v45 = vld [vmem:[#allocation268_spill] sm:$0xff]  ;;  %v2216_v25 = vld [vmem:[%s3739_s22 + $0x8f8] sm:$0xff]  ;;  %3068 = vst [vmem:[%s5633_s19 + $0x898] sm:$0xff] %v2780_v22  ;;  %3069 = vst [vmem:[%s5633_s19 + $0x8a0] sm:$0xff] %v2781_v52  ;;  %s3092_s22 = sfloor.f32 (!%p3367_p4), %s3091_s20 }
 0x241   : > { %v2499_v40 = vsub.f32 %v7345_v45, %v2211_v24  ;;  %v2784_v51 = vmul.f32 %v2496_v26, %v2496_v26  ;;  %v2785_v9 = vmul.f32 %v2497_v29, %v2497_v29  ;;  %v7346_v58 = vld [vmem:[#allocation270_spill] sm:$0xff]  ;;  %v7347_v38 = vld [vmem:[#allocation272_spill] sm:$0xff]  ;;  %3070 = vst [vmem:[%s5633_s19 + $0x8a8] sm:$0xff] %v2782_v20  ;;  %v2504_v12 = vsub.f32 %v5618_v17, %v2216_v25  ;;  %v7350_v17 = vld [vmem:[#allocation27_spill] sm:$0xff] (!%p3367_p4)  ;;  %s3095_s9 = smul.f32 (!%p3367_p4), 0.003921569, %s3092_s22 }
 0x242   : > { %v2500_v30 = vsub.f32 %v7346_v58, %v2212_v6  ;;  %v2501_v18 = vsub.f32 %v7347_v38, %v2213_v39  ;;  %3071 = vst [vmem:[%s5633_s19 + $0x8b0] sm:$0xff] %v2783_v54  ;;  %v2786_v31 = vmul.f32 %v2498_v48, %v2498_v48  ;;  %v7348_v50 = vld [vmem:[#allocation274_spill] sm:$0xff]  ;;  %v7349_v43 = vld [vmem:[#allocation276_spill] sm:$0xff]  ;;  %3084 = sbr.rel (%p3367_p4) target bundleno = 586 (0x24a), region = 40  ;;  %vm3085_vm0 = vcmp.eq.s32.totalorder (!%p3367_p4), %v7350_v17, 0 }
 0x243   : > { %v2787_v16 = vmul.f32 %v2499_v40, %v2499_v40  ;;  %v2502_v23 = vsub.f32 %v7348_v50, %v2214_v28  ;;  %v2503_v33 = vsub.f32 %v7349_v43, %v2215_v35  ;;  %3072 = vst [vmem:[%s5633_s19 + $0x8b8] sm:$0xff] %v2784_v51  ;;  %3073 = vst [vmem:[%s5633_s19 + $0x8c0] sm:$0xff] %v2785_v9  ;;  %v7351_v47 = vld [vmem:[#allocation28_spill] sm:$0xff] (!%p3367_p4)  ;;  %v3098_v1 = vstv (!%p3367_p4), %s3095_s9  ;;  %v7354_v15 = vld [vmem:[#allocation226_spill] sm:$0xff] (!%p3367_p4) }
 0x244   : > { %v2788_v37 = vmul.f32 %v2500_v30, %v2500_v30  ;;  %v2789_v21 = vmul.f32 %v2501_v18, %v2501_v18  ;;  %3074 = vst [vmem:[%s5633_s19 + $0x8c8] sm:$0xff] %v2786_v31  ;;  %v2792_v8 = vmul.f32 %v2504_v12, %v2504_v12  ;;  %vm3086_vm3 = vcmp.eq.s32.totalorder (!%p3367_p4), %v7351_v47, 0  ;;  %v7353_v36 = vld [vmem:[#allocation128_spill] sm:$0xff] (!%p3367_p4) }
 0x245   : > { %3075 = vst [vmem:[%s5633_s19 + $0x8d0] sm:$0xff] %v2787_v16  ;;  %v2790_v49 = vmul.f32 %v2502_v23, %v2502_v23  ;;  %v2791_v19 = vmul.f32 %v2503_v33, %v2503_v33  ;;  %vm3087_vm12 = vmand (!%p3367_p4), %vm3085_vm0, %vm3086_vm3 }
 0x246   : > { %3076 = vst [vmem:[%s5633_s19 + $0x8d8] sm:$0xff] %v2788_v37  ;;  %3077 = vst [vmem:[%s5633_s19 + $0x8e0] sm:$0xff] %v2789_v21  ;;  %v3099_v3 = vsel (!%p3367_p4), %vm3087_vm12, %v3098_v1, %v7352_v46  ;;  %v3112_v61 = vsel (!%p3367_p4), %vm3087_vm12, %v3110_v62, %v7353_v36  ;;  %v3125_v4 = vsel (!%p3367_p4), %vm3087_vm12, %v3122_v2, %v7354_v15 }
 0x247   : > { %3078 = vst [vmem:[%s5633_s19 + $0x8e8] sm:$0xff] %v2790_v49  ;;  %3079 = vst [vmem:[%s5633_s19 + $0x8f0] sm:$0xff] %v2791_v19 }
 0x248   : > { %3080 = vst [vmem:[%s5633_s19 + $0x8f8] sm:$0xff] %v2792_v8  ;;  %3126 = vst [vmem:[%s3980_s23] sm:$0xff] (!%p3367_p4), %v3099_v3 }
 0x249   : > { %3127 = vst [vmem:[%s3980_s23 + $0x100] sm:$0xff] %v3112_v61  ;;  %3128 = vst [vmem:[%s3980_s23 + $0x200] sm:$0xff] %v3125_v4 }
 0x24a PF: > { %s3130_s5 = scalar_lea.sflag [#allocation6], %s3724_s14  ;;  %s3135_s1 = scalar_lea.sflag [#allocation11], %s3724_s14 }
 0x24b   : > { %s3383_s13 = sshll.u32 %s3634_s0, 12  ;;  %s3165_s15 = sshll.u32 %s5633_s19, 4  ;;  %s3166_s15 = int_to_ptr.vmem [resolvable:$true] %s3165_s15 }
 0x24c   : > { %s3148_s12 = scalar_lea.hbm %s6567_s3, %s3383_s13  ;;  %s3564_s21 = smov 4096  }
 0x24d   : > { %3408 = sst [smem:[#allocation17]] (%p3661_p12), %s3564_s21  ;;  %s3565_s8 = smov 8192  }
 0x24e   : > { %3409 = sst [smem:[#allocation17 + $0x1]] (%p3661_p12), %s3565_s8  ;;  %s3566_s22 = smov 16  }
 0x24f   : > { %3410 = sst [smem:[#allocation17 + $0x2]] (%p3661_p12), %s3566_s22  ;;  %s3567_s17 = smov 256  }
 0x250   : > { %3411 = sst [smem:[#allocation17 + $0x3]] (%p3661_p12), %s3567_s17  ;;  %s3568_s0 = smov [#allocation16]  }
 0x251   : > { %3412 = sst [smem:[#allocation17 + $0x4]] (%p3661_p12), %s3567_s17  ;;  %s3569_s19 = smov 0  }
 0x252   : > { %3413 = sst [smem:[#allocation17 + $0x5]] (%p3661_p12), %s3566_s22 }
 0x253   : > { %3414 = dma.general (%p3661_p12), %s3166_s15, 36864, %s3148_s12, %s3130_s5, %s3568_s0, [#allocation17], %s3569_s19, 0  }
 0x254   : > { %s3194_s6 = scalar_lea.hbm %s6568_s4, %s3383_s13  ;;  %s3211_s29 = sshll.u32 %s3980_s23, 4  ;;  %s3212_s29 = int_to_ptr.vmem [resolvable:$true] %s3211_s29 }
 0x255   : > { %s3570_s16 = smov 4096   ;;  %s3571_s18 = smov 8192  }
 0x256   : > { %3415 = sst [smem:[#allocation19]] (%p3661_p12), %s3570_s16  ;;  %s3572_s5 = smov 16  }
 0x257   : > { %3416 = sst [smem:[#allocation19 + $0x1]] (%p3661_p12), %s3571_s18  ;;  %s3573_s15 = smov 256  }
 0x258   : > { %3417 = sst [smem:[#allocation19 + $0x2]] (%p3661_p12), %s3572_s5  ;;  %s3574_s20 = smov [#allocation18]  }
 0x259   : > { %3418 = sst [smem:[#allocation19 + $0x3]] (%p3661_p12), %s3573_s15  ;;  %s3575_s13 = smov 0  }
 0x25a   : > { %3419 = sst [smem:[#allocation19 + $0x4]] (%p3661_p12), %s3573_s15 }
 0x25b   : > { %3420 = sst [smem:[#allocation19 + $0x5]] (%p3661_p12), %s3572_s5 }
 0x25c   : > { %3421 = dma.general (%p3661_p12), %s3212_s29, 12288, %s3194_s6, %s3135_s1, %s3574_s20, [#allocation19], %s3575_s13, 0  }
 0x25d PF: > { %s3239_s23 = sand.u32 1, %s3536_s25   ;;  %p3425_p5 = pnand %p3354_p0, %p3665_p13 }
 0x25e   : > { %s3240_s12 = scalar_lea.sflag [#allocation6], %s3239_s23 }
 0x25f   : > { %3527 = dma.done.wait (!%p3425_p5), %s3240_s12, 36864  }
 0x260   : > { %3529 = vsyncadd (!%p3425_p5), %s3240_s12, 4294930432  ;;  %s3249_s21 = scalar_lea.sflag [#allocation11], %s3239_s23 }
 0x261   : > { %3531 = dma.done.wait (!%p3425_p5), %s3249_s21, 12288  }
 0x262   : > { %3533 = vsyncadd (!%p3425_p5), %s3249_s21, 4294955008  ;;  %p28_p6 = scmp.ge.s32.totalorder %s3638_s30, 4   ;;  %s7355_s25 = smov %s3540_s26 }
 0x263   : > { %s7356_s26 = smov %s3544_s27  ;;  %s7357_s27 = smov %s3650_s7 }
 0x264   : > { %s7358_s28 = smov %s3638_s30  ;;  %30 = sbr.rel (!%p28_p6) target bundleno = 21 (0x15), region = 127 }
 0x26b   :  { %3254 = vsyncpa [#allocation5], 1 }
 0x26c   :  { %3256 = vsyncpa [#allocation5 + $0x1], 1 }
 0x26d   :  { %3257 = vsyncpa [#allocation8], 1 }
 0x26e   :  { %3259 = vsyncpa [#allocation8 + $0x1], 1 }
 0x26f   :  { %3260 = vsyncpa [#allocation6], 1 }
 0x270   :  { %3262 = vsyncpa [#allocation6 + $0x1], 1 }
 0x271   :  { %3263 = vsyncpa [#allocation11], 1 }
 0x272   :  { %3265 = vsyncpa [#allocation11 + $0x1], 1 }

</bundles_post_ra>
